<compile_context>
chip_gen: v6e
topology: v6e:2x2x1
jax: 0.10.0
libtpu: 0.0.40
codegen_flags: <defaults>
</compile_context>

<pallas_src>
import jax
import jax.numpy as jnp
import numpy as np
from jax.experimental import pallas as pl
from jax.experimental.pallas import tpu as pltpu


# ----------------------------------------------------------------------------
# Small shared helpers
# ----------------------------------------------------------------------------
def _leaky(x, slope):
    return jnp.where(x >= 0, x, slope * x)


# ----------------------------------------------------------------------------
# Pallas kernel: full LFA block for one (batch, point-tile) grid step.
# All slabs are channels-first: (C, T) with T points on the 128-lane axis.
# ----------------------------------------------------------------------------
def _lfa_kernel(geom_ref, feat_ref, w_mlp1_ref, w_geo_ref, w_logit_ref,
                w_s1_ref, w_s2_ref, w_fin_ref, bias_ref, out_ref):
    bf16 = jnp.bfloat16
    K = geom_ref.shape[1]                  # geometry block: (1, K, 10, T)
    dh = w_mlp1_ref.shape[0]               # d_out // 2
    d_out = 2 * dh

    # Static row offsets inside the packed (10*dh, 1) bias column.
    o_mlp1 = 0
    o_geo = o_mlp1 + dh
    o_p1 = o_geo + 2 * dh
    o_p2 = o_p1 + dh
    o_fin = o_p2 + d_out

    def bias(off, c):
        return bias_ref[off:off + c, :]     # (c, 1) f32, broadcasts over lanes

    def mm(w_bf, x_bf):                     # MXU matmul: bf16 operands, f32 accumulation
        return jnp.dot(w_bf, x_bf, preferred_element_type=jnp.float32)

    feat_bf = feat_ref[0]                   # (d_in, T) bf16

    # mlp1 + LeakyReLU(0.2)
    x1 = _leaky(mm(w_mlp1_ref[...], feat_bf) + bias(o_mlp1, dh), 0.2)      # (dh, T) f32
    x1_bf = x1.astype(bf16)

    # Shared geometry MLP (LSE1|LSE2 weights fused, BN folded) + hoisted score logits.
    # The logit matmul is one block-diagonal (2dh, 2dh) matmul per neighbor so the
    # stage-2 logits are produced up-front (no serial dependence on x2).
    w_geo = w_geo_ref[...]                  # (2*dh, 10)  bf16
    w_logit = w_logit_ref[...]              # (2*dh, 2*dh) bf16, block-diag [Ws1_g^T, Ws2_g^T]
    b_geo = bias(o_geo, 2 * dh)
    h1, h2, lg1, lg2 = [], [], [], []
    for k in range(K):
        gk = geom_ref[0, k]                                                 # (10, T) bf16
        hk = jnp.maximum(mm(w_geo, gk) + b_geo, 0.0)                        # (2*dh, T) f32
        lgk = mm(w_logit, hk.astype(bf16))                                  # (2*dh, T) f32
        h1.append(hk[:dh])
        h2.append(hk[dh:])
        lg1.append(lgk[:dh])
        lg2.append(lgk[dh:])

    def attentive_stage(lg, h, x_bf, w_s_ref, b_pool):
        # Score logits' feature rows are K-independent (cancel in the softmax) and the
        # feature half of the pooled vector collapses to x itself, so only the geometry
        # logits drive the softmax and only W_pool's feature rows ever touch x.
        featc = mm(w_s_ref[1], x_bf)                                        # (c_out, T)
        m = lg[0]
        for k in range(1, K):
            m = jnp.maximum(m, lg[k])
        z = jnp.zeros_like(m)
        wsum = jnp.zeros_like(m)
        for k in range(K):
            e = jnp.exp(lg[k] - m)
            z = z + e
            wsum = wsum + e * h[k]
        pooled = (wsum * pl.reciprocal(z, approx=True)).astype(jnp.bfloat16)  # (dh, T)
        out = mm(w_s_ref[0], pooled) + featc + b_pool
        return jnp.maximum(out, 0.0)                                        # SharedMLP+ReLU

    x2 = attentive_stage(lg1, h1, x1_bf, w_s1_ref, bias(o_p1, dh))          # (dh, T)
    x3 = attentive_stage(lg2, h2, x2.astype(bf16), w_s2_ref, bias(o_p2, d_out))  # (d_out, T)

    # mlp2 + shortcut merged into one matmul on [x3 ; feat], then LeakyReLU(0.01).
    xcat = jnp.concatenate([x3.astype(bf16), feat_bf], axis=0)              # (d_out+d_in, T)
    y = mm(w_fin_ref[...], xcat) + bias(o_fin, 2 * d_out)
    out_ref[0] = _leaky(y, 0.01).astype(out_ref.dtype)


# ----------------------------------------------------------------------------
# Wrapper-side glue: knn, geometry build, weight packing, tile planning
# ----------------------------------------------------------------------------
def knn_jax(coords, k):
    """Brute-force kNN. coords: (B, N, 3) -> idx (B, N, K) int32, squared dists (B, N, K)."""
    d2 = jnp.sum((coords[:, :, None, :] - coords[:, None, :, :]) ** 2, axis=-1)
    neg_d, idx = jax.lax.top_k(-d2, k)
    return idx.astype(jnp.int32), -neg_d


def _build_geometry(coords, idx, dist):
    """(B,N,3),(B,N,K),(B,N,K) -> (B, K, 10, N) bf16 relative-position encoding.

    Assembled directly in the kernel-facing layout (K leading, channels on sublanes,
    points last) so no full-slab transpose pass is needed after the concat.
    """
    B, N, K = idx.shape
    coords_t = jnp.transpose(coords, (0, 2, 1))                       # (B, 3, N)  tiny
    idx_t = jnp.transpose(idx, (0, 2, 1))                             # (B, K, N)  tiny
    nbr = jax.vmap(lambda ct, it: ct[:, it])(coords_t, idx_t)         # (B, 3, K, N) gather
    nbr = jnp.transpose(nbr, (0, 2, 1, 3))                            # (B, K, 3, N)
    ctr = jnp.broadcast_to(coords_t[:, None], (B, K, 3, N))
    dist_t = jnp.transpose(dist, (0, 2, 1))[:, :, None, :]            # (B, K, 1, N)
    geom = jnp.concatenate([ctr, nbr, ctr - nbr, dist_t], axis=2)     # (B, K, 10, N)
    return geom.astype(jnp.bfloat16)


def _pack_weights(p, d_in, d_out):
    """Fold BN/bias, fuse LSE/score/pool/final weights, transpose to channels-first."""
    dh = d_out // 2
    bf16, f32 = jnp.bfloat16, jnp.float32

    def fold(W, b, s, t):                  # s*(x@W+b)+t == x@(W*s) + (b*s+t)
        return W * s[None, :], b * s + t

    Wg1, cg1 = fold(p["W_lse1"], p["b_lse1"], p["s_lse1"], p["t_lse1"])
    Wg2, cg2 = fold(p["W_lse2"], p["b_lse2"], p["s_lse2"], p["t_lse2"])
    w_geo_t = jnp.concatenate([Wg1, Wg2], axis=1).T                   # (2*dh, 10)

    Wp1, cp1 = fold(p["W_pmlp1"], p["b_pmlp1"], p["s_pmlp1"], p["t_pmlp1"])   # (d_out, dh)
    Wp2, cp2 = fold(p["W_pmlp2"], p["b_pmlp2"], p["s_pmlp2"], p["t_pmlp2"])   # (d_out, d_out)
    Wsc, csc = fold(p["W_sc"], p["b_sc"], p["s_sc"], p["t_sc"])               # (d_in, 2*d_out)

    # Only the geometry block of each score Linear influences the output: feature-row
    # logits cancel in the softmax over K, and the feature half of the pooled vector
    # collapses to the features themselves.
    w_logit = jnp.zeros((2 * dh, 2 * dh), f32)
    w_logit = w_logit.at[:dh, :dh].set(p["W_score1"][:dh, :dh].T)
    w_logit = w_logit.at[dh:, dh:].set(p["W_score2"][:dh, :dh].T)

    w_s1 = jnp.stack([Wp1[:dh, :].T, Wp1[dh:, :].T])                  # (2, dh, dh)
    w_s2 = jnp.stack([Wp2[:dh, :].T, Wp2[dh:, :].T])                  # (2, d_out, dh)
    w_fin = jnp.concatenate([p["W_mlp2"].T, Wsc.T], axis=1)           # (2*d_out, d_out+d_in)
    w_mlp1_t = p["W_mlp1"].T                                          # (dh, d_in)

    bias_col = jnp.concatenate(
        [p["b_mlp1"], cg1, cg2, cp1, cp2, p["b_mlp2"] + csc]).astype(f32)[:, None]

    return (w_mlp1_t.astype(bf16), w_geo_t.astype(bf16), w_logit.astype(bf16),
            w_s1.astype(bf16), w_s2.astype(bf16), w_fin.astype(bf16), bias_col)


def _vmem_capacity_bytes():
    default = 64 << 20                      # v7x floor: safe on every generation
    get_info = getattr(pltpu, "get_tpu_info", None)
    if get_info is None:
        return default
    try:
        cap = getattr(get_info(), "vmem_capacity_bytes", None)
        return int(cap) if cap else default
    except Exception:
        return default


def _plan_tiles(B, N, K, d_in, d_out, out_bytes):
    """Pick point-tile width (multiple of 128) and vmem limit from hardware capacity."""
    dh = d_out // 2
    cap = _vmem_capacity_bytes()
    vmem_limit = int(min(cap * 3 // 4, 100 << 20))   # ~96 MiB on v5e/v6e, 48 MiB on v7x
    tile_budget = int(min(cap // 4, 32 << 20))       # ~32 MiB on v5e/v6e, 16 MiB on v7x
    # Dominant per-point-column VMEM footprint (double-buffered IO + f32 working slabs).
    per_point = (2 * 2 * (K * 10)                    # geometry (bf16, double-buffered)
                 + 2 * 2 * d_in                      # features (bf16, double-buffered)
                 + 2 * out_bytes * 2 * d_out         # output (double-buffered)
                 + 4 * 2 * K * 2 * dh                # h + hoisted-logit stacks (f32)
                 + 4 * 24 * dh)                      # softmax / pooling working slabs (f32)
    n_pad = ((N + 127) // 128) * 128
    max_tile = max(128, min(n_pad, (tile_budget // per_point) // 128 * 128))
    tiles = [t for t in range(128, n_pad + 1, 128) if n_pad % t == 0 and t <= max_tile]
    if not tiles:
        tiles = [min(128, n_pad)]
    tile = max(tiles)
    # Keep >= 2 grid steps when possible so both v7x TensorCores get work.
    if B * (n_pad // tile) < 2:
        balanced = [t for t in tiles if B * (n_pad // t) >= 2]
        if balanced:
            tile = max(balanced)
    return n_pad, tile, vmem_limit


def local_feature_aggregation(coords, features, params, num_neighbors,
                              tile_n=None, out_dtype=jnp.float32):
    """coords: (B, N, 3), features: (B, d_in, N, 1) -> (B, 2*d_out, N, 1)."""
    B, N, _ = coords.shape
    d_in = features.shape[1]
    d_out = params["W_mlp2"].shape[0]
    K = num_neighbors

    idx, dist = knn_jax(coords, K)                                   # external-knn glue
    geom = _build_geometry(coords, idx, dist)                        # (B, K, 10, N) bf16
    feat_cf = features[..., 0].astype(jnp.bfloat16)                  # (B, d_in, N), native order

    out_bytes = jnp.dtype(out_dtype).itemsize
    n_pad, tile, vmem_limit = _plan_tiles(B, N, K, d_in, d_out, out_bytes)
    if tile_n is not None:
        tile = tile_n
    if n_pad != N:                                                   # lane-pad arbitrary N
        geom = jnp.pad(geom, ((0, 0), (0, 0), (0, 0), (0, n_pad - N)))
        feat_cf = jnp.pad(feat_cf, ((0, 0), (0, 0), (0, n_pad - N)))
    assert n_pad % tile == 0, (n_pad, tile)

    packed = _pack_weights(params, d_in, d_out)

    def _full(w):
        return pl.BlockSpec(w.shape, lambda b, t, _nd=w.ndim: (0,) * _nd)

    in_specs = [
        pl.BlockSpec((1, K, 10, tile), lambda b, t: (b, 0, 0, t)),   # geometry tile
        pl.BlockSpec((1, d_in, tile), lambda b, t: (b, 0, t)),       # feature tile
    ] + [_full(w) for w in packed]                                   # resident weights/bias
    out_spec = pl.BlockSpec((1, 2 * d_out, tile), lambda b, t: (b, 0, t))

    out_cf = pl.pallas_call(
        _lfa_kernel,
        out_shape=jax.ShapeDtypeStruct((B, 2 * d_out, n_pad), out_dtype),
        grid_spec=pltpu.PrefetchScalarGridSpec(
            num_scalar_prefetch=0,
            grid=(B, n_pad // tile),
            in_specs=in_specs,
            out_specs=out_spec,
        ),
        compiler_params=pltpu.CompilerParams(
            dimension_semantics=("parallel", "parallel"),
            vmem_limit_bytes=vmem_limit,
        ),
    )(geom, feat_cf, *packed)

    if n_pad != N:
        out_cf = out_cf[:, :, :N]
    return out_cf[..., None]                                         # (B, 2*d_out, N, 1)


# ----------------------------------------------------------------------------
# Pure-JAX reference (unfused / unfolded math) for validation
# ----------------------------------------------------------------------------
def _lfa_reference_single(coords, idx, dist, feat, p):
    N, K = idx.shape

    def bn(x, s, t):
        return x * s + t

    x = _leaky(feat @ p["W_mlp1"] + p["b_mlp1"], 0.2)

    nbr = coords[idx]                                                # (N, K, 3)
    ctr = jnp.broadcast_to(coords[:, None, :], (N, K, 3))
    geom = jnp.concatenate([ctr, nbr, ctr - nbr, dist[..., None]], axis=-1)  # (N, K, 10)

    def lse(xf, W, b, s, t):
        h = jnp.maximum(bn(geom @ W + b, s, t), 0.0)                 # (N, K, dh)
        xe = jnp.broadcast_to(xf[:, None, :], (N, K, xf.shape[-1]))
        return jnp.concatenate([h, xe], axis=-1)                     # (N, K, d)

    def attentive_pool(y, Wsc, Wm, bm, sm, tm):
        scores = jax.nn.softmax(y @ Wsc, axis=1)                     # softmax over K
        pooled = jnp.sum(scores * y, axis=1)                         # (N, d)
        return jnp.maximum(bn(pooled @ Wm + bm, sm, tm), 0.0)

    y = lse(x, p["W_lse1"], p["b_lse1"], p["s_lse1"], p["t_lse1"])
    x = attentive_pool(y, p["W_score1"], p["W_pmlp1"], p["b_pmlp1"], p["s_pmlp1"], p["t_pmlp1"])
    y = lse(x, p["W_lse2"], p["b_lse2"], p["s_lse2"], p["t_lse2"])
    x = attentive_pool(y, p["W_score2"], p["W_pmlp2"], p["b_pmlp2"], p["s_pmlp2"], p["t_pmlp2"])

    main = x @ p["W_mlp2"] + p["b_mlp2"]
    short = bn(feat @ p["W_sc"] + p["b_sc"], p["s_sc"], p["t_sc"])
    return _leaky(main + short, 0.01)


def reference_forward(coords, features, params, num_neighbors):
    idx, dist = knn_jax(coords, num_neighbors)
    feat_nl = jnp.transpose(features[..., 0], (0, 2, 1))
    out_nl = jax.vmap(lambda c, i, d, f: _lfa_reference_single(c, i, d, f, params))(
        coords, idx, dist, feat_nl)
    return jnp.transpose(out_nl, (0, 2, 1))[..., None]


# ----------------------------------------------------------------------------
# Deterministic parameter init (shapes implied by the PyTorch __init__)
# ----------------------------------------------------------------------------
def init_params(key, d_in, d_out):
    dh = d_out // 2
    keys = iter(jax.random.split(key, 64))

    def w(shape, scale=0.1):
        return (scale * jax.random.normal(next(keys), shape)).astype(jnp.float32)

    def bn_params(c):   # BatchNorm2d(c, eps=1e-6) in eval mode, expressed as scale/shift
        gamma = 1.0 + 0.05 * jax.random.normal(next(keys), (c,))
        beta = 0.05 * jax.random.normal(next(keys), (c,))
        scale = (gamma / jnp.sqrt(1.0 + 1e-6)).astype(jnp.float32)
        shift = beta.astype(jnp.float32)
        return scale, shift

    p = {}
    p["W_mlp1"], p["b_mlp1"] = w((d_in, dh)), w((dh,), 0.05)
    p["W_lse1"], p["b_lse1"] = w((10, dh)), w((dh,), 0.05)
    p["s_lse1"], p["t_lse1"] = bn_params(dh)
    p["W_score1"] = w((d_out, d_out))
    p["W_pmlp1"], p["b_pmlp1"] = w((d_out, dh)), w((dh,), 0.05)
    p["s_pmlp1"], p["t_pmlp1"] = bn_params(dh)
    p["W_lse2"], p["b_lse2"] = w((10, dh)), w((dh,), 0.05)
    p["s_lse2"], p["t_lse2"] = bn_params(dh)
    p["W_score2"] = w((d_out, d_out))
    p["W_pmlp2"], p["b_pmlp2"] = w((d_out, d_out)), w((d_out,), 0.05)
    p["s_pmlp2"], p["t_pmlp2"] = bn_params(d_out)
    p["W_mlp2"], p["b_mlp2"] = w((d_out, 2 * d_out)), w((2 * d_out,), 0.05)
    p["W_sc"], p["b_sc"] = w((d_in, 2 * d_out)), w((2 * d_out,), 0.05)
    p["s_sc"], p["t_sc"] = bn_params(2 * d_out)
    return p


if __name__ == "__main__":
    B, N, K = 2, 512, 8
    d_in, d_out = 8, 32

    key = jax.random.PRNGKey(0)
    kc, kf, kp = jax.random.split(key, 3)
    coords = jax.random.normal(kc, (B, N, 3), dtype=jnp.float32)
    features = jax.random.normal(kf, (B, d_in, N, 1), dtype=jnp.float32)
    params = init_params(kp, d_in, d_out)

    out = jax.block_until_ready(local_feature_aggregation(coords, features, params, K))
    assert out.shape == (B, 2 * d_out, N, 1), out.shape
    assert bool(jnp.all(jnp.isfinite(out)))

    ref = jax.block_until_ready(reference_forward(coords, features, params, K))
    if not np.allclose(np.asarray(out), np.asarray(ref), rtol=5e-2, atol=5e-2):
        raise AssertionError("Pallas kernel output mismatch vs pure-JAX reference")

    print("KERNEL_OK")
</pallas_src>

<mosaic_0001>
module attributes {stable_mosaic.version = 11 : i64} {
  func.func @_lfa_kernel(%arg0: i32, %arg1: i32, %arg2: memref<1x8x10x512xbf16, #tpu.memory_space<vmem>>, %arg3: memref<1x8x512xbf16, #tpu.memory_space<vmem>>, %arg4: memref<16x8xbf16, #tpu.memory_space<vmem>>, %arg5: memref<32x10xbf16, #tpu.memory_space<vmem>>, %arg6: memref<32x32xbf16, #tpu.memory_space<vmem>>, %arg7: memref<2x16x16xbf16, #tpu.memory_space<vmem>>, %arg8: memref<2x32x16xbf16, #tpu.memory_space<vmem>>, %arg9: memref<64x40xbf16, #tpu.memory_space<vmem>>, %arg10: memref<160x1xf32, #tpu.memory_space<vmem>>, %arg11: memref<1x64x512xf32, #tpu.memory_space<vmem>>) attributes {dimension_semantics = [#tpu.dimension_semantics<parallel>, #tpu.dimension_semantics<parallel>], iteration_bounds = array<i64: 2, 1>, scalar_prefetch = 0 : i64, scratch_operands = 0 : i64, tpu.core_type = #tpu.core_type<tc>, window_params = [{transform_indices = @transform_0, window_bounds = array<i64: 1, 8, 10, 512>}, {transform_indices = @transform_1, window_bounds = array<i64: 1, 8, 512>}, {pipeline_mode = #tpu.pipeline_mode<synchronous>, transform_indices = @transform_2, window_bounds = array<i64: 16, 8>}, {pipeline_mode = #tpu.pipeline_mode<synchronous>, transform_indices = @transform_3, window_bounds = array<i64: 32, 10>}, {pipeline_mode = #tpu.pipeline_mode<synchronous>, transform_indices = @transform_4, window_bounds = array<i64: 32, 32>}, {pipeline_mode = #tpu.pipeline_mode<synchronous>, transform_indices = @transform_5, window_bounds = array<i64: 2, 16, 16>}, {pipeline_mode = #tpu.pipeline_mode<synchronous>, transform_indices = @transform_6, window_bounds = array<i64: 2, 32, 16>}, {pipeline_mode = #tpu.pipeline_mode<synchronous>, transform_indices = @transform_7, window_bounds = array<i64: 64, 40>}, {pipeline_mode = #tpu.pipeline_mode<synchronous>, transform_indices = @transform_8, window_bounds = array<i64: 160, 1>}, {transform_indices = @transform_9, window_bounds = array<i64: 1, 64, 512>}]} {
    %c0 = arith.constant 0 : index
    %c0_0 = arith.constant 0 : index
    %c0_1 = arith.constant 0 : index
    %0 = vector.load %arg3[%c0, %c0_0, %c0_1] : memref<1x8x512xbf16, #tpu.memory_space<vmem>>, vector<1x8x512xbf16>
    %1 = vector.shape_cast %0 : vector<1x8x512xbf16> to vector<8x512xbf16>
    %c0_2 = arith.constant 0 : index
    %c0_3 = arith.constant 0 : index
    %2 = vector.load %arg4[%c0_2, %c0_3] : memref<16x8xbf16, #tpu.memory_space<vmem>>, vector<16x8xbf16>
    %cst = arith.constant dense<0.000000e+00> : vector<16x512xf32>
    %3 = tpu.matmul %2, %1, %cst {dimension_numbers = #tpu.dot_dimension_numbers<[1], [0], [0], [1], [0, 0, 1, 1], [], []>} : vector<16x8xbf16>, vector<8x512xbf16>, vector<16x512xf32> -> vector<16x512xf32>
    %c0_4 = arith.constant 0 : index
    %c0_5 = arith.constant 0 : index
    %4 = vector.load %arg10[%c0_4, %c0_5] : memref<160x1xf32, #tpu.memory_space<vmem>>, vector<16x1xf32>
    %5 = vector.broadcast %4 : vector<16x1xf32> to vector<16x512xf32>
    %6 = arith.addf %3, %5 : vector<16x512xf32>
    %cst_6 = arith.constant 0.000000e+00 : f32
    %7 = vector.broadcast %cst_6 : f32 to vector<16x512xf32>
    %8 = arith.cmpf oge, %6, %7 : vector<16x512xf32>
    %cst_7 = arith.constant 2.000000e-01 : f32
    %9 = vector.broadcast %cst_7 : f32 to vector<16x512xf32>
    %10 = arith.mulf %9, %6 : vector<16x512xf32>
    %11 = arith.select %8, %6, %10 : vector<16x512xi1>, vector<16x512xf32>
    %12 = arith.truncf %11 : vector<16x512xf32> to vector<16x512xbf16>
    %c0_8 = arith.constant 0 : index
    %c0_9 = arith.constant 0 : index
    %13 = vector.load %arg5[%c0_8, %c0_9] : memref<32x10xbf16, #tpu.memory_space<vmem>>, vector<32x10xbf16>
    %c0_10 = arith.constant 0 : index
    %c0_11 = arith.constant 0 : index
    %14 = vector.load %arg6[%c0_10, %c0_11] : memref<32x32xbf16, #tpu.memory_space<vmem>>, vector<32x32xbf16>
    %c16 = arith.constant 16 : index
    %c0_12 = arith.constant 0 : index
    %15 = vector.load %arg10[%c16, %c0_12] : memref<160x1xf32, #tpu.memory_space<vmem>>, vector<32x1xf32>
    %c0_13 = arith.constant 0 : index
    %c0_14 = arith.constant 0 : index
    %c0_15 = arith.constant 0 : index
    %c0_16 = arith.constant 0 : index
    %16 = vector.load %arg2[%c0_13, %c0_14, %c0_15, %c0_16] : memref<1x8x10x512xbf16, #tpu.memory_space<vmem>>, vector<1x1x10x512xbf16>
    %17 = vector.shape_cast %16 : vector<1x1x10x512xbf16> to vector<10x512xbf16>
    %cst_17 = arith.constant dense<0.000000e+00> : vector<32x512xf32>
    %18 = tpu.matmul %13, %17, %cst_17 {dimension_numbers = #tpu.dot_dimension_numbers<[1], [0], [0], [1], [0, 0, 1, 1], [], []>} : vector<32x10xbf16>, vector<10x512xbf16>, vector<32x512xf32> -> vector<32x512xf32>
    %19 = vector.broadcast %15 : vector<32x1xf32> to vector<32x512xf32>
    %20 = arith.addf %18, %19 : vector<32x512xf32>
    %cst_18 = arith.constant 0.000000e+00 : f32
    %21 = vector.broadcast %cst_18 : f32 to vector<32x512xf32>
    %22 = arith.maximumf %20, %21 : vector<32x512xf32>
    %23 = arith.truncf %22 : vector<32x512xf32> to vector<32x512xbf16>
    %cst_19 = arith.constant dense<0.000000e+00> : vector<32x512xf32>
    %24 = tpu.matmul %14, %23, %cst_19 {dimension_numbers = #tpu.dot_dimension_numbers<[1], [0], [0], [1], [0, 0, 1, 1], [], []>} : vector<32x32xbf16>, vector<32x512xbf16>, vector<32x512xf32> -> vector<32x512xf32>
    %25 = vector.extract_strided_slice %22 {offsets = [0, 0], sizes = [16, 512], strides = [1, 1]} : vector<32x512xf32> to vector<16x512xf32>
    %26 = vector.extract_strided_slice %22 {offsets = [16, 0], sizes = [16, 512], strides = [1, 1]} : vector<32x512xf32> to vector<16x512xf32>
    %27 = vector.extract_strided_slice %24 {offsets = [0, 0], sizes = [16, 512], strides = [1, 1]} : vector<32x512xf32> to vector<16x512xf32>
    %28 = vector.extract_strided_slice %24 {offsets = [16, 0], sizes = [16, 512], strides = [1, 1]} : vector<32x512xf32> to vector<16x512xf32>
    %c0_20 = arith.constant 0 : index
    %c1 = arith.constant 1 : index
    %c0_21 = arith.constant 0 : index
    %c0_22 = arith.constant 0 : index
    %29 = vector.load %arg2[%c0_20, %c1, %c0_21, %c0_22] : memref<1x8x10x512xbf16, #tpu.memory_space<vmem>>, vector<1x1x10x512xbf16>
    %30 = vector.shape_cast %29 : vector<1x1x10x512xbf16> to vector<10x512xbf16>
    %cst_23 = arith.constant dense<0.000000e+00> : vector<32x512xf32>
    %31 = tpu.matmul %13, %30, %cst_23 {dimension_numbers = #tpu.dot_dimension_numbers<[1], [0], [0], [1], [0, 0, 1, 1], [], []>} : vector<32x10xbf16>, vector<10x512xbf16>, vector<32x512xf32> -> vector<32x512xf32>
    %32 = vector.broadcast %15 : vector<32x1xf32> to vector<32x512xf32>
    %33 = arith.addf %31, %32 : vector<32x512xf32>
    %cst_24 = arith.constant 0.000000e+00 : f32
    %34 = vector.broadcast %cst_24 : f32 to vector<32x512xf32>
    %35 = arith.maximumf %33, %34 : vector<32x512xf32>
    %36 = arith.truncf %35 : vector<32x512xf32> to vector<32x512xbf16>
    %cst_25 = arith.constant dense<0.000000e+00> : vector<32x512xf32>
    %37 = tpu.matmul %14, %36, %cst_25 {dimension_numbers = #tpu.dot_dimension_numbers<[1], [0], [0], [1], [0, 0, 1, 1], [], []>} : vector<32x32xbf16>, vector<32x512xbf16>, vector<32x512xf32> -> vector<32x512xf32>
    %38 = vector.extract_strided_slice %35 {offsets = [0, 0], sizes = [16, 512], strides = [1, 1]} : vector<32x512xf32> to vector<16x512xf32>
    %39 = vector.extract_strided_slice %35 {offsets = [16, 0], sizes = [16, 512], strides = [1, 1]} : vector<32x512xf32> to vector<16x512xf32>
    %40 = vector.extract_strided_slice %37 {offsets = [0, 0], sizes = [16, 512], strides = [1, 1]} : vector<32x512xf32> to vector<16x512xf32>
    %41 = vector.extract_strided_slice %37 {offsets = [16, 0], sizes = [16, 512], strides = [1, 1]} : vector<32x512xf32> to vector<16x512xf32>
    %c0_26 = arith.constant 0 : index
    %c2 = arith.constant 2 : index
    %c0_27 = arith.constant 0 : index
    %c0_28 = arith.constant 0 : index
    %42 = vector.load %arg2[%c0_26, %c2, %c0_27, %c0_28] : memref<1x8x10x512xbf16, #tpu.memory_space<vmem>>, vector<1x1x10x512xbf16>
    %43 = vector.shape_cast %42 : vector<1x1x10x512xbf16> to vector<10x512xbf16>
    %cst_29 = arith.constant dense<0.000000e+00> : vector<32x512xf32>
    %44 = tpu.matmul %13, %43, %cst_29 {dimension_numbers = #tpu.dot_dimension_numbers<[1], [0], [0], [1], [0, 0, 1, 1], [], []>} : vector<32x10xbf16>, vector<10x512xbf16>, vector<32x512xf32> -> vector<32x512xf32>
    %45 = vector.broadcast %15 : vector<32x1xf32> to vector<32x512xf32>
    %46 = arith.addf %44, %45 : vector<32x512xf32>
    %cst_30 = arith.constant 0.000000e+00 : f32
    %47 = vector.broadcast %cst_30 : f32 to vector<32x512xf32>
    %48 = arith.maximumf %46, %47 : vector<32x512xf32>
    %49 = arith.truncf %48 : vector<32x512xf32> to vector<32x512xbf16>
    %cst_31 = arith.constant dense<0.000000e+00> : vector<32x512xf32>
    %50 = tpu.matmul %14, %49, %cst_31 {dimension_numbers = #tpu.dot_dimension_numbers<[1], [0], [0], [1], [0, 0, 1, 1], [], []>} : vector<32x32xbf16>, vector<32x512xbf16>, vector<32x512xf32> -> vector<32x512xf32>
    %51 = vector.extract_strided_slice %48 {offsets = [0, 0], sizes = [16, 512], strides = [1, 1]} : vector<32x512xf32> to vector<16x512xf32>
    %52 = vector.extract_strided_slice %48 {offsets = [16, 0], sizes = [16, 512], strides = [1, 1]} : vector<32x512xf32> to vector<16x512xf32>
    %53 = vector.extract_strided_slice %50 {offsets = [0, 0], sizes = [16, 512], strides = [1, 1]} : vector<32x512xf32> to vector<16x512xf32>
    %54 = vector.extract_strided_slice %50 {offsets = [16, 0], sizes = [16, 512], strides = [1, 1]} : vector<32x512xf32> to vector<16x512xf32>
    %c0_32 = arith.constant 0 : index
    %c3 = arith.constant 3 : index
    %c0_33 = arith.constant 0 : index
    %c0_34 = arith.constant 0 : index
    %55 = vector.load %arg2[%c0_32, %c3, %c0_33, %c0_34] : memref<1x8x10x512xbf16, #tpu.memory_space<vmem>>, vector<1x1x10x512xbf16>
    %56 = vector.shape_cast %55 : vector<1x1x10x512xbf16> to vector<10x512xbf16>
    %cst_35 = arith.constant dense<0.000000e+00> : vector<32x512xf32>
    %57 = tpu.matmul %13, %56, %cst_35 {dimension_numbers = #tpu.dot_dimension_numbers<[1], [0], [0], [1], [0, 0, 1, 1], [], []>} : vector<32x10xbf16>, vector<10x512xbf16>, vector<32x512xf32> -> vector<32x512xf32>
    %58 = vector.broadcast %15 : vector<32x1xf32> to vector<32x512xf32>
    %59 = arith.addf %57, %58 : vector<32x512xf32>
    %cst_36 = arith.constant 0.000000e+00 : f32
    %60 = vector.broadcast %cst_36 : f32 to vector<32x512xf32>
    %61 = arith.maximumf %59, %60 : vector<32x512xf32>
    %62 = arith.truncf %61 : vector<32x512xf32> to vector<32x512xbf16>
    %cst_37 = arith.constant dense<0.000000e+00> : vector<32x512xf32>
    %63 = tpu.matmul %14, %62, %cst_37 {dimension_numbers = #tpu.dot_dimension_numbers<[1], [0], [0], [1], [0, 0, 1, 1], [], []>} : vector<32x32xbf16>, vector<32x512xbf16>, vector<32x512xf32> -> vector<32x512xf32>
    %64 = vector.extract_strided_slice %61 {offsets = [0, 0], sizes = [16, 512], strides = [1, 1]} : vector<32x512xf32> to vector<16x512xf32>
    %65 = vector.extract_strided_slice %61 {offsets = [16, 0], sizes = [16, 512], strides = [1, 1]} : vector<32x512xf32> to vector<16x512xf32>
    %66 = vector.extract_strided_slice %63 {offsets = [0, 0], sizes = [16, 512], strides = [1, 1]} : vector<32x512xf32> to vector<16x512xf32>
    %67 = vector.extract_strided_slice %63 {offsets = [16, 0], sizes = [16, 512], strides = [1, 1]} : vector<32x512xf32> to vector<16x512xf32>
    %c0_38 = arith.constant 0 : index
    %c4 = arith.constant 4 : index
    %c0_39 = arith.constant 0 : index
    %c0_40 = arith.constant 0 : index
    %68 = vector.load %arg2[%c0_38, %c4, %c0_39, %c0_40] : memref<1x8x10x512xbf16, #tpu.memory_space<vmem>>, vector<1x1x10x512xbf16>
    %69 = vector.shape_cast %68 : vector<1x1x10x512xbf16> to vector<10x512xbf16>
    %cst_41 = arith.constant dense<0.000000e+00> : vector<32x512xf32>
    %70 = tpu.matmul %13, %69, %cst_41 {dimension_numbers = #tpu.dot_dimension_numbers<[1], [0], [0], [1], [0, 0, 1, 1], [], []>} : vector<32x10xbf16>, vector<10x512xbf16>, vector<32x512xf32> -> vector<32x512xf32>
    %71 = vector.broadcast %15 : vector<32x1xf32> to vector<32x512xf32>
    %72 = arith.addf %70, %71 : vector<32x512xf32>
    %cst_42 = arith.constant 0.000000e+00 : f32
    %73 = vector.broadcast %cst_42 : f32 to vector<32x512xf32>
    %74 = arith.maximumf %72, %73 : vector<32x512xf32>
    %75 = arith.truncf %74 : vector<32x512xf32> to vector<32x512xbf16>
    %cst_43 = arith.constant dense<0.000000e+00> : vector<32x512xf32>
    %76 = tpu.matmul %14, %75, %cst_43 {dimension_numbers = #tpu.dot_dimension_numbers<[1], [0], [0], [1], [0, 0, 1, 1], [], []>} : vector<32x32xbf16>, vector<32x512xbf16>, vector<32x512xf32> -> vector<32x512xf32>
    %77 = vector.extract_strided_slice %74 {offsets = [0, 0], sizes = [16, 512], strides = [1, 1]} : vector<32x512xf32> to vector<16x512xf32>
    %78 = vector.extract_strided_slice %74 {offsets = [16, 0], sizes = [16, 512], strides = [1, 1]} : vector<32x512xf32> to vector<16x512xf32>
    %79 = vector.extract_strided_slice %76 {offsets = [0, 0], sizes = [16, 512], strides = [1, 1]} : vector<32x512xf32> to vector<16x512xf32>
    %80 = vector.extract_strided_slice %76 {offsets = [16, 0], sizes = [16, 512], strides = [1, 1]} : vector<32x512xf32> to vector<16x512xf32>
    %c0_44 = arith.constant 0 : index
    %c5 = arith.constant 5 : index
    %c0_45 = arith.constant 0 : index
    %c0_46 = arith.constant 0 : index
    %81 = vector.load %arg2[%c0_44, %c5, %c0_45, %c0_46] : memref<1x8x10x512xbf16, #tpu.memory_space<vmem>>, vector<1x1x10x512xbf16>
    %82 = vector.shape_cast %81 : vector<1x1x10x512xbf16> to vector<10x512xbf16>
    %cst_47 = arith.constant dense<0.000000e+00> : vector<32x512xf32>
    %83 = tpu.matmul %13, %82, %cst_47 {dimension_numbers = #tpu.dot_dimension_numbers<[1], [0], [0], [1], [0, 0, 1, 1], [], []>} : vector<32x10xbf16>, vector<10x512xbf16>, vector<32x512xf32> -> vector<32x512xf32>
    %84 = vector.broadcast %15 : vector<32x1xf32> to vector<32x512xf32>
    %85 = arith.addf %83, %84 : vector<32x512xf32>
    %cst_48 = arith.constant 0.000000e+00 : f32
    %86 = vector.broadcast %cst_48 : f32 to vector<32x512xf32>
    %87 = arith.maximumf %85, %86 : vector<32x512xf32>
    %88 = arith.truncf %87 : vector<32x512xf32> to vector<32x512xbf16>
    %cst_49 = arith.constant dense<0.000000e+00> : vector<32x512xf32>
    %89 = tpu.matmul %14, %88, %cst_49 {dimension_numbers = #tpu.dot_dimension_numbers<[1], [0], [0], [1], [0, 0, 1, 1], [], []>} : vector<32x32xbf16>, vector<32x512xbf16>, vector<32x512xf32> -> vector<32x512xf32>
    %90 = vector.extract_strided_slice %87 {offsets = [0, 0], sizes = [16, 512], strides = [1, 1]} : vector<32x512xf32> to vector<16x512xf32>
    %91 = vector.extract_strided_slice %87 {offsets = [16, 0], sizes = [16, 512], strides = [1, 1]} : vector<32x512xf32> to vector<16x512xf32>
    %92 = vector.extract_strided_slice %89 {offsets = [0, 0], sizes = [16, 512], strides = [1, 1]} : vector<32x512xf32> to vector<16x512xf32>
    %93 = vector.extract_strided_slice %89 {offsets = [16, 0], sizes = [16, 512], strides = [1, 1]} : vector<32x512xf32> to vector<16x512xf32>
    %c0_50 = arith.constant 0 : index
    %c6 = arith.constant 6 : index
    %c0_51 = arith.constant 0 : index
    %c0_52 = arith.constant 0 : index
    %94 = vector.load %arg2[%c0_50, %c6, %c0_51, %c0_52] : memref<1x8x10x512xbf16, #tpu.memory_space<vmem>>, vector<1x1x10x512xbf16>
    %95 = vector.shape_cast %94 : vector<1x1x10x512xbf16> to vector<10x512xbf16>
    %cst_53 = arith.constant dense<0.000000e+00> : vector<32x512xf32>
    %96 = tpu.matmul %13, %95, %cst_53 {dimension_numbers = #tpu.dot_dimension_numbers<[1], [0], [0], [1], [0, 0, 1, 1], [], []>} : vector<32x10xbf16>, vector<10x512xbf16>, vector<32x512xf32> -> vector<32x512xf32>
    %97 = vector.broadcast %15 : vector<32x1xf32> to vector<32x512xf32>
    %98 = arith.addf %96, %97 : vector<32x512xf32>
    %cst_54 = arith.constant 0.000000e+00 : f32
    %99 = vector.broadcast %cst_54 : f32 to vector<32x512xf32>
    %100 = arith.maximumf %98, %99 : vector<32x512xf32>
    %101 = arith.truncf %100 : vector<32x512xf32> to vector<32x512xbf16>
    %cst_55 = arith.constant dense<0.000000e+00> : vector<32x512xf32>
    %102 = tpu.matmul %14, %101, %cst_55 {dimension_numbers = #tpu.dot_dimension_numbers<[1], [0], [0], [1], [0, 0, 1, 1], [], []>} : vector<32x32xbf16>, vector<32x512xbf16>, vector<32x512xf32> -> vector<32x512xf32>
    %103 = vector.extract_strided_slice %100 {offsets = [0, 0], sizes = [16, 512], strides = [1, 1]} : vector<32x512xf32> to vector<16x512xf32>
    %104 = vector.extract_strided_slice %100 {offsets = [16, 0], sizes = [16, 512], strides = [1, 1]} : vector<32x512xf32> to vector<16x512xf32>
    %105 = vector.extract_strided_slice %102 {offsets = [0, 0], sizes = [16, 512], strides = [1, 1]} : vector<32x512xf32> to vector<16x512xf32>
    %106 = vector.extract_strided_slice %102 {offsets = [16, 0], sizes = [16, 512], strides = [1, 1]} : vector<32x512xf32> to vector<16x512xf32>
    %c0_56 = arith.constant 0 : index
    %c7 = arith.constant 7 : index
    %c0_57 = arith.constant 0 : index
    %c0_58 = arith.constant 0 : index
    %107 = vector.load %arg2[%c0_56, %c7, %c0_57, %c0_58] : memref<1x8x10x512xbf16, #tpu.memory_space<vmem>>, vector<1x1x10x512xbf16>
    %108 = vector.shape_cast %107 : vector<1x1x10x512xbf16> to vector<10x512xbf16>
    %cst_59 = arith.constant dense<0.000000e+00> : vector<32x512xf32>
    %109 = tpu.matmul %13, %108, %cst_59 {dimension_numbers = #tpu.dot_dimension_numbers<[1], [0], [0], [1], [0, 0, 1, 1], [], []>} : vector<32x10xbf16>, vector<10x512xbf16>, vector<32x512xf32> -> vector<32x512xf32>
    %110 = vector.broadcast %15 : vector<32x1xf32> to vector<32x512xf32>
    %111 = arith.addf %109, %110 : vector<32x512xf32>
    %cst_60 = arith.constant 0.000000e+00 : f32
    %112 = vector.broadcast %cst_60 : f32 to vector<32x512xf32>
    %113 = arith.maximumf %111, %112 : vector<32x512xf32>
    %114 = arith.truncf %113 : vector<32x512xf32> to vector<32x512xbf16>
    %cst_61 = arith.constant dense<0.000000e+00> : vector<32x512xf32>
    %115 = tpu.matmul %14, %114, %cst_61 {dimension_numbers = #tpu.dot_dimension_numbers<[1], [0], [0], [1], [0, 0, 1, 1], [], []>} : vector<32x32xbf16>, vector<32x512xbf16>, vector<32x512xf32> -> vector<32x512xf32>
    %116 = vector.extract_strided_slice %113 {offsets = [0, 0], sizes = [16, 512], strides = [1, 1]} : vector<32x512xf32> to vector<16x512xf32>
    %117 = vector.extract_strided_slice %113 {offsets = [16, 0], sizes = [16, 512], strides = [1, 1]} : vector<32x512xf32> to vector<16x512xf32>
    %118 = vector.extract_strided_slice %115 {offsets = [0, 0], sizes = [16, 512], strides = [1, 1]} : vector<32x512xf32> to vector<16x512xf32>
    %119 = vector.extract_strided_slice %115 {offsets = [16, 0], sizes = [16, 512], strides = [1, 1]} : vector<32x512xf32> to vector<16x512xf32>
    %c48 = arith.constant 48 : index
    %c0_62 = arith.constant 0 : index
    %120 = vector.load %arg10[%c48, %c0_62] : memref<160x1xf32, #tpu.memory_space<vmem>>, vector<16x1xf32>
    %c1_63 = arith.constant 1 : index
    %c0_64 = arith.constant 0 : index
    %c0_65 = arith.constant 0 : index
    %121 = vector.load %arg7[%c1_63, %c0_64, %c0_65] : memref<2x16x16xbf16, #tpu.memory_space<vmem>>, vector<1x16x16xbf16>
    %122 = vector.shape_cast %121 : vector<1x16x16xbf16> to vector<16x16xbf16>
    %cst_66 = arith.constant dense<0.000000e+00> : vector<16x512xf32>
    %123 = tpu.matmul %122, %12, %cst_66 {dimension_numbers = #tpu.dot_dimension_numbers<[1], [0], [0], [1], [0, 0, 1, 1], [], []>} : vector<16x16xbf16>, vector<16x512xbf16>, vector<16x512xf32> -> vector<16x512xf32>
    %124 = arith.maximumf %27, %40 : vector<16x512xf32>
    %125 = arith.maximumf %124, %53 : vector<16x512xf32>
    %126 = arith.maximumf %125, %66 : vector<16x512xf32>
    %127 = arith.maximumf %126, %79 : vector<16x512xf32>
    %128 = arith.maximumf %127, %92 : vector<16x512xf32>
    %129 = arith.maximumf %128, %105 : vector<16x512xf32>
    %130 = arith.maximumf %129, %118 : vector<16x512xf32>
    %cst_67 = arith.constant 0.000000e+00 : f32
    %131 = vector.broadcast %cst_67 : f32 to vector<16x512xf32>
    %cst_68 = arith.constant 0.000000e+00 : f32
    %132 = vector.broadcast %cst_68 : f32 to vector<16x512xf32>
    %133 = arith.subf %27, %130 : vector<16x512xf32>
    %134 = math.exp %133 : vector<16x512xf32>
    %135 = arith.addf %131, %134 : vector<16x512xf32>
    %136 = arith.mulf %134, %25 : vector<16x512xf32>
    %137 = arith.addf %132, %136 : vector<16x512xf32>
    %138 = arith.subf %40, %130 : vector<16x512xf32>
    %139 = math.exp %138 : vector<16x512xf32>
    %140 = arith.addf %135, %139 : vector<16x512xf32>
    %141 = arith.mulf %139, %38 : vector<16x512xf32>
    %142 = arith.addf %137, %141 : vector<16x512xf32>
    %143 = arith.subf %53, %130 : vector<16x512xf32>
    %144 = math.exp %143 : vector<16x512xf32>
    %145 = arith.addf %140, %144 : vector<16x512xf32>
    %146 = arith.mulf %144, %51 : vector<16x512xf32>
    %147 = arith.addf %142, %146 : vector<16x512xf32>
    %148 = arith.subf %66, %130 : vector<16x512xf32>
    %149 = math.exp %148 : vector<16x512xf32>
    %150 = arith.addf %145, %149 : vector<16x512xf32>
    %151 = arith.mulf %149, %64 : vector<16x512xf32>
    %152 = arith.addf %147, %151 : vector<16x512xf32>
    %153 = arith.subf %79, %130 : vector<16x512xf32>
    %154 = math.exp %153 : vector<16x512xf32>
    %155 = arith.addf %150, %154 : vector<16x512xf32>
    %156 = arith.mulf %154, %77 : vector<16x512xf32>
    %157 = arith.addf %152, %156 : vector<16x512xf32>
    %158 = arith.subf %92, %130 : vector<16x512xf32>
    %159 = math.exp %158 : vector<16x512xf32>
    %160 = arith.addf %155, %159 : vector<16x512xf32>
    %161 = arith.mulf %159, %90 : vector<16x512xf32>
    %162 = arith.addf %157, %161 : vector<16x512xf32>
    %163 = arith.subf %105, %130 : vector<16x512xf32>
    %164 = math.exp %163 : vector<16x512xf32>
    %165 = arith.addf %160, %164 : vector<16x512xf32>
    %166 = arith.mulf %164, %103 : vector<16x512xf32>
    %167 = arith.addf %162, %166 : vector<16x512xf32>
    %168 = arith.subf %118, %130 : vector<16x512xf32>
    %169 = math.exp %168 : vector<16x512xf32>
    %170 = arith.addf %165, %169 : vector<16x512xf32>
    %171 = arith.mulf %169, %116 : vector<16x512xf32>
    %172 = arith.addf %167, %171 : vector<16x512xf32>
    %173 = tpu.reciprocal %170 {approx = true} : vector<16x512xf32> -> vector<16x512xf32>
    %174 = arith.mulf %172, %173 : vector<16x512xf32>
    %175 = arith.truncf %174 : vector<16x512xf32> to vector<16x512xbf16>
    %c0_69 = arith.constant 0 : index
    %c0_70 = arith.constant 0 : index
    %c0_71 = arith.constant 0 : index
    %176 = vector.load %arg7[%c0_69, %c0_70, %c0_71] : memref<2x16x16xbf16, #tpu.memory_space<vmem>>, vector<1x16x16xbf16>
    %177 = vector.shape_cast %176 : vector<1x16x16xbf16> to vector<16x16xbf16>
    %cst_72 = arith.constant dense<0.000000e+00> : vector<16x512xf32>
    %178 = tpu.matmul %177, %175, %cst_72 {dimension_numbers = #tpu.dot_dimension_numbers<[1], [0], [0], [1], [0, 0, 1, 1], [], []>} : vector<16x16xbf16>, vector<16x512xbf16>, vector<16x512xf32> -> vector<16x512xf32>
    %179 = arith.addf %178, %123 : vector<16x512xf32>
    %180 = vector.broadcast %120 : vector<16x1xf32> to vector<16x512xf32>
    %181 = arith.addf %179, %180 : vector<16x512xf32>
    %cst_73 = arith.constant 0.000000e+00 : f32
    %182 = vector.broadcast %cst_73 : f32 to vector<16x512xf32>
    %183 = arith.maximumf %181, %182 : vector<16x512xf32>
    %184 = arith.truncf %183 : vector<16x512xf32> to vector<16x512xbf16>
    %c64 = arith.constant 64 : index
    %c0_74 = arith.constant 0 : index
    %185 = vector.load %arg10[%c64, %c0_74] : memref<160x1xf32, #tpu.memory_space<vmem>>, vector<32x1xf32>
    %c1_75 = arith.constant 1 : index
    %c0_76 = arith.constant 0 : index
    %c0_77 = arith.constant 0 : index
    %186 = vector.load %arg8[%c1_75, %c0_76, %c0_77] : memref<2x32x16xbf16, #tpu.memory_space<vmem>>, vector<1x32x16xbf16>
    %187 = vector.shape_cast %186 : vector<1x32x16xbf16> to vector<32x16xbf16>
    %cst_78 = arith.constant dense<0.000000e+00> : vector<32x512xf32>
    %188 = tpu.matmul %187, %184, %cst_78 {dimension_numbers = #tpu.dot_dimension_numbers<[1], [0], [0], [1], [0, 0, 1, 1], [], []>} : vector<32x16xbf16>, vector<16x512xbf16>, vector<32x512xf32> -> vector<32x512xf32>
    %189 = arith.maximumf %28, %41 : vector<16x512xf32>
    %190 = arith.maximumf %189, %54 : vector<16x512xf32>
    %191 = arith.maximumf %190, %67 : vector<16x512xf32>
    %192 = arith.maximumf %191, %80 : vector<16x512xf32>
    %193 = arith.maximumf %192, %93 : vector<16x512xf32>
    %194 = arith.maximumf %193, %106 : vector<16x512xf32>
    %195 = arith.maximumf %194, %119 : vector<16x512xf32>
    %cst_79 = arith.constant 0.000000e+00 : f32
    %196 = vector.broadcast %cst_79 : f32 to vector<16x512xf32>
    %cst_80 = arith.constant 0.000000e+00 : f32
    %197 = vector.broadcast %cst_80 : f32 to vector<16x512xf32>
    %198 = arith.subf %28, %195 : vector<16x512xf32>
    %199 = math.exp %198 : vector<16x512xf32>
    %200 = arith.addf %196, %199 : vector<16x512xf32>
    %201 = arith.mulf %199, %26 : vector<16x512xf32>
    %202 = arith.addf %197, %201 : vector<16x512xf32>
    %203 = arith.subf %41, %195 : vector<16x512xf32>
    %204 = math.exp %203 : vector<16x512xf32>
    %205 = arith.addf %200, %204 : vector<16x512xf32>
    %206 = arith.mulf %204, %39 : vector<16x512xf32>
    %207 = arith.addf %202, %206 : vector<16x512xf32>
    %208 = arith.subf %54, %195 : vector<16x512xf32>
    %209 = math.exp %208 : vector<16x512xf32>
    %210 = arith.addf %205, %209 : vector<16x512xf32>
    %211 = arith.mulf %209, %52 : vector<16x512xf32>
    %212 = arith.addf %207, %211 : vector<16x512xf32>
    %213 = arith.subf %67, %195 : vector<16x512xf32>
    %214 = math.exp %213 : vector<16x512xf32>
    %215 = arith.addf %210, %214 : vector<16x512xf32>
    %216 = arith.mulf %214, %65 : vector<16x512xf32>
    %217 = arith.addf %212, %216 : vector<16x512xf32>
    %218 = arith.subf %80, %195 : vector<16x512xf32>
    %219 = math.exp %218 : vector<16x512xf32>
    %220 = arith.addf %215, %219 : vector<16x512xf32>
    %221 = arith.mulf %219, %78 : vector<16x512xf32>
    %222 = arith.addf %217, %221 : vector<16x512xf32>
    %223 = arith.subf %93, %195 : vector<16x512xf32>
    %224 = math.exp %223 : vector<16x512xf32>
    %225 = arith.addf %220, %224 : vector<16x512xf32>
    %226 = arith.mulf %224, %91 : vector<16x512xf32>
    %227 = arith.addf %222, %226 : vector<16x512xf32>
    %228 = arith.subf %106, %195 : vector<16x512xf32>
    %229 = math.exp %228 : vector<16x512xf32>
    %230 = arith.addf %225, %229 : vector<16x512xf32>
    %231 = arith.mulf %229, %104 : vector<16x512xf32>
    %232 = arith.addf %227, %231 : vector<16x512xf32>
    %233 = arith.subf %119, %195 : vector<16x512xf32>
    %234 = math.exp %233 : vector<16x512xf32>
    %235 = arith.addf %230, %234 : vector<16x512xf32>
    %236 = arith.mulf %234, %117 : vector<16x512xf32>
    %237 = arith.addf %232, %236 : vector<16x512xf32>
    %238 = tpu.reciprocal %235 {approx = true} : vector<16x512xf32> -> vector<16x512xf32>
    %239 = arith.mulf %237, %238 : vector<16x512xf32>
    %240 = arith.truncf %239 : vector<16x512xf32> to vector<16x512xbf16>
    %c0_81 = arith.constant 0 : index
    %c0_82 = arith.constant 0 : index
    %c0_83 = arith.constant 0 : index
    %241 = vector.load %arg8[%c0_81, %c0_82, %c0_83] : memref<2x32x16xbf16, #tpu.memory_space<vmem>>, vector<1x32x16xbf16>
    %242 = vector.shape_cast %241 : vector<1x32x16xbf16> to vector<32x16xbf16>
    %cst_84 = arith.constant dense<0.000000e+00> : vector<32x512xf32>
    %243 = tpu.matmul %242, %240, %cst_84 {dimension_numbers = #tpu.dot_dimension_numbers<[1], [0], [0], [1], [0, 0, 1, 1], [], []>} : vector<32x16xbf16>, vector<16x512xbf16>, vector<32x512xf32> -> vector<32x512xf32>
    %244 = arith.addf %243, %188 : vector<32x512xf32>
    %245 = vector.broadcast %185 : vector<32x1xf32> to vector<32x512xf32>
    %246 = arith.addf %244, %245 : vector<32x512xf32>
    %cst_85 = arith.constant 0.000000e+00 : f32
    %247 = vector.broadcast %cst_85 : f32 to vector<32x512xf32>
    %248 = arith.maximumf %246, %247 : vector<32x512xf32>
    %249 = arith.truncf %248 : vector<32x512xf32> to vector<32x512xbf16>
    %250 = tpu.concatenate %249, %1 in 0 : vector<32x512xbf16>, vector<8x512xbf16> -> vector<40x512xbf16>
    %c0_86 = arith.constant 0 : index
    %c0_87 = arith.constant 0 : index
    %251 = vector.load %arg9[%c0_86, %c0_87] : memref<64x40xbf16, #tpu.memory_space<vmem>>, vector<64x40xbf16>
    %cst_88 = arith.constant dense<0.000000e+00> : vector<64x512xf32>
    %252 = tpu.matmul %251, %250, %cst_88 {dimension_numbers = #tpu.dot_dimension_numbers<[1], [0], [0], [1], [0, 0, 1, 1], [], []>} : vector<64x40xbf16>, vector<40x512xbf16>, vector<64x512xf32> -> vector<64x512xf32>
    %c96 = arith.constant 96 : index
    %c0_89 = arith.constant 0 : index
    %253 = vector.load %arg10[%c96, %c0_89] : memref<160x1xf32, #tpu.memory_space<vmem>>, vector<64x1xf32>
    %254 = vector.broadcast %253 : vector<64x1xf32> to vector<64x512xf32>
    %255 = arith.addf %252, %254 : vector<64x512xf32>
    %cst_90 = arith.constant 0.000000e+00 : f32
    %256 = vector.broadcast %cst_90 : f32 to vector<64x512xf32>
    %257 = arith.cmpf oge, %255, %256 : vector<64x512xf32>
    %cst_91 = arith.constant 0.00999999977 : f32
    %258 = vector.broadcast %cst_91 : f32 to vector<64x512xf32>
    %259 = arith.mulf %258, %255 : vector<64x512xf32>
    %260 = arith.select %257, %255, %259 : vector<64x512xi1>, vector<64x512xf32>
    %c0_92 = arith.constant 0 : index
    %c0_93 = arith.constant 0 : index
    %c0_94 = arith.constant 0 : index
    %261 = vector.load %arg11[%c0_92, %c0_93, %c0_94] : memref<1x64x512xf32, #tpu.memory_space<vmem>>, vector<1x64x512xf32>
    %262 = vector.shape_cast %261 : vector<1x64x512xf32> to vector<64x512xf32>
    %263 = vector.shape_cast %260 : vector<64x512xf32> to vector<1x64x512xf32>
    tpu.vector_store %arg11[%c0_92, %c0_93, %c0_94], %263 {strides = array<i32>} : memref<1x64x512xf32, #tpu.memory_space<vmem>>, vector<1x64x512xf32>,
    return
  }
  func.func @transform_0(%arg0: i32, %arg1: i32) -> (i32, i32, i32, i32) {
    %c0_i32 = arith.constant 0 : i32
    %c0_i32_0 = arith.constant 0 : i32
    %c0_i32_1 = arith.constant 0 : i32
    return %arg0, %c0_i32, %c0_i32_0, %arg1 : i32, i32, i32, i32
  }
  func.func @transform_1(%arg0: i32, %arg1: i32) -> (i32, i32, i32) {
    %c0_i32 = arith.constant 0 : i32
    %c0_i32_0 = arith.constant 0 : i32
    return %arg0, %c0_i32, %arg1 : i32, i32, i32
  }
  func.func @transform_2(%arg0: i32, %arg1: i32) -> (i32, i32) {
    %c0_i32 = arith.constant 0 : i32
    %c0_i32_0 = arith.constant 0 : i32
    %c0_i32_1 = arith.constant 0 : i32
    return %c0_i32, %c0_i32_0 : i32, i32
  }
  func.func @transform_3(%arg0: i32, %arg1: i32) -> (i32, i32) {
    %c0_i32 = arith.constant 0 : i32
    %c0_i32_0 = arith.constant 0 : i32
    %c0_i32_1 = arith.constant 0 : i32
    return %c0_i32, %c0_i32_0 : i32, i32
  }
  func.func @transform_4(%arg0: i32, %arg1: i32) -> (i32, i32) {
    %c0_i32 = arith.constant 0 : i32
    %c0_i32_0 = arith.constant 0 : i32
    %c0_i32_1 = arith.constant 0 : i32
    return %c0_i32, %c0_i32_0 : i32, i32
  }
  func.func @transform_5(%arg0: i32, %arg1: i32) -> (i32, i32, i32) {
    %c0_i32 = arith.constant 0 : i32
    %c0_i32_0 = arith.constant 0 : i32
    %c0_i32_1 = arith.constant 0 : i32
    %c0_i32_2 = arith.constant 0 : i32
    return %c0_i32, %c0_i32_0, %c0_i32_1 : i32, i32, i32
  }
  func.func @transform_6(%arg0: i32, %arg1: i32) -> (i32, i32, i32) {
    %c0_i32 = arith.constant 0 : i32
    %c0_i32_0 = arith.constant 0 : i32
    %c0_i32_1 = arith.constant 0 : i32
    %c0_i32_2 = arith.constant 0 : i32
    return %c0_i32, %c0_i32_0, %c0_i32_1 : i32, i32, i32
  }
  func.func @transform_7(%arg0: i32, %arg1: i32) -> (i32, i32) {
    %c0_i32 = arith.constant 0 : i32
    %c0_i32_0 = arith.constant 0 : i32
    %c0_i32_1 = arith.constant 0 : i32
    return %c0_i32, %c0_i32_0 : i32, i32
  }
  func.func @transform_8(%arg0: i32, %arg1: i32) -> (i32, i32) {
    %c0_i32 = arith.constant 0 : i32
    %c0_i32_0 = arith.constant 0 : i32
    %c0_i32_1 = arith.constant 0 : i32
    return %c0_i32, %c0_i32_0 : i32, i32
  }
  func.func @transform_9(%arg0: i32, %arg1: i32) -> (i32, i32, i32) {
    %c0_i32 = arith.constant 0 : i32
    %c0_i32_0 = arith.constant 0 : i32
    return %arg0, %c0_i32, %arg1 : i32, i32, i32
  }
}

</mosaic_0001>

<bundles_post_ra>
// kernel: tpu_custom_call.1
= control target key start
LH: loop header
LB: loop body
LE: loop exit
PB: predicated region body
PF: predicated region fallthrough
CT: control target
= control target key end

     0   :  { %14 = vsyncpa [#allocation3], 0  ;;  %s8405_s0 = inlined_call_operand.vmem [shape: bf16[2,8,10,512], index: 0, kind: input, shape index: {}]   ;;  %s8406_s1 = inlined_call_operand.vmem [shape: bf16[2,8,512], index: 1, kind: input, shape index: {}]   ;;  %s8407_s2 = inlined_call_operand.vmem [shape: bf16[16,8], index: 2, kind: input, shape index: {}]   ;;  %s8408_s3 = inlined_call_operand.vmem [shape: bf16[32,10], index: 3, kind: input, shape index: {}]   ;;  %s8409_s4 = inlined_call_operand.vmem [shape: bf16[32,32], index: 4, kind: input, shape index: {}]   ;;  %s8410_s5 = inlined_call_operand.vmem [shape: bf16[2,16,16], index: 5, kind: input, shape index: {}]   ;;  %s8411_s6 = inlined_call_operand.vmem [shape: bf16[2,32,16], index: 6, kind: input, shape index: {}]   ;;  %s8412_s7 = inlined_call_operand.vmem [shape: bf16[64,40], index: 7, kind: input, shape index: {}]   ;;  %s8413_s8 = inlined_call_operand.vmem [shape: f32[160,1], index: 8, kind: input, shape index: {}]   ;;  %s8414_s9 = inlined_call_operand.hbm [shape: f32[2,64,512], index: 9, kind: output, shape index: {}]  }
   0x1   :  { %16 = vsyncpa [#allocation3 + $0x1], 0  ;;  %s5478_s30 = smov 0   ;;  %s5480_s10 = smov 0  }
   0x2   :  { %s5482_s11 = smov 0   ;;  %s5484_s12 = smov 0  }
   0x3   :  { %s5486_s13 = smov 0   ;;  %s5488_s14 = smov 0  }
   0x4 LB: > { %8719 = sst [smem:[#allocation5_spill]] %s5418_s13  ;;  %s4718_s15 = sadd.s32 4294967295, %s5422_s14   ;;  %s5422_s14 = sphi %s5488_s14, %s22_s14   ;;  %s5418_s13 = sphi %s5486_s13, %s9443_s13   ;;  %s5414_s12 = sphi %s5484_s12, %s9442_s12   ;;  %s5410_s11 = sphi %s5482_s11, %s9446_s11   ;;  %s5406_s10 = sphi %s5480_s10, %s9445_s10   ;;  %s5402_s30 = sphi %s5478_s30, %s9444_s30  }
   0x5   : > { %s4719_s16 = sadd.s32 4294967294, %s5422_s14   ;;  %s34_s17 = sadd.s32 1, %s5418_s13 }
   0x6   : > { %s246_s18 = sadd.s32 1, %s5410_s11  ;;  %p36_p0 = scmp.ge.s32.totalorder %s34_s17, 2 }
   0x7   : > { %p256_p1 = scmp.ne.s32.totalorder %s5410_s11, %s5406_s10  ;;  %p257_p2 = scmp.eq.s32.totalorder %s4718_s15, 1 }
   0x8   : > { %p262_p3 = scmp.ne.s32.totalorder %s5406_s10, %s5402_s30  ;;  %s9448_s17 = smov (%p36_p0, %s34_s17), 0 }
   0x9   : > { %8720 = sst [smem:[#allocation6_spill]] %s9448_s17  ;;  %p5518_p4 = por %p257_p2, %p256_p1 }
   0xa   : > { %p263_p5 = scmp.eq.s32.totalorder %s4719_s16, 1  ;;  %s241_s20 = ssub.s32 %s5418_s13, %s9448_s17 }
   0xb   : > { %p4722_p6 = scmp.ge.s32.totalorder %s5422_s14, 1  ;;  %p244_p7 = scmp.eq.s32.totalorder %s241_s20, 0 }
   0xc   : > { %p5525_p8 = por %p263_p5, %p262_p3  ;;  %p328_p9 = scmp.lt.s32.totalorder %s5422_s14, 3 }
   0xd   : > { %s5531_s22 = scalar_select %p244_p7, %s5410_s11, %s246_s18  }
   0xe   : > { %p329_p10 = pnand %p4722_p6, %p328_p9 }
  0x10   : > { %332 = sbr.rel (%p329_p10) target bundleno = 2941 (0xb7d), region = 56 }
  0x15   : > { %p378_p11 = scmp.lt.s32.totalorder %s5414_s12, 1  ;;  %v8433_v0 = vmov 0   ;;  %v571_v1 = vld [vmem:[%s8413_s8 + $0x20] sm:$0xff]  ;;  %v569_v2 = vld [vmem:[%s8413_s8 + $0x10] sm:$0xff]  ;;  %v572_v3 = vld [vmem:[%s8413_s8 + $0x28] sm:$0xff]  ;;  %vm434_vm0 = vcmask 1043456  }
  0x16   : > { %479 = vmatprep.mubr.bf16.mxu0 %v8433_v0  ;;  %522 = vmatprep.mubr.bf16.mxu1 %v8433_v0  ;;  %vm630_vm1 = vcmask 1044480   ;;  %v4991_v10 = vld [vmem:[%s8407_s2] sm:$0xff]   ;;  %v570_v13 = vld [vmem:[%s8413_s8 + $0x18] sm:$0xff]  ;;  %vm430_vm2 = vcmask 64512   ;;  %v404_v21 = vld [vmem:[%s8413_s8 + $0x8] sm:$0xff]  ;;  %vm623_vm3 = vcmask 80896  }
  0x17   : > { %s379_s23 = scalar_select %p378_p11, %s5414_s12, 1  ;;  %4985 = vset.pattern.permute.xlu0 %v8433_v0  ;;  %4986 = vset.pattern.permute.xlu1 %v8433_v0  ;;  %v403_v17 = vld [vmem:[%s8413_s8] sm:$0xff]  ;;  %v2779_v22 = vld [vmem:[%s8413_s8 + $0x30] sm:$0xff]  ;;  %v2780_v24 = vld [vmem:[%s8413_s8 + $0x38] sm:$0xff]  ;;  %vm783_vm8 = vcmask 261120   ;;  %vm2789_vm13 = vcmask 130048  }
  0x18   : > { %589 = vperm.xlu0 %4985, %v571_v1   ;;  %579 = vperm.xlu1 %4986, %v569_v2   ;;  %v5600_v23 = vld [vmem:[%s8408_s3] sm:$0xff]   ;;  %v3467_v25 = vld [vmem:[%s8413_s8 + $0x50] sm:$0xff]  ;;  %v3468_v26 = vld [vmem:[%s8413_s8 + $0x58] sm:$0xff]  ;;  %vm4318_vm14 = vcmask 326656   ;;  %s374_s24 = sand.u32 1, %s5406_s10   ;;  %s5425_s29 = smov [#allocation2]  }
  0x19   : > { %s4924_s26 = sshll.u32 %s379_s23, 8  ;;  %s4925_s27 = sshll.u32 %s379_s23, 4  ;;  %v3465_v27 = vld [vmem:[%s8413_s8 + $0x40] sm:$0xff]  ;;  %v5623_v28 = vld [vmem:[%s8408_s3 + $0x8] sm:$0xff]   ;;  %v4252_v32 = vld [vmem:[%s8413_s8 + $0x70] sm:$0xff] }
  0x1a   : > { %s5548_s18 = scalar_lea.vmem %s8405_s0, %s4924_s26  ;;  %s395_s13 = scalar_lea.vmem %s8406_s1, %s4925_s27  ;;  %v3466_v29 = vld [vmem:[%s8413_s8 + $0x48] sm:$0xff]  ;;  %v4250_v30 = vld [vmem:[%s8413_s8 + $0x60] sm:$0xff]  ;;  %v4253_v33 = vld [vmem:[%s8413_s8 + $0x78] sm:$0xff] }
  0x1b   : > { %v399_v4 = vld [vmem:[%s395_s13] sm:$0xff]  ;;  %v400_v5 = vld [vmem:[%s395_s13 + $0x8] sm:$0xff]  ;;  %v4256_v36 = vld [vmem:[%s8413_s8 + $0x90] sm:$0xff]  ;;  %s4723_s25 = sshll.u32 %s374_s24, 8  ;;  %s4926_s23 = sshll.u32 %s5414_s12, 12 }
  0x1c   : > { %v5556_v6 = vcombine.high %v399_v4, %v399_v4  ;;  %v5558_v7 = vcombine.high %v400_v5, %v400_v5  ;;  %v4729_v8 = vcombine.low %v399_v4, %v399_v4  ;;  %v4731_v9 = vcombine.low %v400_v5, %v400_v5  ;;  %v4992_v11 = vld [vmem:[%s5548_s18 + $0x4] ss:$16 sps:$4 sm:$0x1f]   ;;  %v4994_v12 = vld [vmem:[%s5548_s18 + $0xc] ss:$16 sps:$4 sm:$0x1f]   ;;  %594 = vperm.xlu0 %4985, %v572_v3   ;;  %s8352_s13 = scalar_lea.hbm %s8414_s9, %s4926_s23 }
  0x1d   : > { %v4996_v16 = vld [vmem:[%s5548_s18] ss:$16 sps:$4 sm:$0x1f]   ;;  %v4997_v18 = vld [vmem:[%s5548_s18 + $0x8] ss:$16 sps:$4 sm:$0x1f]   ;;  %584 = vperm.xlu1 %4986, %v570_v13  }
  0x1e   : > { %8723 = vst [vmem:[#allocation7_spill] sm:$0xff] %v5556_v6  ;;  %8724 = vst [vmem:[#allocation8_spill] sm:$0xff] %v5558_v7  ;;  %4733 = vmatprep.subr.msk.bf16.mxu0 %vm434_vm0, %v5556_v6  ;;  %4735 = vmatprep.subr.msk.bf16.mxu1 %vm434_vm0, %v5558_v7  ;;  %v5573_v14 = vsel %vm434_vm0, %v4729_v8, 0  ;;  %v5576_v15 = vsel %vm434_vm0, %v4731_v9, 0  ;;  %v632_v19 = vsel %vm630_vm1, %v4996_v16, 0  ;;  %v638_v20 = vsel %vm630_vm1, %v4997_v18, 0 }
  0x1f   : > { %8725 = vst [vmem:[#allocation9_spill] sm:$0xff] %v5573_v14  ;;  %8726 = vst [vmem:[#allocation10_spill] sm:$0xff] %v5576_v15  ;;  %462 = vmatpush1.bf16.msra.mxu0 %v5573_v14  ;;  %505 = vmatpush1.bf16.msra.mxu1 %v5576_v15  ;;  %v4251_v31 = vld [vmem:[%s8413_s8 + $0x68] sm:$0xff]  ;;  %v4254_v34 = vld [vmem:[%s8413_s8 + $0x80] sm:$0xff]  ;;  %s8291_s17 = scalar_lea.vmem [#allocation2], %s4723_s25  ;;  %s8360_s12 = scalar_lea.sflag [#allocation3], %s374_s24 }
  0x20   : > { %4743 = vmatprep.subr.msk.bf16.mxu0 %vm630_vm1, %v4992_v11  ;;  %4746 = vmatprep.subr.msk.bf16.mxu1 %vm630_vm1, %v4994_v12  ;;  %v4255_v35 = vld [vmem:[%s8413_s8 + $0x88] sm:$0xff]  ;;  %v4257_v37 = vld [vmem:[%s8413_s8 + $0x98] sm:$0xff]  ;;  %s4621_s26 = sshll.u32 %s8291_s17, 4  ;;  %s5350_s15 = sshll.u32 %s5425_s29, 4  ;;  %s8354_s26 = int_to_ptr.vmem [resolvable:$true] %s4621_s26  ;;  %s5351_s15 = int_to_ptr.vmem [resolvable:$false] %s5350_s15 }
  0x21   : > { %407 = vperm.xlu0 %4985, %v403_v17   ;;  %412 = vperm.xlu1 %4986, %v404_v21   ;;  %s5346_s28 = scalar_lea.vmem %s8354_s26, 4096  ;;  %s5352_s16 = scalar_lea.vmem %s5351_s15, 8192 }
  0x22   : > { %4734 = vmatmul.mubr.msk.bf16.vlgmr.msra.gmra.mxu0 %vm430_vm2, %v4991_v10  ;;  %4736 = vmatmul.mubr.msk.bf16.vlgmr.msra.gmra.mxu1 %vm430_vm2, %v4991_v10  ;;  %p5347_p12 = scmp.ne.s32.totalorder %s8354_s26, %s5346_s28  ;;  %p5353_p1 = scmp.lt.s32.totalorder %s8354_s26, %s5351_s15 }
  0x23   : > { %658 = vmatpush1.bf16.msra.mxu0 %v632_v19  ;;  %711 = vmatpush1.bf16.msra.mxu1 %v638_v20  ;;  %p5354_p2 = scmp.lt.s32.totalorder %s5352_s16, %s5346_s28 }
  0x24   : > { %675 = vmatprep.mubr.bf16.mxu0 %v8433_v0  ;;  %728 = vmatprep.mubr.bf16.mxu1 %v8433_v0  ;;  %p5348_p13 = pnand %p5347_p12, %p5518_p4 }
  0x25   : > { %3437 = vperm.xlu0 %4985, %v2779_v22   ;;  %3442 = vperm.xlu1 %4986, %v2780_v24   ;;  %p5355_p3 = por %p5354_p2, %p5353_p1 }
  0x26   : > { %p5349_p0 = pneg %p5348_p13 }
  0x28   : > { %p5356_p5 = pnand %p5355_p3, %p5349_p0 }
  0x29   : > { %4194 = vperm.xlu0 %4985, %v3467_v25   ;;  %4199 = vperm.xlu1 %4986, %v3468_v26  }
  0x2a   : > { %4744 = vmatmul.mubr.msk.bf16.vlgmr.msra.gmra.mxu0 %vm623_vm3, %v5600_v23  ;;  %4747 = vmatmul.mubr.msk.bf16.vlgmr.msra.gmra.mxu1 %vm623_vm3, %v5600_v23 }
  0x2b   : > { %685 = vmatprep.mubr.bf16.mxu0 %v8433_v0  ;;  %738 = vmatprep.mubr.bf16.mxu1 %v8433_v0 }
  0x2d   : > { %4184 = vperm.xlu0 %4985, %v3465_v27   ;;  %4189 = vperm.xlu1 %4986, %v3466_v29  }
  0x31   : > { %4260 = vperm.xlu0 %4985, %v4250_v30   ;;  %4265 = vperm.xlu1 %4986, %v4251_v31  }
  0x32   : > { %4745 = vmatmul.mubr.msk.bf16.gmra.mxu0 %vm623_vm3, %v5623_v28  ;;  %4748 = vmatmul.mubr.msk.bf16.gmra.mxu1 %vm623_vm3, %v5623_v28 }
  0x33   : > { %822 = vmatprep.mubr.bf16.mxu0 %v8433_v0  ;;  %875 = vmatprep.mubr.bf16.mxu1 %v8433_v0 }
  0x35   : > { %4270 = vperm.xlu0 %4985, %v4252_v32   ;;  %4275 = vperm.xlu1 %4986, %v4253_v33  }
  0x39   : > { %4280 = vperm.xlu0 %4985, %v4254_v34   ;;  %4285 = vperm.xlu1 %4986, %v4255_v35  }
  0x3d   : > { %4290 = vperm.xlu0 %4985, %v4256_v36   ;;  %4295 = vperm.xlu1 %4986, %v4257_v37  }
  0x93   : > { %v5658_v38 = vpop.permute.xlu0 %589  ;;  %v5660_v39 = vpop.permute.xlu1 %579 }
  0x97   : > { %v5662_v40 = vpop.permute.xlu0 %594 }
  0x98   : > { %v5664_v41 = vpop.permute.xlu1 %584 }
  0x9c   : > { %v5666_v42 = vpop.permute.xlu0 %407  ;;  %v5674_v49 = vpop.permute.xlu1 %412 }
  0xe2   : > { %v481_v43 = vpop.f32.mrf.mxu0  ;;  %v524_v44 = vpop.f32.mrf.mxu1 }
  0xe3   : > { %v482_v45 = vadd.f32 %v481_v43, %v5666_v42  ;;  %v525_v46 = vadd.f32 %v524_v44, %v5666_v42 }
  0xe4   : > { %v5670_v47 = vpop.f32.mrf.mxu0  ;;  %v5672_v48 = vpop.f32.mrf.mxu1 }
  0xe5   : > { %v541_v52 = vmul.f32 0.2, %v482_v45  ;;  %v543_v53 = vmul.f32 0.2, %v525_v46  ;;  %vm533_vm4 = vcmp.ge.f32.partialorder %v482_v45, 0.0  ;;  %vm535_vm5 = vcmp.ge.f32.partialorder %v525_v46, 0.0 }
  0xe6   : > { %v485_v50 = vpop.f32.mrf.mxu0  ;;  %v528_v51 = vpop.f32.mrf.mxu1 }
  0xe7   : > { %v486_v54 = vadd.f32 %v485_v50, %v5674_v49  ;;  %v529_v55 = vadd.f32 %v528_v51, %v5674_v49  ;;  %v5682_v62 = vsel %vm533_vm4, %v482_v45, %v541_v52  ;;  %v5684_v63 = vsel %vm535_vm5, %v525_v46, %v543_v53 }
  0xe8   : > { %v5678_v56 = vpop.f32.mrf.mxu0  ;;  %v5680_v57 = vpop.f32.mrf.mxu1 }
  0xe9   : > { %vm537_vm6 = vcmp.ge.f32.partialorder %v486_v54, 0.0  ;;  %v545_v58 = vmul.f32 0.2, %v486_v54  ;;  %vm539_vm7 = vcmp.ge.f32.partialorder %v529_v55, 0.0  ;;  %v547_v59 = vmul.f32 0.2, %v529_v55 }
  0xea   : > { %v677_v60 = vpop.f32.mrf.mxu0  ;;  %v730_v61 = vpop.f32.mrf.mxu1 }
  0xeb   : > { %v5686_v1 = vsel %vm537_vm6, %v486_v54, %v545_v58  ;;  %v5688_v2 = vsel %vm539_vm7, %v529_v55, %v547_v59  ;;  %v5745_v55 = vadd.f32 %v677_v60, %v5660_v39  ;;  %v5748_v58 = vadd.f32 %v730_v61, %v5660_v39 }
  0xec   : > { %v679_v5 = vpop.f32.mrf.mxu0  ;;  %v732_v8 = vpop.f32.mrf.mxu1 }
  0xed   : > { %v5713_v29 = vadd.f32 %v679_v5, %v5660_v39  ;;  %v5716_v30 = vadd.f32 %v732_v8, %v5660_v39  ;;  %8741 = vst [vmem:[#allocation25_spill] sm:$0xff] %v5745_v55  ;;  %8742 = vst [vmem:[#allocation26_spill] sm:$0xff] %v5748_v58 }
  0xee   : > { %v681_v9 = vpop.f32.mrf.mxu0  ;;  %v734_v10 = vpop.f32.mrf.mxu1 }
  0xef   : > { %8733 = vst [vmem:[#allocation17_spill] sm:$0xff] %v5713_v29  ;;  %8734 = vst [vmem:[#allocation18_spill] sm:$0xff] %v5716_v30  ;;  %v5725_v35 = vadd.f32 %v681_v9, %v5664_v41  ;;  %v5728_v36 = vadd.f32 %v734_v10, %v5664_v41  ;;  %v8432_v8 = vmax.f32 %v5713_v29, 0.0  ;;  %v8430_v9 = vmax.f32 %v5716_v30, 0.0 }
  0xf0   : > { %v683_v11 = vpop.f32.mrf.mxu0  ;;  %v736_v12 = vpop.f32.mrf.mxu1 }
  0xf1   : > { %v5695_v19 = vadd.f32 %v683_v11, %v5664_v41  ;;  %v5698_v20 = vadd.f32 %v736_v12, %v5664_v41  ;;  %8737 = vst [vmem:[#allocation21_spill] sm:$0xff] %v5725_v35  ;;  %8738 = vst [vmem:[#allocation22_spill] sm:$0xff] %v5728_v36  ;;  %v8427_v61 = vmax.f32 %v5725_v35, 0.0  ;;  %v8425_v11 = vmax.f32 %v5728_v36, 0.0 }
  0xf2   : > { %v687_v13 = vpop.f32.mrf.mxu0  ;;  %v740_v16 = vpop.f32.mrf.mxu1 }
  0xf3   : > { %8727 = vst [vmem:[#allocation11_spill] sm:$0xff] %v5695_v19  ;;  %8728 = vst [vmem:[#allocation12_spill] sm:$0xff] %v5698_v20  ;;  %v5719_v31 = vadd.f32 %v687_v13, %v5658_v38  ;;  %v5722_v32 = vadd.f32 %v740_v16, %v5658_v38  ;;  %v8431_v44 = vmax.f32 %v5695_v19, 0.0  ;;  %v8429_v45 = vmax.f32 %v5698_v20, 0.0 }
  0xf4   : > { %v689_v17 = vpop.f32.mrf.mxu0  ;;  %v742_v18 = vpop.f32.mrf.mxu1 }
  0xf5   : > { %v5701_v24 = vadd.f32 %v689_v17, %v5658_v38  ;;  %v5704_v25 = vadd.f32 %v742_v18, %v5658_v38  ;;  %8735 = vst [vmem:[#allocation19_spill] sm:$0xff] %v5719_v31  ;;  %8736 = vst [vmem:[#allocation20_spill] sm:$0xff] %v5722_v32  ;;  %v8420_v59 = vmax.f32 %v5719_v31, 0.0  ;;  %v8417_v5 = vmax.f32 %v5722_v32, 0.0 }
  0xf6   : > { %v691_v21 = vpop.f32.mrf.mxu0  ;;  %v744_v22 = vpop.f32.mrf.mxu1  ;;  %v766_v16 = vpack.c.bf16 %v8431_v44, %v8432_v8  ;;  %v768_v17 = vpack.c.bf16 %v8429_v45, %v8430_v9  ;;  %v8428_v18 = vmax.f32 %v5745_v55, 0.0 }
  0xf7   : > { %8729 = vst [vmem:[#allocation13_spill] sm:$0xff] %v5701_v24  ;;  %8730 = vst [vmem:[#allocation14_spill] sm:$0xff] %v5704_v25  ;;  %v5707_v26 = vadd.f32 %v691_v21, %v5662_v40  ;;  %v5710_v27 = vadd.f32 %v744_v22, %v5662_v40  ;;  %v8424_v51 = vmax.f32 %v5701_v24, 0.0  ;;  %v8421_v52 = vmax.f32 %v5704_v25, 0.0 }
  0xf8   : > { %v693_v33 = vpop.f32.mrf.mxu0  ;;  %v746_v34 = vpop.f32.mrf.mxu1  ;;  %v8426_v21 = vmax.f32 %v5748_v58, 0.0  ;;  %v5002_v22 = vld [vmem:[%s5548_s18 + $0x24] ss:$16 sps:$4 sm:$0x1f]  }
  0xf9   : > { %8731 = vst [vmem:[#allocation15_spill] sm:$0xff] %v5707_v26  ;;  %8732 = vst [vmem:[#allocation16_spill] sm:$0xff] %v5710_v27  ;;  %v5731_v37 = vadd.f32 %v693_v33, %v5662_v40  ;;  %v5734_v43 = vadd.f32 %v746_v34, %v5662_v40  ;;  %v8422_v46 = vmax.f32 %v5707_v26, 0.0  ;;  %v8418_v50 = vmax.f32 %v5710_v27, 0.0 }
  0xfa   : > { %v5004_v33 = vld [vmem:[%s5548_s18 + $0x2c] ss:$16 sps:$4 sm:$0x1f]   ;;  %v765_v34 = vpack.c.bf16 %v8427_v61, %v8428_v18 }
  0xfb   : > { %8739 = vst [vmem:[#allocation23_spill] sm:$0xff] %v5731_v37  ;;  %8740 = vst [vmem:[#allocation24_spill] sm:$0xff] %v5734_v43  ;;  %v8423_v53 = vmax.f32 %v5731_v37, 0.0  ;;  %v8419_v54 = vmax.f32 %v5734_v43, 0.0  ;;  %v769_v12 = vpack.c.bf16 %v8422_v46, %v8420_v59  ;;  %v771_v13 = vpack.c.bf16 %v8418_v50, %v8417_v5 }
  0xfc   : > { %v5007_v5 = vld [vmem:[%s5548_s18 + $0x28] ss:$16 sps:$4 sm:$0x1f]  }
  0xfd   : > { %v770_v10 = vpack.c.bf16 %v8423_v53, %v8424_v51  ;;  %v772_v60 = vpack.c.bf16 %v8419_v54, %v8421_v52 }
  0xff   : > { %802 = vmatprep.subr.bf16.mxu0 %v770_v10  ;;  %855 = vmatprep.subr.bf16.mxu1 %v772_v60  ;;  %v767_v10 = vpack.c.bf16 %v8425_v11, %v8426_v21  ;;  %v5006_v60 = vld [vmem:[%s5548_s18 + $0x20] ss:$16 sps:$4 sm:$0x1f]  }
 0x100   : > { %803 = vmatpush1.bf16.msra.mxu0 %v769_v12  ;;  %856 = vmatpush1.bf16.msra.mxu1 %v771_v13  ;;  %v5797_v12 = vld [vmem:[%s8409_s4] sm:$0xff]   ;;  %v918_v13 = vsel %vm630_vm1, %v5006_v60, 0 }
 0x101   : > { %804 = vmatprep.subr.bf16.mxu0 %v766_v16  ;;  %857 = vmatprep.subr.bf16.mxu1 %v768_v17  ;;  %v924_v16 = vsel %vm630_vm1, %v5007_v5, 0  ;;  %v5812_v17 = vld [vmem:[%s8409_s4 + $0x8] sm:$0xff]  }
 0x104   : > { %805 = vmatpush1.bf16.msra.mxu0 %v765_v34  ;;  %858 = vmatpush1.bf16.msra.mxu1 %v767_v10 }
 0x105   : > { %4763 = vmatprep.subr.msk.bf16.mxu0 %vm630_vm1, %v5002_v22  ;;  %4766 = vmatprep.subr.msk.bf16.mxu1 %vm630_vm1, %v5004_v33 }
 0x107   : > { %4751 = vmatmul.mubr.msk.bf16.vlgmr.msra.gmra.mxu0 %vm783_vm8, %v5797_v12  ;;  %4753 = vmatmul.mubr.msk.bf16.vlgmr.msra.gmra.mxu1 %vm783_vm8, %v5797_v12 }
 0x108   : > { %832 = vmatprep.mubr.bf16.mxu0 %v8433_v0  ;;  %885 = vmatprep.mubr.bf16.mxu1 %v8433_v0 }
 0x109   : > { %944 = vmatpush1.bf16.msra.mxu0 %v918_v13  ;;  %997 = vmatpush1.bf16.msra.mxu1 %v924_v16 }
 0x10f   : > { %4752 = vmatmul.mubr.msk.bf16.gmra.mxu0 %vm783_vm8, %v5812_v17  ;;  %4754 = vmatmul.mubr.msk.bf16.gmra.mxu1 %vm783_vm8, %v5812_v17 }
 0x110   : > { %961 = vmatprep.mubr.bf16.mxu0 %v8433_v0  ;;  %1014 = vmatprep.mubr.bf16.mxu1 %v8433_v0 }
 0x117   : > { %4764 = vmatmul.mubr.msk.bf16.vlgmr.msra.gmra.mxu0 %vm623_vm3, %v5600_v23  ;;  %4767 = vmatmul.mubr.msk.bf16.vlgmr.msra.gmra.mxu1 %vm623_vm3, %v5600_v23 }
 0x118   : > { %971 = vmatprep.mubr.bf16.mxu0 %v8433_v0  ;;  %1024 = vmatprep.mubr.bf16.mxu1 %v8433_v0 }
 0x11f   : > { %4765 = vmatmul.mubr.msk.bf16.gmra.mxu0 %vm623_vm3, %v5623_v28  ;;  %4768 = vmatmul.mubr.msk.bf16.gmra.mxu1 %vm623_vm3, %v5623_v28 }
 0x120   : > { %1091 = vmatprep.mubr.bf16.mxu0 %v8433_v0  ;;  %1144 = vmatprep.mubr.bf16.mxu1 %v8433_v0 }
 0x1c7   : > { %v5832_v5 = vpop.f32.mrf.mxu0  ;;  %v5834_v22 = vpop.f32.mrf.mxu1 }
 0x1c9   : > { %v5836_v33 = vpop.f32.mrf.mxu0  ;;  %v5838_v34 = vpop.f32.mrf.mxu1 }
 0x1ca   : > { %8743 = vst [vmem:[#allocation27_spill] sm:$0xff] %v5838_v34 }
 0x1cb   : > { %v5840_v10 = vpop.f32.mrf.mxu0  ;;  %v5842_v60 = vpop.f32.mrf.mxu1 }
 0x1cc   : > { %8744 = vst [vmem:[#allocation28_spill] sm:$0xff] %v5840_v10  ;;  %8745 = vst [vmem:[#allocation29_spill] sm:$0xff] %v5842_v60 }
 0x1cd   : > { %v5844_v13 = vpop.f32.mrf.mxu0  ;;  %v5846_v16 = vpop.f32.mrf.mxu1 }
 0x1ce   : > { %8746 = vst [vmem:[#allocation30_spill] sm:$0xff] %v5846_v16 }
 0x1cf   : > { %v5848_v50 = vpop.f32.mrf.mxu0  ;;  %v5850_v54 = vpop.f32.mrf.mxu1 }
 0x1d0   : > { %8747 = vst [vmem:[#allocation31_spill] sm:$0xff] %v5848_v50  ;;  %8748 = vst [vmem:[#allocation32_spill] sm:$0xff] %v5850_v54 }
 0x1d1   : > { %v5852_v59 = vpop.f32.mrf.mxu0  ;;  %v5854_v52 = vpop.f32.mrf.mxu1 }
 0x1d2   : > { %8749 = vst [vmem:[#allocation33_spill] sm:$0xff] %v5852_v59  ;;  %8750 = vst [vmem:[#allocation34_spill] sm:$0xff] %v5854_v52 }
 0x1d3   : > { %v5856_v46 = vpop.f32.mrf.mxu0  ;;  %v5858_v53 = vpop.f32.mrf.mxu1 }
 0x1d4   : > { %8751 = vst [vmem:[#allocation35_spill] sm:$0xff] %v5856_v46  ;;  %8752 = vst [vmem:[#allocation36_spill] sm:$0xff] %v5858_v53 }
 0x1d5   : > { %v5860_v51 = vpop.f32.mrf.mxu0  ;;  %v5862_v11 = vpop.f32.mrf.mxu1 }
 0x1d6   : > { %8753 = vst [vmem:[#allocation37_spill] sm:$0xff] %v5860_v51  ;;  %8754 = vst [vmem:[#allocation38_spill] sm:$0xff] %v5862_v11 }
 0x1d7   : > { %v963_v21 = vpop.f32.mrf.mxu0  ;;  %v1016_v61 = vpop.f32.mrf.mxu1 }
 0x1d8   : > { %v5915_v46 = vadd.f32 %v963_v21, %v5660_v39 }
 0x1d9   : > { %v965_v18 = vpop.f32.mrf.mxu0  ;;  %v1018_v45 = vpop.f32.mrf.mxu1 }
 0x1da   : > { %8769 = vst [vmem:[#allocation53_spill] sm:$0xff] %v5915_v46 }
 0x1db   : > { %v967_v9 = vpop.f32.mrf.mxu0  ;;  %v1020_v44 = vpop.f32.mrf.mxu1 }
 0x1dd   : > { %v969_v8 = vpop.f32.mrf.mxu0  ;;  %v1022_v4 = vpop.f32.mrf.mxu1 }
 0x1de   : > { %v5865_v7 = vadd.f32 %v969_v8, %v5664_v41  ;;  %v5868_v6 = vadd.f32 %v1022_v4, %v5664_v41  ;;  %v5883_v8 = vadd.f32 %v965_v18, %v5660_v39  ;;  %v5886_v4 = vadd.f32 %v1018_v45, %v5660_v39 }
 0x1df   : > { %v973_v3 = vpop.f32.mrf.mxu0  ;;  %v1026_v0 = vpop.f32.mrf.mxu1 }
 0x1e0   : > { %8755 = vst [vmem:[#allocation39_spill] sm:$0xff] %v5865_v7  ;;  %8756 = vst [vmem:[#allocation40_spill] sm:$0xff] %v5868_v6  ;;  %v5889_v37 = vadd.f32 %v973_v3, %v5658_v38  ;;  %v8779_v3 = vmax.f32 %v5886_v4, 0.0 }
 0x1e1   : > { %v975_v15 = vpop.f32.mrf.mxu0  ;;  %v1028_v14 = vpop.f32.mrf.mxu1  ;;  %8761 = vst [vmem:[#allocation45_spill] sm:$0xff] %v5883_v8  ;;  %8762 = vst [vmem:[#allocation46_spill] sm:$0xff] %v5886_v4 }
 0x1e2   : > { %v5871_v43 = vadd.f32 %v975_v15, %v5658_v38  ;;  %v5874_v31 = vadd.f32 %v1028_v14, %v5658_v38  ;;  %8763 = vst [vmem:[#allocation47_spill] sm:$0xff] %v5889_v37  ;;  %v5892_v15 = vadd.f32 %v1026_v0, %v5658_v38  ;;  %v8773_v51 = vmax.f32 %v5889_v37, 0.0 }
 0x1e3   : > { %v977_v32 = vpop.f32.mrf.mxu0  ;;  %v1030_v27 = vpop.f32.mrf.mxu1 }
 0x1e4   : > { %8757 = vst [vmem:[#allocation41_spill] sm:$0xff] %v5871_v43  ;;  %8758 = vst [vmem:[#allocation42_spill] sm:$0xff] %v5874_v31  ;;  %v5877_v25 = vadd.f32 %v977_v32, %v5662_v40  ;;  %v5880_v26 = vadd.f32 %v1030_v27, %v5662_v40  ;;  %v5895_v32 = vadd.f32 %v967_v9, %v5664_v41  ;;  %v8454_v9 = vmax.f32 %v5871_v43, 0.0 }
 0x1e5   : > { %8764 = vst [vmem:[#allocation48_spill] sm:$0xff] %v5892_v15  ;;  %v979_v14 = vpop.f32.mrf.mxu0  ;;  %v1032_v24 = vpop.f32.mrf.mxu1  ;;  %v5898_v27 = vadd.f32 %v1020_v44, %v5664_v41  ;;  %v8775_v43 = vmax.f32 %v5892_v15, 0.0 }
 0x1e6   : > { %8759 = vst [vmem:[#allocation43_spill] sm:$0xff] %v5877_v25  ;;  %8760 = vst [vmem:[#allocation44_spill] sm:$0xff] %v5880_v26  ;;  %v5901_v18 = vadd.f32 %v979_v14, %v5662_v40  ;;  %v5904_v45 = vadd.f32 %v1032_v24, %v5662_v40  ;;  %v5918_v24 = vadd.f32 %v1016_v61, %v5660_v39  ;;  %v8771_v14 = vmax.f32 %v5874_v31, 0.0 }
 0x1e7   : > { %8765 = vst [vmem:[#allocation49_spill] sm:$0xff] %v5895_v32  ;;  %8766 = vst [vmem:[#allocation50_spill] sm:$0xff] %v5898_v27  ;;  %v8774_v0 = vmax.f32 %v5877_v25, 0.0 }
 0x1e8   : > { %8767 = vst [vmem:[#allocation51_spill] sm:$0xff] %v5901_v18  ;;  %8768 = vst [vmem:[#allocation52_spill] sm:$0xff] %v5904_v45  ;;  %v8453_v44 = vmax.f32 %v5901_v18, 0.0  ;;  %v8772_v21 = vmax.f32 %v5904_v45, 0.0  ;;  %v8780_v45 = vmax.f32 %v5868_v6, 0.0 }
 0x1e9   : > { %8770 = vst [vmem:[#allocation54_spill] sm:$0xff] %v5918_v24  ;;  %v1055_v52 = vpack.c.bf16 %v8774_v0, %v8773_v51  ;;  %v8458_v51 = vmax.f32 %v5915_v46, 0.0  ;;  %v8457_v0 = vmax.f32 %v5918_v24, 0.0 }
 0x1ea   : > { %v1056_v53 = vpack.c.bf16 %v8453_v44, %v8454_v9  ;;  %v1058_v61 = vpack.c.bf16 %v8772_v21, %v8771_v14  ;;  %v8776_v44 = vmax.f32 %v5880_v26, 0.0  ;;  %v8777_v14 = vmax.f32 %v5883_v8, 0.0 }
 0x1eb   : > { %v8778_v21 = vmax.f32 %v5865_v7, 0.0  ;;  %v1054_v37 = vpack.c.bf16 %v8780_v45, %v8779_v3  ;;  %v5012_v3 = vld [vmem:[%s5548_s18 + $0x40] ss:$16 sps:$4 sm:$0x1f]  }
 0x1ec   : > { %v1057_v9 = vpack.c.bf16 %v8776_v44, %v8775_v43  ;;  %1071 = vmatprep.subr.bf16.mxu0 %v1056_v53  ;;  %1124 = vmatprep.subr.bf16.mxu1 %v1058_v61  ;;  %v5008_v43 = vld [vmem:[%s5548_s18 + $0x44] ss:$16 sps:$4 sm:$0x1f]   ;;  %v5010_v53 = vld [vmem:[%s5548_s18 + $0x4c] ss:$16 sps:$4 sm:$0x1f]  }
 0x1ed   : > { %v1052_v11 = vpack.c.bf16 %v8778_v21, %v8777_v14  ;;  %1072 = vmatpush1.bf16.msra.mxu0 %v1055_v52  ;;  %v8781_v44 = vmax.f32 %v5895_v32, 0.0  ;;  %v8782_v14 = vmax.f32 %v5898_v27, 0.0  ;;  %v5013_v21 = vld [vmem:[%s5548_s18 + $0x48] ss:$16 sps:$4 sm:$0x1f]  }
 0x1ee   : > { %1125 = vmatpush1.bf16.msra.mxu1 %v1057_v9  ;;  %v1193_v52 = vsel %vm630_vm1, %v5013_v21, 0 }
 0x1ef   : > { %1073 = vmatprep.subr.bf16.mxu0 %v1052_v11  ;;  %1126 = vmatprep.subr.bf16.mxu1 %v1054_v37  ;;  %v1051_v61 = vpack.c.bf16 %v8781_v44, %v8458_v51  ;;  %v1053_v45 = vpack.c.bf16 %v8782_v14, %v8457_v0  ;;  %v1187_v37 = vsel %vm630_vm1, %v5012_v3, 0  ;;  %v8783_v11 = vmov 0  }
 0x1f1   : > { %1074 = vmatpush1.bf16.msra.mxu0 %v1051_v61 }
 0x1f2   : > { %1127 = vmatpush1.bf16.msra.mxu1 %v1053_v45  ;;  %4781 = vmatprep.subr.msk.bf16.mxu0 %vm630_vm1, %v5008_v43 }
 0x1f3   : > { %4784 = vmatprep.subr.msk.bf16.mxu1 %vm630_vm1, %v5010_v53 }
 0x1f4   : > { %4769 = vmatmul.mubr.msk.bf16.vlgmr.msra.gmra.mxu0 %vm783_vm8, %v5797_v12 }
 0x1f5   : > { %4771 = vmatmul.mubr.msk.bf16.vlgmr.msra.gmra.mxu1 %vm783_vm8, %v5797_v12  ;;  %1101 = vmatprep.mubr.bf16.mxu0 %v8783_v11 }
 0x1f6   : > { %1154 = vmatprep.mubr.bf16.mxu1 %v8783_v11  ;;  %1213 = vmatpush1.bf16.msra.mxu0 %v1187_v37 }
 0x1f7   : > { %1266 = vmatpush1.bf16.msra.mxu1 %v1193_v52 }
 0x1fc   : > { %4770 = vmatmul.mubr.msk.bf16.gmra.mxu0 %vm783_vm8, %v5812_v17 }
 0x1fd   : > { %4772 = vmatmul.mubr.msk.bf16.gmra.mxu1 %vm783_vm8, %v5812_v17  ;;  %1230 = vmatprep.mubr.bf16.mxu0 %v8783_v11 }
 0x1fe   : > { %1283 = vmatprep.mubr.bf16.mxu1 %v8783_v11 }
 0x204   : > { %4782 = vmatmul.mubr.msk.bf16.vlgmr.msra.gmra.mxu0 %vm623_vm3, %v5600_v23 }
 0x205   : > { %4785 = vmatmul.mubr.msk.bf16.vlgmr.msra.gmra.mxu1 %vm623_vm3, %v5600_v23  ;;  %1240 = vmatprep.mubr.bf16.mxu0 %v8783_v11 }
 0x206   : > { %1293 = vmatprep.mubr.bf16.mxu1 %v8783_v11 }
 0x20c   : > { %4783 = vmatmul.mubr.msk.bf16.gmra.mxu0 %vm623_vm3, %v5623_v28 }
 0x20d   : > { %4786 = vmatmul.mubr.msk.bf16.gmra.mxu1 %vm623_vm3, %v5623_v28  ;;  %1360 = vmatprep.mubr.bf16.mxu0 %v8783_v11 }
 0x20e   : > { %1413 = vmatprep.mubr.bf16.mxu1 %v8783_v11 }
 0x2b4   : > { %v5992_v9 = vpop.f32.mrf.mxu0 }
 0x2b5   : > { %v5994_v43 = vpop.f32.mrf.mxu1 }
 0x2b6   : > { %v5996_v53 = vpop.f32.mrf.mxu0 }
 0x2b7   : > { %v5998_v44 = vpop.f32.mrf.mxu1 }
 0x2b8   : > { %8784 = vst [vmem:[#allocation55_spill] sm:$0xff] %v5998_v44  ;;  %v6000_v61 = vpop.f32.mrf.mxu0 }
 0x2b9   : > { %8785 = vst [vmem:[#allocation56_spill] sm:$0xff] %v6000_v61  ;;  %v6002_v14 = vpop.f32.mrf.mxu1 }
 0x2ba   : > { %8786 = vst [vmem:[#allocation57_spill] sm:$0xff] %v6002_v14  ;;  %v6004_v45 = vpop.f32.mrf.mxu0 }
 0x2bb   : > { %v6006_v3 = vpop.f32.mrf.mxu1 }
 0x2bc   : > { %8787 = vst [vmem:[#allocation58_spill] sm:$0xff] %v6006_v3  ;;  %v6008_v21 = vpop.f32.mrf.mxu0 }
 0x2bd   : > { %8788 = vst [vmem:[#allocation59_spill] sm:$0xff] %v6008_v21  ;;  %v6010_v37 = vpop.f32.mrf.mxu1 }
 0x2be   : > { %8789 = vst [vmem:[#allocation60_spill] sm:$0xff] %v6010_v37  ;;  %v6012_v52 = vpop.f32.mrf.mxu0 }
 0x2bf   : > { %8790 = vst [vmem:[#allocation61_spill] sm:$0xff] %v6012_v52  ;;  %v6014_v0 = vpop.f32.mrf.mxu1 }
 0x2c0   : > { %8791 = vst [vmem:[#allocation62_spill] sm:$0xff] %v6014_v0  ;;  %v6016_v51 = vpop.f32.mrf.mxu0 }
 0x2c1   : > { %8792 = vst [vmem:[#allocation63_spill] sm:$0xff] %v6016_v51  ;;  %v6018_v15 = vpop.f32.mrf.mxu1 }
 0x2c2   : > { %8793 = vst [vmem:[#allocation64_spill] sm:$0xff] %v6018_v15  ;;  %v6020_v26 = vpop.f32.mrf.mxu0 }
 0x2c3   : > { %8794 = vst [vmem:[#allocation65_spill] sm:$0xff] %v6020_v26  ;;  %v6022_v31 = vpop.f32.mrf.mxu1 }
 0x2c4   : > { %8795 = vst [vmem:[#allocation66_spill] sm:$0xff] %v6022_v31  ;;  %v1232_v25 = vpop.f32.mrf.mxu0 }
 0x2c5   : > { %v1285_v18 = vpop.f32.mrf.mxu1  ;;  %v6075_v7 = vadd.f32 %v1232_v25, %v5660_v39 }
 0x2c6   : > { %v1234_v59 = vpop.f32.mrf.mxu0 }
 0x2c7   : > { %v1287_v54 = vpop.f32.mrf.mxu1  ;;  %8810 = vst [vmem:[#allocation81_spill] sm:$0xff] %v6075_v7 }
 0x2c8   : > { %v1236_v50 = vpop.f32.mrf.mxu0 }
 0x2c9   : > { %v1289_v21 = vpop.f32.mrf.mxu1 }
 0x2ca   : > { %v1238_v27 = vpop.f32.mrf.mxu0 }
 0x2cb   : > { %v1291_v37 = vpop.f32.mrf.mxu1  ;;  %v6025_v51 = vadd.f32 %v1238_v27, %v5664_v41  ;;  %v6043_v27 = vadd.f32 %v1234_v59, %v5660_v39 }
 0x2cc   : > { %v1242_v24 = vpop.f32.mrf.mxu0  ;;  %v6028_v15 = vadd.f32 %v1291_v37, %v5664_v41  ;;  %v6046_v37 = vadd.f32 %v1287_v54, %v5660_v39 }
 0x2cd   : > { %v1295_v52 = vpop.f32.mrf.mxu1  ;;  %8796 = vst [vmem:[#allocation67_spill] sm:$0xff] %v6025_v51  ;;  %8802 = vst [vmem:[#allocation73_spill] sm:$0xff] %v6043_v27  ;;  %v6049_v55 = vadd.f32 %v1242_v24, %v5658_v38 }
 0x2ce   : > { %v1244_v36 = vpop.f32.mrf.mxu0  ;;  %8797 = vst [vmem:[#allocation68_spill] sm:$0xff] %v6028_v15  ;;  %8803 = vst [vmem:[#allocation74_spill] sm:$0xff] %v6046_v37  ;;  %v8820_v24 = vmax.f32 %v6046_v37, 0.0 }
 0x2cf   : > { %v1297_v0 = vpop.f32.mrf.mxu1  ;;  %v6031_v58 = vadd.f32 %v1244_v36, %v5658_v38  ;;  %8804 = vst [vmem:[#allocation75_spill] sm:$0xff] %v6049_v55  ;;  %v6052_v36 = vadd.f32 %v1295_v52, %v5658_v38  ;;  %v8814_v20 = vmax.f32 %v6049_v55, 0.0 }
 0x2d0   : > { %v1246_v26 = vpop.f32.mrf.mxu0  ;;  %v6034_v32 = vadd.f32 %v1297_v0, %v5658_v38 }
 0x2d1   : > { %v1299_v31 = vpop.f32.mrf.mxu1  ;;  %8798 = vst [vmem:[#allocation69_spill] sm:$0xff] %v6031_v58  ;;  %v6037_v46 = vadd.f32 %v1246_v26, %v5662_v40  ;;  %8805 = vst [vmem:[#allocation76_spill] sm:$0xff] %v6052_v36  ;;  %v6055_v26 = vadd.f32 %v1236_v50, %v5664_v41  ;;  %v8491_v50 = vmax.f32 %v6031_v58, 0.0  ;;  %v8816_v58 = vmax.f32 %v6052_v36, 0.0 }
 0x2d2   : > { %8799 = vst [vmem:[#allocation70_spill] sm:$0xff] %v6034_v32  ;;  %v6040_v35 = vadd.f32 %v1299_v31, %v5662_v40  ;;  %v1248_v0 = vpop.f32.mrf.mxu0  ;;  %v6058_v31 = vadd.f32 %v1289_v21, %v5664_v41 }
 0x2d3   : > { %8800 = vst [vmem:[#allocation71_spill] sm:$0xff] %v6037_v46  ;;  %v1301_v6 = vpop.f32.mrf.mxu1  ;;  %8806 = vst [vmem:[#allocation77_spill] sm:$0xff] %v6055_v26  ;;  %v6061_v59 = vadd.f32 %v1248_v0, %v5662_v40  ;;  %v8812_v0 = vmax.f32 %v6034_v32, 0.0  ;;  %v8815_v52 = vmax.f32 %v6037_v46, 0.0 }
 0x2d4   : > { %8801 = vst [vmem:[#allocation72_spill] sm:$0xff] %v6040_v35  ;;  %8807 = vst [vmem:[#allocation78_spill] sm:$0xff] %v6058_v31  ;;  %v6064_v54 = vadd.f32 %v1301_v6, %v5662_v40  ;;  %v6078_v6 = vadd.f32 %v1285_v18, %v5660_v39 }
 0x2d5   : > { %8808 = vst [vmem:[#allocation79_spill] sm:$0xff] %v6061_v59  ;;  %v8490_v21 = vmax.f32 %v6061_v59, 0.0  ;;  %v1324_v8 = vpack.c.bf16 %v8815_v52, %v8814_v20  ;;  %v8495_v20 = vmax.f32 %v6075_v7, 0.0 }
 0x2d6   : > { %8809 = vst [vmem:[#allocation80_spill] sm:$0xff] %v6064_v54  ;;  %8811 = vst [vmem:[#allocation82_spill] sm:$0xff] %v6078_v6  ;;  %v8813_v25 = vmax.f32 %v6064_v54, 0.0  ;;  %v8821_v54 = vmax.f32 %v6028_v15, 0.0  ;;  %v8494_v52 = vmax.f32 %v6078_v6, 0.0 }
 0x2d7   : > { %v1325_v30 = vpack.c.bf16 %v8490_v21, %v8491_v50  ;;  %v8817_v21 = vmax.f32 %v6040_v35, 0.0 }
 0x2d8   : > { %v1327_v18 = vpack.c.bf16 %v8813_v25, %v8812_v0  ;;  %v8818_v0 = vmax.f32 %v6043_v27, 0.0  ;;  %v8819_v25 = vmax.f32 %v6025_v51, 0.0  ;;  %v1323_v55 = vpack.c.bf16 %v8821_v54, %v8820_v24  ;;  %v5018_v24 = vld [vmem:[%s5548_s18 + $0x60] ss:$16 sps:$4 sm:$0x1f]  }
 0x2d9   : > { %v1326_v50 = vpack.c.bf16 %v8817_v21, %v8816_v58  ;;  %1340 = vmatprep.subr.bf16.mxu0 %v1325_v30  ;;  %v5014_v30 = vld [vmem:[%s5548_s18 + $0x64] ss:$16 sps:$4 sm:$0x1f]   ;;  %v5016_v58 = vld [vmem:[%s5548_s18 + $0x6c] ss:$16 sps:$4 sm:$0x1f]  }
 0x2da   : > { %1393 = vmatprep.subr.bf16.mxu1 %v1327_v18  ;;  %v1321_v4 = vpack.c.bf16 %v8819_v25, %v8818_v0  ;;  %1341 = vmatpush1.bf16.msra.mxu0 %v1324_v8  ;;  %v8822_v21 = vmax.f32 %v6055_v26, 0.0  ;;  %v8823_v0 = vmax.f32 %v6058_v31, 0.0  ;;  %v5019_v25 = vld [vmem:[%s5548_s18 + $0x68] ss:$16 sps:$4 sm:$0x1f]  }
 0x2db   : > { %1394 = vmatpush1.bf16.msra.mxu1 %v1326_v50  ;;  %v1462_v8 = vsel %vm630_vm1, %v5019_v25, 0 }
 0x2dc   : > { %1342 = vmatprep.subr.bf16.mxu0 %v1321_v4  ;;  %1395 = vmatprep.subr.bf16.mxu1 %v1323_v55  ;;  %v1320_v18 = vpack.c.bf16 %v8822_v21, %v8495_v20  ;;  %v1322_v54 = vpack.c.bf16 %v8823_v0, %v8494_v52  ;;  %v1456_v55 = vsel %vm630_vm1, %v5018_v24, 0 }
 0x2de   : > { %1343 = vmatpush1.bf16.msra.mxu0 %v1320_v18 }
 0x2df   : > { %1396 = vmatpush1.bf16.msra.mxu1 %v1322_v54  ;;  %4799 = vmatprep.subr.msk.bf16.mxu0 %vm630_vm1, %v5014_v30 }
 0x2e0   : > { %4802 = vmatprep.subr.msk.bf16.mxu1 %vm630_vm1, %v5016_v58 }
 0x2e1   : > { %4787 = vmatmul.mubr.msk.bf16.vlgmr.msra.gmra.mxu0 %vm783_vm8, %v5797_v12 }
 0x2e2   : > { %4789 = vmatmul.mubr.msk.bf16.vlgmr.msra.gmra.mxu1 %vm783_vm8, %v5797_v12  ;;  %1370 = vmatprep.mubr.bf16.mxu0 %v8783_v11 }
 0x2e3   : > { %1423 = vmatprep.mubr.bf16.mxu1 %v8783_v11  ;;  %1482 = vmatpush1.bf16.msra.mxu0 %v1456_v55 }
 0x2e4   : > { %1535 = vmatpush1.bf16.msra.mxu1 %v1462_v8 }
 0x2e9   : > { %4788 = vmatmul.mubr.msk.bf16.gmra.mxu0 %vm783_vm8, %v5812_v17 }
 0x2ea   : > { %4790 = vmatmul.mubr.msk.bf16.gmra.mxu1 %vm783_vm8, %v5812_v17  ;;  %1499 = vmatprep.mubr.bf16.mxu0 %v8783_v11 }
 0x2eb   : > { %1552 = vmatprep.mubr.bf16.mxu1 %v8783_v11 }
 0x2f1   : > { %4800 = vmatmul.mubr.msk.bf16.vlgmr.msra.gmra.mxu0 %vm623_vm3, %v5600_v23 }
 0x2f2   : > { %4803 = vmatmul.mubr.msk.bf16.vlgmr.msra.gmra.mxu1 %vm623_vm3, %v5600_v23  ;;  %1509 = vmatprep.mubr.bf16.mxu0 %v8783_v11 }
 0x2f3   : > { %1562 = vmatprep.mubr.bf16.mxu1 %v8783_v11 }
 0x2f9   : > { %4801 = vmatmul.mubr.msk.bf16.gmra.mxu0 %vm623_vm3, %v5623_v28 }
 0x2fa   : > { %4804 = vmatmul.mubr.msk.bf16.gmra.mxu1 %vm623_vm3, %v5623_v28  ;;  %1629 = vmatprep.mubr.bf16.mxu0 %v8783_v11 }
 0x2fb   : > { %1682 = vmatprep.mubr.bf16.mxu1 %v8783_v11 }
 0x3a1   : > { %v6152_v4 = vpop.f32.mrf.mxu0 }
 0x3a2   : > { %v6154_v50 = vpop.f32.mrf.mxu1 }
 0x3a3   : > { %v6156_v30 = vpop.f32.mrf.mxu0 }
 0x3a4   : > { %v6158_v23 = vpop.f32.mrf.mxu1 }
 0x3a5   : > { %8824 = vst [vmem:[#allocation83_spill] sm:$0xff] %v6158_v23  ;;  %v6160_v58 = vpop.f32.mrf.mxu0 }
 0x3a6   : > { %8825 = vst [vmem:[#allocation84_spill] sm:$0xff] %v6160_v58  ;;  %v6162_v21 = vpop.f32.mrf.mxu1 }
 0x3a7   : > { %8826 = vst [vmem:[#allocation85_spill] sm:$0xff] %v6162_v21  ;;  %v6164_v18 = vpop.f32.mrf.mxu0 }
 0x3a8   : > { %v6166_v0 = vpop.f32.mrf.mxu1 }
 0x3a9   : > { %8827 = vst [vmem:[#allocation86_spill] sm:$0xff] %v6166_v0  ;;  %v6168_v54 = vpop.f32.mrf.mxu0 }
 0x3aa   : > { %8828 = vst [vmem:[#allocation87_spill] sm:$0xff] %v6168_v54  ;;  %v6170_v24 = vpop.f32.mrf.mxu1 }
 0x3ab   : > { %8829 = vst [vmem:[#allocation88_spill] sm:$0xff] %v6170_v24  ;;  %v6172_v25 = vpop.f32.mrf.mxu0 }
 0x3ac   : > { %8830 = vst [vmem:[#allocation89_spill] sm:$0xff] %v6172_v25  ;;  %v6174_v55 = vpop.f32.mrf.mxu1 }
 0x3ad   : > { %8831 = vst [vmem:[#allocation90_spill] sm:$0xff] %v6174_v55  ;;  %v6176_v8 = vpop.f32.mrf.mxu0 }
 0x3ae   : > { %8832 = vst [vmem:[#allocation91_spill] sm:$0xff] %v6176_v8  ;;  %v6178_v52 = vpop.f32.mrf.mxu1 }
 0x3af   : > { %8833 = vst [vmem:[#allocation92_spill] sm:$0xff] %v6178_v52  ;;  %v6180_v20 = vpop.f32.mrf.mxu0 }
 0x3b0   : > { %8834 = vst [vmem:[#allocation93_spill] sm:$0xff] %v6180_v20  ;;  %v6182_v36 = vpop.f32.mrf.mxu1 }
 0x3b1   : > { %8835 = vst [vmem:[#allocation94_spill] sm:$0xff] %v6182_v36  ;;  %v1501_v35 = vpop.f32.mrf.mxu0 }
 0x3b2   : > { %v1554_v32 = vpop.f32.mrf.mxu1  ;;  %v6235_v58 = vadd.f32 %v1501_v35, %v5660_v39 }
 0x3b3   : > { %v1503_v46 = vpop.f32.mrf.mxu0 }
 0x3b4   : > { %v1556_v59 = vpop.f32.mrf.mxu1  ;;  %8850 = vst [vmem:[#allocation109_spill] sm:$0xff] %v6235_v58 }
 0x3b5   : > { %v1505_v31 = vpop.f32.mrf.mxu0 }
 0x3b6   : > { %v1558_v54 = vpop.f32.mrf.mxu1 }
 0x3b7   : > { %v1507_v6 = vpop.f32.mrf.mxu0 }
 0x3b8   : > { %v1560_v24 = vpop.f32.mrf.mxu1  ;;  %v6185_v8 = vadd.f32 %v1507_v6, %v5664_v41  ;;  %v6203_v6 = vadd.f32 %v1503_v46, %v5660_v39 }
 0x3b9   : > { %v1511_v26 = vpop.f32.mrf.mxu0  ;;  %v6188_v52 = vadd.f32 %v1560_v24, %v5664_v41  ;;  %v6206_v24 = vadd.f32 %v1556_v59, %v5660_v39 }
 0x3ba   : > { %v1564_v25 = vpop.f32.mrf.mxu1  ;;  %8836 = vst [vmem:[#allocation95_spill] sm:$0xff] %v6185_v8  ;;  %8842 = vst [vmem:[#allocation101_spill] sm:$0xff] %v6203_v6  ;;  %v6209_v19 = vadd.f32 %v1511_v26, %v5658_v38 }
 0x3bb   : > { %v1513_v7 = vpop.f32.mrf.mxu0  ;;  %8837 = vst [vmem:[#allocation96_spill] sm:$0xff] %v6188_v52  ;;  %8843 = vst [vmem:[#allocation102_spill] sm:$0xff] %v6206_v24  ;;  %v8860_v26 = vmax.f32 %v6206_v24, 0.0 }
 0x3bc   : > { %v1566_v55 = vpop.f32.mrf.mxu1  ;;  %v6191_v15 = vadd.f32 %v1513_v7, %v5658_v38  ;;  %8844 = vst [vmem:[#allocation103_spill] sm:$0xff] %v6209_v19  ;;  %v6212_v7 = vadd.f32 %v1564_v25, %v5658_v38  ;;  %v8854_v60 = vmax.f32 %v6209_v19, 0.0  ;;  %v8861_v19 = vmax.f32 %v6188_v52, 0.0 }
 0x3bd   : > { %v1515_v20 = vpop.f32.mrf.mxu0  ;;  %v6194_v37 = vadd.f32 %v1566_v55, %v5658_v38 }
 0x3be   : > { %v1568_v36 = vpop.f32.mrf.mxu1  ;;  %8838 = vst [vmem:[#allocation97_spill] sm:$0xff] %v6191_v15  ;;  %v6197_v51 = vadd.f32 %v1515_v20, %v5662_v40  ;;  %8845 = vst [vmem:[#allocation104_spill] sm:$0xff] %v6212_v7  ;;  %v6215_v20 = vadd.f32 %v1505_v31, %v5664_v41  ;;  %v8526_v31 = vmax.f32 %v6191_v15, 0.0  ;;  %v8856_v15 = vmax.f32 %v6212_v7, 0.0 }
 0x3bf   : > { %8839 = vst [vmem:[#allocation98_spill] sm:$0xff] %v6194_v37  ;;  %v6200_v27 = vadd.f32 %v1568_v36, %v5662_v40  ;;  %v1517_v55 = vpop.f32.mrf.mxu0  ;;  %v6218_v36 = vadd.f32 %v1558_v54, %v5664_v41 }
 0x3c0   : > { %8840 = vst [vmem:[#allocation99_spill] sm:$0xff] %v6197_v51  ;;  %v1570_v29 = vpop.f32.mrf.mxu1  ;;  %8846 = vst [vmem:[#allocation105_spill] sm:$0xff] %v6215_v20  ;;  %v6221_v46 = vadd.f32 %v1517_v55, %v5662_v40  ;;  %v8852_v55 = vmax.f32 %v6194_v37, 0.0  ;;  %v8855_v25 = vmax.f32 %v6197_v51, 0.0 }
 0x3c1   : > { %8841 = vst [vmem:[#allocation100_spill] sm:$0xff] %v6200_v27  ;;  %8847 = vst [vmem:[#allocation106_spill] sm:$0xff] %v6218_v36  ;;  %v6224_v59 = vadd.f32 %v1570_v29, %v5662_v40  ;;  %v6238_v29 = vadd.f32 %v1554_v32, %v5660_v39 }
 0x3c2   : > { %8848 = vst [vmem:[#allocation107_spill] sm:$0xff] %v6221_v46  ;;  %v8525_v54 = vmax.f32 %v6221_v46, 0.0  ;;  %v1593_v10 = vpack.c.bf16 %v8855_v25, %v8854_v60  ;;  %v8530_v60 = vmax.f32 %v6235_v58, 0.0 }
 0x3c3   : > { %8849 = vst [vmem:[#allocation108_spill] sm:$0xff] %v6224_v59  ;;  %8851 = vst [vmem:[#allocation110_spill] sm:$0xff] %v6238_v29  ;;  %v8853_v35 = vmax.f32 %v6224_v59, 0.0  ;;  %v1592_v59 = vpack.c.bf16 %v8861_v19, %v8860_v26  ;;  %v8529_v25 = vmax.f32 %v6238_v29, 0.0 }
 0x3c4   : > { %v1594_v14 = vpack.c.bf16 %v8525_v54, %v8526_v31  ;;  %v8857_v54 = vmax.f32 %v6200_v27, 0.0  ;;  %v5024_v26 = vld [vmem:[%s5548_s18 + $0x80] ss:$16 sps:$4 sm:$0x1f]  }
 0x3c5   : > { %v1596_v32 = vpack.c.bf16 %v8853_v35, %v8852_v55  ;;  %v8858_v55 = vmax.f32 %v6203_v6, 0.0  ;;  %v8859_v35 = vmax.f32 %v6185_v8, 0.0 }
 0x3c6   : > { %v1595_v31 = vpack.c.bf16 %v8857_v54, %v8856_v15  ;;  %1609 = vmatprep.subr.bf16.mxu0 %v1594_v14  ;;  %v5020_v15 = vld [vmem:[%s5548_s18 + $0x84] ss:$16 sps:$4 sm:$0x1f]   ;;  %v5022_v14 = vld [vmem:[%s5548_s18 + $0x8c] ss:$16 sps:$4 sm:$0x1f]  }
 0x3c7   : > { %1662 = vmatprep.subr.bf16.mxu1 %v1596_v32  ;;  %v1590_v21 = vpack.c.bf16 %v8859_v35, %v8858_v55  ;;  %1610 = vmatpush1.bf16.msra.mxu0 %v1593_v10  ;;  %v8862_v54 = vmax.f32 %v6215_v20, 0.0  ;;  %v8863_v55 = vmax.f32 %v6218_v36, 0.0  ;;  %v5025_v35 = vld [vmem:[%s5548_s18 + $0x88] ss:$16 sps:$4 sm:$0x1f]   ;;  %v1725_v10 = vsel %vm630_vm1, %v5024_v26, 0 }
 0x3c8   : > { %1663 = vmatpush1.bf16.msra.mxu1 %v1595_v31 }
 0x3c9   : > { %1611 = vmatprep.subr.bf16.mxu0 %v1590_v21  ;;  %1664 = vmatprep.subr.bf16.mxu1 %v1592_v59  ;;  %v1589_v32 = vpack.c.bf16 %v8862_v54, %v8530_v60  ;;  %v1591_v19 = vpack.c.bf16 %v8863_v55, %v8529_v25  ;;  %v1731_v21 = vsel %vm630_vm1, %v5025_v35, 0  ;;  %v6303_v59 = vld [vmem:[%s8408_s3] sm:$0xff]  }
 0x3cb   : > { %1612 = vmatpush1.bf16.msra.mxu0 %v1589_v32 }
 0x3cc   : > { %1665 = vmatpush1.bf16.msra.mxu1 %v1591_v19  ;;  %4817 = vmatprep.subr.msk.bf16.mxu0 %vm630_vm1, %v5020_v15 }
 0x3cd   : > { %4820 = vmatprep.subr.msk.bf16.mxu1 %vm630_vm1, %v5022_v14 }
 0x3ce   : > { %4805 = vmatmul.mubr.msk.bf16.vlgmr.msra.gmra.mxu0 %vm783_vm8, %v5797_v12 }
 0x3cf   : > { %4807 = vmatmul.mubr.msk.bf16.vlgmr.msra.gmra.mxu1 %vm783_vm8, %v5797_v12  ;;  %1639 = vmatprep.mubr.bf16.mxu0 %v8783_v11 }
 0x3d0   : > { %1692 = vmatprep.mubr.bf16.mxu1 %v8783_v11  ;;  %1751 = vmatpush1.bf16.msra.mxu0 %v1725_v10 }
 0x3d1   : > { %1804 = vmatpush1.bf16.msra.mxu1 %v1731_v21 }
 0x3d6   : > { %4806 = vmatmul.mubr.msk.bf16.gmra.mxu0 %vm783_vm8, %v5812_v17 }
 0x3d7   : > { %4808 = vmatmul.mubr.msk.bf16.gmra.mxu1 %vm783_vm8, %v5812_v17  ;;  %1768 = vmatprep.mubr.bf16.mxu0 %v8783_v11 }
 0x3d8   : > { %1821 = vmatprep.mubr.bf16.mxu1 %v8783_v11 }
 0x3de   : > { %4818 = vmatmul.mubr.msk.bf16.vlgmr.msra.gmra.mxu0 %vm623_vm3, %v6303_v59 }
 0x3df   : > { %4821 = vmatmul.mubr.msk.bf16.vlgmr.msra.gmra.mxu1 %vm623_vm3, %v6303_v59  ;;  %1778 = vmatprep.mubr.bf16.mxu0 %v8783_v11 }
 0x3e0   : > { %1831 = vmatprep.mubr.bf16.mxu1 %v8783_v11 }
 0x3e6   : > { %4819 = vmatmul.mubr.msk.bf16.gmra.mxu0 %vm623_vm3, %v5623_v28 }
 0x3e7   : > { %4822 = vmatmul.mubr.msk.bf16.gmra.mxu1 %vm623_vm3, %v5623_v28  ;;  %1898 = vmatprep.mubr.bf16.mxu0 %v8783_v11 }
 0x3e8   : > { %1951 = vmatprep.mubr.bf16.mxu1 %v8783_v11 }
 0x48e   : > { %v6317_v31 = vpop.f32.mrf.mxu0 }
 0x48f   : > { %v6319_v15 = vpop.f32.mrf.mxu1 }
 0x490   : > { %v6321_v14 = vpop.f32.mrf.mxu0 }
 0x491   : > { %v6323_v54 = vpop.f32.mrf.mxu1 }
 0x492   : > { %8864 = vst [vmem:[#allocation111_spill] sm:$0xff] %v6323_v54  ;;  %v6325_v32 = vpop.f32.mrf.mxu0 }
 0x493   : > { %8865 = vst [vmem:[#allocation112_spill] sm:$0xff] %v6325_v32  ;;  %v6327_v55 = vpop.f32.mrf.mxu1 }
 0x494   : > { %8866 = vst [vmem:[#allocation113_spill] sm:$0xff] %v6327_v55  ;;  %v6329_v19 = vpop.f32.mrf.mxu0 }
 0x495   : > { %8867 = vst [vmem:[#allocation114_spill] sm:$0xff] %v6329_v19  ;;  %v6331_v26 = vpop.f32.mrf.mxu1 }
 0x496   : > { %8868 = vst [vmem:[#allocation115_spill] sm:$0xff] %v6331_v26  ;;  %v6333_v28 = vpop.f32.mrf.mxu0 }
 0x497   : > { %8869 = vst [vmem:[#allocation116_spill] sm:$0xff] %v6333_v28  ;;  %v6335_v35 = vpop.f32.mrf.mxu1 }
 0x498   : > { %8870 = vst [vmem:[#allocation117_spill] sm:$0xff] %v6335_v35  ;;  %v6337_v10 = vpop.f32.mrf.mxu0 }
 0x499   : > { %8871 = vst [vmem:[#allocation118_spill] sm:$0xff] %v6337_v10  ;;  %v6339_v21 = vpop.f32.mrf.mxu1 }
 0x49a   : > { %8872 = vst [vmem:[#allocation119_spill] sm:$0xff] %v6339_v21  ;;  %v6341_v25 = vpop.f32.mrf.mxu0 }
 0x49b   : > { %8873 = vst [vmem:[#allocation120_spill] sm:$0xff] %v6341_v25  ;;  %v6343_v60 = vpop.f32.mrf.mxu1 }
 0x49c   : > { %8874 = vst [vmem:[#allocation121_spill] sm:$0xff] %v6343_v60  ;;  %v6345_v7 = vpop.f32.mrf.mxu0 }
 0x49d   : > { %8875 = vst [vmem:[#allocation122_spill] sm:$0xff] %v6345_v7  ;;  %v6347_v27 = vpop.f32.mrf.mxu1 }
 0x49e   : > { %8876 = vst [vmem:[#allocation123_spill] sm:$0xff] %v6347_v27  ;;  %v1770_v37 = vpop.f32.mrf.mxu0 }
 0x49f   : > { %v1823_v51 = vpop.f32.mrf.mxu1  ;;  %v6400_v16 = vadd.f32 %v1770_v37, %v5660_v39 }
 0x4a0   : > { %v1772_v46 = vpop.f32.mrf.mxu0 }
 0x4a1   : > { %v1825_v36 = vpop.f32.mrf.mxu1  ;;  %8891 = vst [vmem:[#allocation138_spill] sm:$0xff] %v6400_v16 }
 0x4a2   : > { %v1774_v29 = vpop.f32.mrf.mxu0 }
 0x4a3   : > { %v1827_v28 = vpop.f32.mrf.mxu1 }
 0x4a4   : > { %v1776_v20 = vpop.f32.mrf.mxu0 }
 0x4a5   : > { %v1829_v35 = vpop.f32.mrf.mxu1  ;;  %v6350_v25 = vadd.f32 %v1776_v20, %v5664_v41  ;;  %v6368_v20 = vadd.f32 %v1772_v46, %v5660_v39 }
 0x4a6   : > { %v1780_v58 = vpop.f32.mrf.mxu0  ;;  %v6353_v60 = vadd.f32 %v1829_v35, %v5664_v41  ;;  %v6371_v35 = vadd.f32 %v1825_v36, %v5660_v39 }
 0x4a7   : > { %v1833_v10 = vpop.f32.mrf.mxu1  ;;  %8877 = vst [vmem:[#allocation124_spill] sm:$0xff] %v6350_v25  ;;  %8883 = vst [vmem:[#allocation130_spill] sm:$0xff] %v6368_v20  ;;  %v6374_v32 = vadd.f32 %v1780_v58, %v5658_v38 }
 0x4a8   : > { %v1782_v52 = vpop.f32.mrf.mxu0  ;;  %8878 = vst [vmem:[#allocation125_spill] sm:$0xff] %v6353_v60  ;;  %8884 = vst [vmem:[#allocation131_spill] sm:$0xff] %v6371_v35  ;;  %v8901_v26 = vmax.f32 %v6371_v35, 0.0  ;;  %v8902_v58 = vmax.f32 %v6353_v60, 0.0 }
 0x4a9   : > { %v1835_v21 = vpop.f32.mrf.mxu1  ;;  %v6356_v24 = vadd.f32 %v1782_v52, %v5658_v38  ;;  %8885 = vst [vmem:[#allocation132_spill] sm:$0xff] %v6374_v32  ;;  %v6377_v52 = vadd.f32 %v1833_v10, %v5658_v38  ;;  %v8895_v0 = vmax.f32 %v6374_v32, 0.0 }
 0x4aa   : > { %v1784_v7 = vpop.f32.mrf.mxu0  ;;  %v6359_v8 = vadd.f32 %v1835_v21, %v5658_v38  ;;  %v1861_v32 = vpack.c.bf16 %v8902_v58, %v8901_v26  ;;  %v5030_v58 = vld [vmem:[%s5548_s18 + $0xa0] ss:$16 sps:$4 sm:$0x1f]  }
 0x4ab   : > { %v1837_v27 = vpop.f32.mrf.mxu1  ;;  %8879 = vst [vmem:[#allocation126_spill] sm:$0xff] %v6356_v24  ;;  %v6362_v6 = vadd.f32 %v1784_v7, %v5662_v40  ;;  %8886 = vst [vmem:[#allocation133_spill] sm:$0xff] %v6377_v52  ;;  %v6380_v7 = vadd.f32 %v1774_v29, %v5664_v41  ;;  %v8561_v29 = vmax.f32 %v6356_v24, 0.0  ;;  %v8897_v24 = vmax.f32 %v6377_v52, 0.0 }
 0x4ac   : > { %8880 = vst [vmem:[#allocation127_spill] sm:$0xff] %v6359_v8  ;;  %v6365_v55 = vadd.f32 %v1837_v27, %v5662_v40  ;;  %v1786_v21 = vpop.f32.mrf.mxu0  ;;  %v6383_v27 = vadd.f32 %v1827_v28, %v5664_v41 }
 0x4ad   : > { %8881 = vst [vmem:[#allocation128_spill] sm:$0xff] %v6362_v6  ;;  %v1839_v61 = vpop.f32.mrf.mxu1  ;;  %8887 = vst [vmem:[#allocation134_spill] sm:$0xff] %v6380_v7  ;;  %v6386_v46 = vadd.f32 %v1786_v21, %v5662_v40  ;;  %v8893_v21 = vmax.f32 %v6359_v8, 0.0  ;;  %v8896_v10 = vmax.f32 %v6362_v6, 0.0 }
 0x4ae   : > { %8882 = vst [vmem:[#allocation129_spill] sm:$0xff] %v6365_v55  ;;  %8888 = vst [vmem:[#allocation135_spill] sm:$0xff] %v6383_v27  ;;  %v6389_v36 = vadd.f32 %v1839_v61, %v5662_v40  ;;  %v6403_v61 = vadd.f32 %v1823_v51, %v5660_v39 }
 0x4af   : > { %8889 = vst [vmem:[#allocation136_spill] sm:$0xff] %v6386_v46  ;;  %v8562_v28 = vmax.f32 %v6386_v46, 0.0  ;;  %v1862_v3 = vpack.c.bf16 %v8896_v10, %v8895_v0  ;;  %v8566_v0 = vmax.f32 %v6400_v16, 0.0 }
 0x4b0   : > { %8890 = vst [vmem:[#allocation137_spill] sm:$0xff] %v6389_v36  ;;  %8892 = vst [vmem:[#allocation139_spill] sm:$0xff] %v6403_v61  ;;  %v8894_v37 = vmax.f32 %v6389_v36, 0.0  ;;  %v8899_v36 = vmax.f32 %v6368_v20, 0.0  ;;  %v8565_v10 = vmax.f32 %v6403_v61, 0.0 }
 0x4b1   : > { %v1863_v54 = vpack.c.bf16 %v8562_v28, %v8561_v29  ;;  %v8898_v29 = vmax.f32 %v6365_v55, 0.0 }
 0x4b2   : > { %v1865_v51 = vpack.c.bf16 %v8894_v37, %v8893_v21  ;;  %v8900_v21 = vmax.f32 %v6350_v25, 0.0 }
 0x4b3   : > { %v1864_v28 = vpack.c.bf16 %v8898_v29, %v8897_v24  ;;  %1878 = vmatprep.subr.bf16.mxu0 %v1863_v54  ;;  %v5026_v24 = vld [vmem:[%s5548_s18 + $0xa4] ss:$16 sps:$4 sm:$0x1f]   ;;  %v5028_v29 = vld [vmem:[%s5548_s18 + $0xac] ss:$16 sps:$4 sm:$0x1f]  }
 0x4b4   : > { %v1859_v37 = vpack.c.bf16 %v8900_v21, %v8899_v36  ;;  %1931 = vmatprep.subr.bf16.mxu1 %v1865_v51  ;;  %1879 = vmatpush1.bf16.msra.mxu0 %v1862_v3  ;;  %v8903_v36 = vmax.f32 %v6380_v7, 0.0  ;;  %v8904_v54 = vmax.f32 %v6383_v27, 0.0  ;;  %v5031_v51 = vld [vmem:[%s5548_s18 + $0xa8] ss:$16 sps:$4 sm:$0x1f]   ;;  %v1994_v3 = vsel %vm630_vm1, %v5030_v58, 0 }
 0x4b5   : > { %1932 = vmatpush1.bf16.msra.mxu1 %v1864_v28 }
 0x4b6   : > { %1880 = vmatprep.subr.bf16.mxu0 %v1859_v37  ;;  %1933 = vmatprep.subr.bf16.mxu1 %v1861_v32  ;;  %v1858_v21 = vpack.c.bf16 %v8903_v36, %v8566_v0  ;;  %v1860_v26 = vpack.c.bf16 %v8904_v54, %v8565_v10  ;;  %v2000_v32 = vsel %vm630_vm1, %v5031_v51, 0 }
 0x4b8   : > { %1881 = vmatpush1.bf16.msra.mxu0 %v1858_v21 }
 0x4b9   : > { %1934 = vmatpush1.bf16.msra.mxu1 %v1860_v26  ;;  %4835 = vmatprep.subr.msk.bf16.mxu0 %vm630_vm1, %v5026_v24 }
 0x4ba   : > { %4838 = vmatprep.subr.msk.bf16.mxu1 %vm630_vm1, %v5028_v29 }
 0x4bb   : > { %4823 = vmatmul.mubr.msk.bf16.vlgmr.msra.gmra.mxu0 %vm783_vm8, %v5797_v12 }
 0x4bc   : > { %4825 = vmatmul.mubr.msk.bf16.vlgmr.msra.gmra.mxu1 %vm783_vm8, %v5797_v12  ;;  %1908 = vmatprep.mubr.bf16.mxu0 %v8783_v11  ;;  %v6474_v12 = vld [vmem:[%s8408_s3 + $0x8] sm:$0xff]  }
 0x4bd   : > { %1961 = vmatprep.mubr.bf16.mxu1 %v8783_v11  ;;  %2020 = vmatpush1.bf16.msra.mxu0 %v1994_v3 }
 0x4be   : > { %2073 = vmatpush1.bf16.msra.mxu1 %v2000_v32 }
 0x4c3   : > { %4824 = vmatmul.mubr.msk.bf16.gmra.mxu0 %vm783_vm8, %v5812_v17 }
 0x4c4   : > { %4826 = vmatmul.mubr.msk.bf16.gmra.mxu1 %vm783_vm8, %v5812_v17  ;;  %2037 = vmatprep.mubr.bf16.mxu0 %v8783_v11 }
 0x4c5   : > { %2090 = vmatprep.mubr.bf16.mxu1 %v8783_v11 }
 0x4cb   : > { %4836 = vmatmul.mubr.msk.bf16.vlgmr.msra.gmra.mxu0 %vm623_vm3, %v6303_v59 }
 0x4cc   : > { %4839 = vmatmul.mubr.msk.bf16.vlgmr.msra.gmra.mxu1 %vm623_vm3, %v6303_v59  ;;  %2047 = vmatprep.mubr.bf16.mxu0 %v8783_v11 }
 0x4cd   : > { %2100 = vmatprep.mubr.bf16.mxu1 %v8783_v11 }
 0x4d3   : > { %4837 = vmatmul.mubr.msk.bf16.gmra.mxu0 %vm623_vm3, %v6474_v12 }
 0x4d4   : > { %4840 = vmatmul.mubr.msk.bf16.gmra.mxu1 %vm623_vm3, %v6474_v12  ;;  %2167 = vmatprep.mubr.bf16.mxu0 %v8783_v11 }
 0x4d5   : > { %2220 = vmatprep.mubr.bf16.mxu1 %v8783_v11 }
 0x57b   : > { %v6482_v17 = vpop.f32.mrf.mxu0 }
 0x57c   : > { %v6484_v28 = vpop.f32.mrf.mxu1 }
 0x57d   : > { %v6486_v37 = vpop.f32.mrf.mxu0 }
 0x57e   : > { %8905 = vst [vmem:[#allocation140_spill] sm:$0xff] %v6486_v37  ;;  %v6488_v24 = vpop.f32.mrf.mxu1 }
 0x57f   : > { %8906 = vst [vmem:[#allocation141_spill] sm:$0xff] %v6488_v24  ;;  %v6490_v29 = vpop.f32.mrf.mxu0 }
 0x580   : > { %8907 = vst [vmem:[#allocation142_spill] sm:$0xff] %v6490_v29  ;;  %v6492_v36 = vpop.f32.mrf.mxu1 }
 0x581   : > { %8908 = vst [vmem:[#allocation143_spill] sm:$0xff] %v6492_v36  ;;  %v6494_v21 = vpop.f32.mrf.mxu0 }
 0x582   : > { %8909 = vst [vmem:[#allocation144_spill] sm:$0xff] %v6494_v21  ;;  %v6496_v54 = vpop.f32.mrf.mxu1 }
 0x583   : > { %8910 = vst [vmem:[#allocation145_spill] sm:$0xff] %v6496_v54  ;;  %v6498_v26 = vpop.f32.mrf.mxu0 }
 0x584   : > { %8911 = vst [vmem:[#allocation146_spill] sm:$0xff] %v6498_v26  ;;  %v6500_v58 = vpop.f32.mrf.mxu1 }
 0x585   : > { %8912 = vst [vmem:[#allocation147_spill] sm:$0xff] %v6500_v58  ;;  %v6502_v51 = vpop.f32.mrf.mxu0 }
 0x586   : > { %8913 = vst [vmem:[#allocation148_spill] sm:$0xff] %v6502_v51  ;;  %v6504_v3 = vpop.f32.mrf.mxu1 }
 0x587   : > { %8914 = vst [vmem:[#allocation149_spill] sm:$0xff] %v6504_v3  ;;  %v6506_v32 = vpop.f32.mrf.mxu0 }
 0x588   : > { %8915 = vst [vmem:[#allocation150_spill] sm:$0xff] %v6506_v32  ;;  %v6508_v10 = vpop.f32.mrf.mxu1 }
 0x589   : > { %8916 = vst [vmem:[#allocation151_spill] sm:$0xff] %v6508_v10  ;;  %v6510_v0 = vpop.f32.mrf.mxu0 }
 0x58a   : > { %8917 = vst [vmem:[#allocation152_spill] sm:$0xff] %v6510_v0  ;;  %v6512_v52 = vpop.f32.mrf.mxu1 }
 0x58b   : > { %8918 = vst [vmem:[#allocation153_spill] sm:$0xff] %v6512_v52  ;;  %v2039_v55 = vpop.f32.mrf.mxu0 }
 0x58c   : > { %v2092_v6 = vpop.f32.mrf.mxu1  ;;  %v6565_v34 = vadd.f32 %v2039_v55, %v5660_v39 }
 0x58d   : > { %v2041_v8 = vpop.f32.mrf.mxu0 }
 0x58e   : > { %v2094_v46 = vpop.f32.mrf.mxu1  ;;  %8933 = vst [vmem:[#allocation168_spill] sm:$0xff] %v6565_v34 }
 0x58f   : > { %v2043_v27 = vpop.f32.mrf.mxu0 }
 0x590   : > { %v2096_v26 = vpop.f32.mrf.mxu1 }
 0x591   : > { %v2045_v61 = vpop.f32.mrf.mxu0 }
 0x592   : > { %v2098_v58 = vpop.f32.mrf.mxu1  ;;  %v6515_v32 = vadd.f32 %v2045_v61, %v5664_v41  ;;  %v6533_v61 = vadd.f32 %v2041_v8, %v5660_v39 }
 0x593   : > { %v2049_v7 = vpop.f32.mrf.mxu0  ;;  %v6518_v10 = vadd.f32 %v2098_v58, %v5664_v41  ;;  %v6536_v58 = vadd.f32 %v2094_v46, %v5660_v39 }
 0x594   : > { %v2102_v51 = vpop.f32.mrf.mxu1  ;;  %8919 = vst [vmem:[#allocation154_spill] sm:$0xff] %v6515_v32  ;;  %8925 = vst [vmem:[#allocation160_spill] sm:$0xff] %v6533_v61  ;;  %v6539_v36 = vadd.f32 %v2049_v7, %v5658_v38 }
 0x595   : > { %v2051_v16 = vpop.f32.mrf.mxu0  ;;  %8920 = vst [vmem:[#allocation155_spill] sm:$0xff] %v6518_v10  ;;  %8926 = vst [vmem:[#allocation161_spill] sm:$0xff] %v6536_v58  ;;  %v8943_v54 = vmax.f32 %v6536_v58, 0.0  ;;  %v8944_v7 = vmax.f32 %v6518_v10, 0.0 }
 0x596   : > { %v2104_v3 = vpop.f32.mrf.mxu1  ;;  %v6521_v60 = vadd.f32 %v2051_v16, %v5658_v38  ;;  %8927 = vst [vmem:[#allocation162_spill] sm:$0xff] %v6539_v36  ;;  %v6542_v16 = vadd.f32 %v2102_v51, %v5658_v38  ;;  %v8937_v24 = vmax.f32 %v6539_v36, 0.0 }
 0x597   : > { %v2053_v0 = vpop.f32.mrf.mxu0  ;;  %v6524_v35 = vadd.f32 %v2104_v3, %v5658_v38  ;;  %v2130_v36 = vpack.c.bf16 %v8944_v7, %v8943_v54  ;;  %v5036_v7 = vld [vmem:[%s5548_s18 + $0xc0] ss:$16 sps:$4 sm:$0x1f]  }
 0x598   : > { %v2106_v52 = vpop.f32.mrf.mxu1  ;;  %8921 = vst [vmem:[#allocation156_spill] sm:$0xff] %v6521_v60  ;;  %v6527_v25 = vadd.f32 %v2053_v0, %v5662_v40  ;;  %8928 = vst [vmem:[#allocation163_spill] sm:$0xff] %v6542_v16  ;;  %v6545_v0 = vadd.f32 %v2043_v27, %v5664_v41  ;;  %v8597_v27 = vmax.f32 %v6521_v60, 0.0  ;;  %v8939_v60 = vmax.f32 %v6542_v16, 0.0 }
 0x599   : > { %8922 = vst [vmem:[#allocation157_spill] sm:$0xff] %v6524_v35  ;;  %v6530_v20 = vadd.f32 %v2106_v52, %v5662_v40  ;;  %v2055_v3 = vpop.f32.mrf.mxu0  ;;  %v6548_v52 = vadd.f32 %v2096_v26, %v5664_v41 }
 0x59a   : > { %8923 = vst [vmem:[#allocation158_spill] sm:$0xff] %v6527_v25  ;;  %v2108_v29 = vpop.f32.mrf.mxu1  ;;  %8929 = vst [vmem:[#allocation164_spill] sm:$0xff] %v6545_v0  ;;  %v6551_v8 = vadd.f32 %v2055_v3, %v5662_v40  ;;  %v8935_v3 = vmax.f32 %v6524_v35, 0.0  ;;  %v8938_v51 = vmax.f32 %v6527_v25, 0.0 }
 0x59b   : > { %8924 = vst [vmem:[#allocation159_spill] sm:$0xff] %v6530_v20  ;;  %8930 = vst [vmem:[#allocation165_spill] sm:$0xff] %v6548_v52  ;;  %v6554_v46 = vadd.f32 %v2108_v29, %v5662_v40  ;;  %v6568_v29 = vadd.f32 %v2092_v6, %v5660_v39 }
 0x59c   : > { %8931 = vst [vmem:[#allocation166_spill] sm:$0xff] %v6551_v8  ;;  %v8596_v26 = vmax.f32 %v6551_v8, 0.0  ;;  %v2131_v44 = vpack.c.bf16 %v8938_v51, %v8937_v24  ;;  %v8601_v24 = vmax.f32 %v6565_v34, 0.0 }
 0x59d   : > { %8932 = vst [vmem:[#allocation167_spill] sm:$0xff] %v6554_v46  ;;  %8934 = vst [vmem:[#allocation169_spill] sm:$0xff] %v6568_v29  ;;  %v8936_v55 = vmax.f32 %v6554_v46, 0.0  ;;  %v8941_v46 = vmax.f32 %v6533_v61, 0.0  ;;  %v8600_v51 = vmax.f32 %v6568_v29, 0.0 }
 0x59e   : > { %v2132_v23 = vpack.c.bf16 %v8596_v26, %v8597_v27  ;;  %v8940_v26 = vmax.f32 %v6530_v20, 0.0 }
 0x59f   : > { %v2134_v6 = vpack.c.bf16 %v8936_v55, %v8935_v3  ;;  %v8942_v3 = vmax.f32 %v6515_v32, 0.0 }
 0x5a0   : > { %v2133_v27 = vpack.c.bf16 %v8940_v26, %v8939_v60  ;;  %2147 = vmatprep.subr.bf16.mxu0 %v2132_v23  ;;  %v5032_v60 = vld [vmem:[%s5548_s18 + $0xc4] ss:$16 sps:$4 sm:$0x1f]   ;;  %v5034_v26 = vld [vmem:[%s5548_s18 + $0xcc] ss:$16 sps:$4 sm:$0x1f]  }
 0x5a1   : > { %v2128_v55 = vpack.c.bf16 %v8942_v3, %v8941_v46  ;;  %2200 = vmatprep.subr.bf16.mxu1 %v2134_v6  ;;  %2148 = vmatpush1.bf16.msra.mxu0 %v2131_v44  ;;  %v8945_v46 = vmax.f32 %v6545_v0, 0.0  ;;  %v8946_v23 = vmax.f32 %v6548_v52, 0.0  ;;  %v5037_v6 = vld [vmem:[%s5548_s18 + $0xc8] ss:$16 sps:$4 sm:$0x1f]   ;;  %v2263_v44 = vsel %vm630_vm1, %v5036_v7, 0 }
 0x5a2   : > { %2201 = vmatpush1.bf16.msra.mxu1 %v2133_v27  ;;  %v6621_v27 = vld [vmem:[%s8409_s4] sm:$0xff]  }
 0x5a3   : > { %2149 = vmatprep.subr.bf16.mxu0 %v2128_v55  ;;  %2202 = vmatprep.subr.bf16.mxu1 %v2130_v36  ;;  %v2127_v3 = vpack.c.bf16 %v8945_v46, %v8601_v24  ;;  %v2129_v54 = vpack.c.bf16 %v8946_v23, %v8600_v51  ;;  %v2269_v36 = vsel %vm630_vm1, %v5037_v6, 0  ;;  %v6632_v55 = vld [vmem:[%s8409_s4 + $0x8] sm:$0xff]  }
 0x5a5   : > { %2150 = vmatpush1.bf16.msra.mxu0 %v2127_v3 }
 0x5a6   : > { %2203 = vmatpush1.bf16.msra.mxu1 %v2129_v54  ;;  %4853 = vmatprep.subr.msk.bf16.mxu0 %vm630_vm1, %v5032_v60 }
 0x5a7   : > { %4856 = vmatprep.subr.msk.bf16.mxu1 %vm630_vm1, %v5034_v26 }
 0x5a8   : > { %4841 = vmatmul.mubr.msk.bf16.vlgmr.msra.gmra.mxu0 %vm783_vm8, %v6621_v27 }
 0x5a9   : > { %4843 = vmatmul.mubr.msk.bf16.vlgmr.msra.gmra.mxu1 %vm783_vm8, %v6621_v27  ;;  %2177 = vmatprep.mubr.bf16.mxu0 %v8783_v11 }
 0x5aa   : > { %2230 = vmatprep.mubr.bf16.mxu1 %v8783_v11  ;;  %2289 = vmatpush1.bf16.msra.mxu0 %v2263_v44 }
 0x5ab   : > { %2342 = vmatpush1.bf16.msra.mxu1 %v2269_v36 }
 0x5b0   : > { %4842 = vmatmul.mubr.msk.bf16.gmra.mxu0 %vm783_vm8, %v6632_v55 }
 0x5b1   : > { %4844 = vmatmul.mubr.msk.bf16.gmra.mxu1 %vm783_vm8, %v6632_v55  ;;  %2306 = vmatprep.mubr.bf16.mxu0 %v8783_v11 }
 0x5b2   : > { %2359 = vmatprep.mubr.bf16.mxu1 %v8783_v11 }
 0x5b8   : > { %4854 = vmatmul.mubr.msk.bf16.vlgmr.msra.gmra.mxu0 %vm623_vm3, %v6303_v59 }
 0x5b9   : > { %4857 = vmatmul.mubr.msk.bf16.vlgmr.msra.gmra.mxu1 %vm623_vm3, %v6303_v59  ;;  %2316 = vmatprep.mubr.bf16.mxu0 %v8783_v11 }
 0x5ba   : > { %2369 = vmatprep.mubr.bf16.mxu1 %v8783_v11 }
 0x5c0   : > { %4855 = vmatmul.mubr.msk.bf16.gmra.mxu0 %vm623_vm3, %v6474_v12 }
 0x5c1   : > { %4858 = vmatmul.mubr.msk.bf16.gmra.mxu1 %vm623_vm3, %v6474_v12  ;;  %2436 = vmatprep.mubr.bf16.mxu0 %v8783_v11 }
 0x5c2   : > { %2489 = vmatprep.mubr.bf16.mxu1 %v8783_v11 }
 0x668   : > { %v6652_v60 = vpop.f32.mrf.mxu0 }
 0x669   : > { %v6654_v26 = vpop.f32.mrf.mxu1 }
 0x66a   : > { %8947 = vst [vmem:[#allocation170_spill] sm:$0xff] %v6654_v26  ;;  %v6656_v46 = vpop.f32.mrf.mxu0 }
 0x66b   : > { %8948 = vst [vmem:[#allocation171_spill] sm:$0xff] %v6656_v46  ;;  %v6658_v3 = vpop.f32.mrf.mxu1 }
 0x66c   : > { %8949 = vst [vmem:[#allocation172_spill] sm:$0xff] %v6658_v3  ;;  %v6660_v23 = vpop.f32.mrf.mxu0 }
 0x66d   : > { %8950 = vst [vmem:[#allocation173_spill] sm:$0xff] %v6660_v23  ;;  %v6662_v54 = vpop.f32.mrf.mxu1 }
 0x66e   : > { %8951 = vst [vmem:[#allocation174_spill] sm:$0xff] %v6662_v54  ;;  %v6664_v7 = vpop.f32.mrf.mxu0 }
 0x66f   : > { %8952 = vst [vmem:[#allocation175_spill] sm:$0xff] %v6664_v7  ;;  %v6666_v6 = vpop.f32.mrf.mxu1 }
 0x670   : > { %8953 = vst [vmem:[#allocation176_spill] sm:$0xff] %v6666_v6  ;;  %v6668_v44 = vpop.f32.mrf.mxu0 }
 0x671   : > { %8954 = vst [vmem:[#allocation177_spill] sm:$0xff] %v6668_v44  ;;  %v6670_v36 = vpop.f32.mrf.mxu1 }
 0x672   : > { %8955 = vst [vmem:[#allocation178_spill] sm:$0xff] %v6670_v36  ;;  %v6672_v51 = vpop.f32.mrf.mxu0 }
 0x673   : > { %8956 = vst [vmem:[#allocation179_spill] sm:$0xff] %v6672_v51  ;;  %v6674_v24 = vpop.f32.mrf.mxu1 }
 0x674   : > { %8957 = vst [vmem:[#allocation180_spill] sm:$0xff] %v6674_v24  ;;  %v6676_v16 = vpop.f32.mrf.mxu0 }
 0x675   : > { %8958 = vst [vmem:[#allocation181_spill] sm:$0xff] %v6676_v16  ;;  %v6678_v20 = vpop.f32.mrf.mxu1 }
 0x676   : > { %8959 = vst [vmem:[#allocation182_spill] sm:$0xff] %v6678_v20  ;;  %v6680_v25 = vpop.f32.mrf.mxu0 }
 0x677   : > { %8960 = vst [vmem:[#allocation183_spill] sm:$0xff] %v6680_v25  ;;  %v6682_v35 = vpop.f32.mrf.mxu1 }
 0x678   : > { %8961 = vst [vmem:[#allocation184_spill] sm:$0xff] %v6682_v35  ;;  %v2308_v8 = vpop.f32.mrf.mxu0 }
 0x679   : > { %v2361_v52 = vpop.f32.mrf.mxu1  ;;  %v6735_v19 = vadd.f32 %v2308_v8, %v5660_v39 }
 0x67a   : > { %v2310_v29 = vpop.f32.mrf.mxu0 }
 0x67b   : > { %v2363_v0 = vpop.f32.mrf.mxu1  ;;  %8976 = vst [vmem:[#allocation199_spill] sm:$0xff] %v6735_v19 }
 0x67c   : > { %v2312_v34 = vpop.f32.mrf.mxu0 }
 0x67d   : > { %v2365_v44 = vpop.f32.mrf.mxu1 }
 0x67e   : > { %v2314_v10 = vpop.f32.mrf.mxu0 }
 0x67f   : > { %v2367_v36 = vpop.f32.mrf.mxu1  ;;  %v6685_v16 = vadd.f32 %v2314_v10, %v5664_v41  ;;  %v6703_v10 = vadd.f32 %v2310_v29, %v5660_v39 }
 0x680   : > { %v2318_v58 = vpop.f32.mrf.mxu0  ;;  %v6688_v20 = vadd.f32 %v2367_v36, %v5664_v41  ;;  %v6706_v36 = vadd.f32 %v2363_v0, %v5660_v39 }
 0x681   : > { %v2371_v51 = vpop.f32.mrf.mxu1  ;;  %8962 = vst [vmem:[#allocation185_spill] sm:$0xff] %v6685_v16  ;;  %8968 = vst [vmem:[#allocation191_spill] sm:$0xff] %v6703_v10  ;;  %v6709_v3 = vadd.f32 %v2318_v58, %v5658_v38 }
 0x682   : > { %v2320_v32 = vpop.f32.mrf.mxu0  ;;  %8963 = vst [vmem:[#allocation186_spill] sm:$0xff] %v6688_v20  ;;  %8969 = vst [vmem:[#allocation192_spill] sm:$0xff] %v6706_v36  ;;  %v8986_v46 = vmax.f32 %v6706_v36, 0.0  ;;  %v8987_v58 = vmax.f32 %v6688_v20, 0.0 }
 0x683   : > { %v2373_v24 = vpop.f32.mrf.mxu1  ;;  %v6691_v61 = vadd.f32 %v2320_v32, %v5658_v38  ;;  %8970 = vst [vmem:[#allocation193_spill] sm:$0xff] %v6709_v3  ;;  %v6712_v32 = vadd.f32 %v2371_v51, %v5658_v38  ;;  %v8980_v21 = vmax.f32 %v6709_v3, 0.0 }
 0x684   : > { %v2322_v25 = vpop.f32.mrf.mxu0  ;;  %v6694_v54 = vadd.f32 %v2373_v24, %v5658_v38  ;;  %v2399_v3 = vpack.c.bf16 %v8987_v58, %v8986_v46  ;;  %v5042_v58 = vld [vmem:[%s5548_s18 + $0xe0] ss:$16 sps:$4 sm:$0x1f]  }
 0x685   : > { %v2375_v35 = vpop.f32.mrf.mxu1  ;;  %8964 = vst [vmem:[#allocation187_spill] sm:$0xff] %v6691_v61  ;;  %v6697_v23 = vadd.f32 %v2322_v25, %v5662_v40  ;;  %8971 = vst [vmem:[#allocation194_spill] sm:$0xff] %v6712_v32  ;;  %v6715_v25 = vadd.f32 %v2312_v34, %v5664_v41  ;;  %v8635_v34 = vmax.f32 %v6691_v61, 0.0  ;;  %v8982_v61 = vmax.f32 %v6712_v32, 0.0 }
 0x686   : > { %8965 = vst [vmem:[#allocation188_spill] sm:$0xff] %v6694_v54  ;;  %v6700_v6 = vadd.f32 %v2375_v35, %v5662_v40  ;;  %v2324_v24 = vpop.f32.mrf.mxu0  ;;  %v6718_v35 = vadd.f32 %v2365_v44, %v5664_v41 }
 0x687   : > { %8966 = vst [vmem:[#allocation189_spill] sm:$0xff] %v6697_v23  ;;  %v2377_v7 = vpop.f32.mrf.mxu1  ;;  %8972 = vst [vmem:[#allocation195_spill] sm:$0xff] %v6715_v25  ;;  %v6721_v29 = vadd.f32 %v2324_v24, %v5662_v40  ;;  %v8978_v24 = vmax.f32 %v6694_v54, 0.0  ;;  %v8981_v51 = vmax.f32 %v6697_v23, 0.0 }
 0x688   : > { %8967 = vst [vmem:[#allocation190_spill] sm:$0xff] %v6700_v6  ;;  %8973 = vst [vmem:[#allocation196_spill] sm:$0xff] %v6718_v35  ;;  %v6724_v0 = vadd.f32 %v2377_v7, %v5662_v40  ;;  %v6738_v7 = vadd.f32 %v2361_v52, %v5660_v39 }
 0x689   : > { %8974 = vst [vmem:[#allocation197_spill] sm:$0xff] %v6721_v29  ;;  %v8634_v44 = vmax.f32 %v6721_v29, 0.0  ;;  %v2400_v26 = vpack.c.bf16 %v8981_v51, %v8980_v21  ;;  %v8639_v21 = vmax.f32 %v6735_v19, 0.0 }
 0x68a   : > { %8975 = vst [vmem:[#allocation198_spill] sm:$0xff] %v6724_v0  ;;  %8977 = vst [vmem:[#allocation200_spill] sm:$0xff] %v6738_v7  ;;  %v8979_v8 = vmax.f32 %v6724_v0, 0.0  ;;  %v8984_v0 = vmax.f32 %v6703_v10, 0.0  ;;  %v8638_v51 = vmax.f32 %v6738_v7, 0.0 }
 0x68b   : > { %v2401_v37 = vpack.c.bf16 %v8634_v44, %v8635_v34  ;;  %v8983_v44 = vmax.f32 %v6700_v6, 0.0 }
 0x68c   : > { %v2403_v52 = vpack.c.bf16 %v8979_v8, %v8978_v24  ;;  %v8985_v24 = vmax.f32 %v6685_v16, 0.0 }
 0x68d   : > { %v2402_v34 = vpack.c.bf16 %v8983_v44, %v8982_v61  ;;  %2416 = vmatprep.subr.bf16.mxu0 %v2401_v37  ;;  %v5038_v61 = vld [vmem:[%s5548_s18 + $0xe4] ss:$16 sps:$4 sm:$0x1f]   ;;  %v5040_v44 = vld [vmem:[%s5548_s18 + $0xec] ss:$16 sps:$4 sm:$0x1f]  }
 0x68e   : > { %v2397_v8 = vpack.c.bf16 %v8985_v24, %v8984_v0  ;;  %2469 = vmatprep.subr.bf16.mxu1 %v2403_v52  ;;  %2417 = vmatpush1.bf16.msra.mxu0 %v2400_v26  ;;  %v8988_v0 = vmax.f32 %v6715_v25, 0.0  ;;  %v8989_v37 = vmax.f32 %v6718_v35, 0.0  ;;  %v5043_v52 = vld [vmem:[%s5548_s18 + $0xe8] ss:$16 sps:$4 sm:$0x1f]   ;;  %v2532_v26 = vsel %vm630_vm1, %v5042_v58, 0 }
 0x68f   : > { %2470 = vmatpush1.bf16.msra.mxu1 %v2402_v34 }
 0x690   : > { %2418 = vmatprep.subr.bf16.mxu0 %v2397_v8  ;;  %2471 = vmatprep.subr.bf16.mxu1 %v2399_v3  ;;  %v2396_v24 = vpack.c.bf16 %v8988_v0, %v8639_v21  ;;  %v2398_v46 = vpack.c.bf16 %v8989_v37, %v8638_v51  ;;  %v2538_v3 = vsel %vm630_vm1, %v5043_v52, 0 }
 0x692   : > { %2419 = vmatpush1.bf16.msra.mxu0 %v2396_v24 }
 0x693   : > { %2472 = vmatpush1.bf16.msra.mxu1 %v2398_v46  ;;  %4871 = vmatprep.subr.msk.bf16.mxu0 %vm630_vm1, %v5038_v61 }
 0x694   : > { %4874 = vmatprep.subr.msk.bf16.mxu1 %vm630_vm1, %v5040_v44 }
 0x695   : > { %4859 = vmatmul.mubr.msk.bf16.vlgmr.msra.gmra.mxu0 %vm783_vm8, %v6621_v27 }
 0x696   : > { %4861 = vmatmul.mubr.msk.bf16.vlgmr.msra.gmra.mxu1 %vm783_vm8, %v6621_v27  ;;  %2446 = vmatprep.mubr.bf16.mxu0 %v8783_v11 }
 0x697   : > { %2499 = vmatprep.mubr.bf16.mxu1 %v8783_v11  ;;  %2558 = vmatpush1.bf16.msra.mxu0 %v2532_v26 }
 0x698   : > { %2611 = vmatpush1.bf16.msra.mxu1 %v2538_v3 }
 0x69d   : > { %4860 = vmatmul.mubr.msk.bf16.gmra.mxu0 %vm783_vm8, %v6632_v55 }
 0x69e   : > { %4862 = vmatmul.mubr.msk.bf16.gmra.mxu1 %vm783_vm8, %v6632_v55  ;;  %2575 = vmatprep.mubr.bf16.mxu0 %v8783_v11 }
 0x69f   : > { %2628 = vmatprep.mubr.bf16.mxu1 %v8783_v11 }
 0x6a5   : > { %4872 = vmatmul.mubr.msk.bf16.vlgmr.msra.gmra.mxu0 %vm623_vm3, %v6303_v59 }
 0x6a6   : > { %4875 = vmatmul.mubr.msk.bf16.vlgmr.msra.gmra.mxu1 %vm623_vm3, %v6303_v59  ;;  %2585 = vmatprep.mubr.bf16.mxu0 %v8783_v11 }
 0x6a7   : > { %2638 = vmatprep.mubr.bf16.mxu1 %v8783_v11 }
 0x6ad   : > { %4873 = vmatmul.mubr.msk.bf16.gmra.mxu0 %vm623_vm3, %v6474_v12 }
 0x6ae   : > { %4876 = vmatmul.mubr.msk.bf16.gmra.mxu1 %vm623_vm3, %v6474_v12  ;;  %2705 = vmatprep.mubr.bf16.mxu0 %v8783_v11 }
 0x6af   : > { %2758 = vmatprep.mubr.bf16.mxu1 %v8783_v11 }
 0x755   : > { %v6812_v34 = vpop.f32.mrf.mxu0 }
 0x756   : > { %v6814_v8 = vpop.f32.mrf.mxu1 }
 0x757   : > { %v6816_v61 = vpop.f32.mrf.mxu0 }
 0x758   : > { %v6818_v59 = vpop.f32.mrf.mxu1 }
 0x759   : > { %8990 = vst [vmem:[#allocation201_spill] sm:$0xff] %v6818_v59  ;;  %v6820_v44 = vpop.f32.mrf.mxu0 }
 0x75a   : > { %8991 = vst [vmem:[#allocation202_spill] sm:$0xff] %v6820_v44  ;;  %v6822_v0 = vpop.f32.mrf.mxu1 }
 0x75b   : > { %8992 = vst [vmem:[#allocation203_spill] sm:$0xff] %v6822_v0  ;;  %v6824_v24 = vpop.f32.mrf.mxu0 }
 0x75c   : > { %8993 = vst [vmem:[#allocation204_spill] sm:$0xff] %v6824_v24  ;;  %v6826_v37 = vpop.f32.mrf.mxu1 }
 0x75d   : > { %8994 = vst [vmem:[#allocation205_spill] sm:$0xff] %v6826_v37  ;;  %v6828_v12 = vpop.f32.mrf.mxu0 }
 0x75e   : > { %8995 = vst [vmem:[#allocation206_spill] sm:$0xff] %v6828_v12  ;;  %v6830_v46 = vpop.f32.mrf.mxu1 }
 0x75f   : > { %8996 = vst [vmem:[#allocation207_spill] sm:$0xff] %v6830_v46  ;;  %v6832_v58 = vpop.f32.mrf.mxu0  ;;  %v6846_v46 = vadd.f32 %v5670_v47, %v5666_v42 }
 0x760   : > { %8997 = vst [vmem:[#allocation208_spill] sm:$0xff] %v6832_v58  ;;  %v6834_v52 = vpop.f32.mrf.mxu1 }
 0x761   : > { %8998 = vst [vmem:[#allocation209_spill] sm:$0xff] %v6834_v52  ;;  %v6836_v26 = vpop.f32.mrf.mxu0  ;;  %v6857_v7 = vmul.f32 0.2, %v6846_v46  ;;  %vm534_vm11 = vcmp.ge.f32.partialorder %v6846_v46, 0.0 }
 0x762   : > { %8999 = vst [vmem:[#allocation210_spill] sm:$0xff] %v6836_v26  ;;  %v6838_v3 = vpop.f32.mrf.mxu1  ;;  %v6850_v26 = vadd.f32 %v5672_v48, %v5666_v42 }
 0x763   : > { %9000 = vst [vmem:[#allocation211_spill] sm:$0xff] %v6838_v3  ;;  %v6840_v51 = vpop.f32.mrf.mxu0 }
 0x764   : > { %9001 = vst [vmem:[#allocation212_spill] sm:$0xff] %v6840_v51  ;;  %v6842_v21 = vpop.f32.mrf.mxu1  ;;  %v488_v51 = vadd.f32 %v5678_v56, %v5674_v49  ;;  %v544_v19 = vmul.f32 0.2, %v6850_v26  ;;  %vm536_vm12 = vcmp.ge.f32.partialorder %v6850_v26, 0.0 }
 0x765   : > { %9002 = vst [vmem:[#allocation213_spill] sm:$0xff] %v6842_v21  ;;  %v2577_v32 = vpop.f32.mrf.mxu0  ;;  %v531_v21 = vadd.f32 %v5680_v57, %v5674_v49 }
 0x766   : > { %v2630_v6 = vpop.f32.mrf.mxu1  ;;  %vm538_vm9 = vcmp.ge.f32.partialorder %v488_v51, 0.0  ;;  %v546_v20 = vmul.f32 0.2, %v488_v51 }
 0x767   : > { %v2579_v23 = vpop.f32.mrf.mxu0  ;;  %vm540_vm10 = vcmp.ge.f32.partialorder %v531_v21, 0.0  ;;  %v548_v42 = vmul.f32 0.2, %v531_v21 }
 0x768   : > { %v2632_v54 = vpop.f32.mrf.mxu1 }
 0x769   : > { %v2581_v29 = vpop.f32.mrf.mxu0 }
 0x76a   : > { %v2634_v12 = vpop.f32.mrf.mxu1 }
 0x76b   : > { %v2583_v58 = vpop.f32.mrf.mxu0 }
 0x76c   : > { %v2636_v52 = vpop.f32.mrf.mxu1  ;;  %v6861_v48 = vadd.f32 %v2583_v58, %v5664_v41  ;;  %v6879_v58 = vadd.f32 %v2579_v23, %v5660_v39 }
 0x76d   : > { %v2587_v3 = vpop.f32.mrf.mxu0  ;;  %v6864_v56 = vadd.f32 %v2636_v52, %v5664_v41  ;;  %v6882_v52 = vadd.f32 %v2632_v54, %v5660_v39 }
 0x76e   : > { %v2640_v35 = vpop.f32.mrf.mxu1  ;;  %9003 = vst [vmem:[#allocation214_spill] sm:$0xff] %v6861_v48  ;;  %9009 = vst [vmem:[#allocation220_spill] sm:$0xff] %v6879_v58  ;;  %v6885_v44 = vadd.f32 %v2587_v3, %v5658_v38 }
 0x76f   : > { %v2589_v25 = vpop.f32.mrf.mxu0  ;;  %9004 = vst [vmem:[#allocation215_spill] sm:$0xff] %v6864_v56  ;;  %9010 = vst [vmem:[#allocation221_spill] sm:$0xff] %v6882_v52 }
 0x770   : > { %v2642_v47 = vpop.f32.mrf.mxu1  ;;  %v6867_v36 = vadd.f32 %v2589_v25, %v5658_v38  ;;  %9011 = vst [vmem:[#allocation222_spill] sm:$0xff] %v6885_v44  ;;  %v6888_v25 = vadd.f32 %v2640_v35, %v5658_v38 }
 0x771   : > { %v2591_v49 = vpop.f32.mrf.mxu0  ;;  %v6870_v16 = vadd.f32 %v2642_v47, %v5658_v38 }
 0x772   : > { %v2644_v57 = vpop.f32.mrf.mxu1  ;;  %9005 = vst [vmem:[#allocation216_spill] sm:$0xff] %v6867_v36  ;;  %v6873_v10 = vadd.f32 %v2591_v49, %v5662_v40  ;;  %9012 = vst [vmem:[#allocation223_spill] sm:$0xff] %v6888_v25  ;;  %v6891_v49 = vadd.f32 %v2581_v29, %v5664_v41  ;;  %v8671_v29 = vmax.f32 %v6867_v36, 0.0  ;;  %v9020_v35 = vmax.f32 %v6888_v25, 0.0 }
 0x773   : > { %9006 = vst [vmem:[#allocation217_spill] sm:$0xff] %v6870_v16  ;;  %v6876_v0 = vadd.f32 %v2644_v57, %v5662_v40  ;;  %v2593_v47 = vpop.f32.mrf.mxu0  ;;  %v6894_v57 = vadd.f32 %v2634_v12, %v5664_v41  ;;  %v8668_v24 = vmax.f32 %v6870_v16, 0.0 }
 0x774   : > { %9007 = vst [vmem:[#allocation218_spill] sm:$0xff] %v6873_v10  ;;  %v2646_v37 = vpop.f32.mrf.mxu1  ;;  %9013 = vst [vmem:[#allocation224_spill] sm:$0xff] %v6891_v49  ;;  %v6897_v23 = vadd.f32 %v2593_v47, %v5662_v40  ;;  %v6911_v47 = vadd.f32 %v2577_v32, %v5660_v39  ;;  %v9019_v3 = vmax.f32 %v6873_v10, 0.0 }
 0x775   : > { %9008 = vst [vmem:[#allocation219_spill] sm:$0xff] %v6876_v0  ;;  %9014 = vst [vmem:[#allocation225_spill] sm:$0xff] %v6894_v57  ;;  %v6900_v54 = vadd.f32 %v2646_v37, %v5662_v40  ;;  %v6914_v40 = vadd.f32 %v2630_v6, %v5660_v39  ;;  %v8672_v37 = vmax.f32 %v6885_v44, 0.0  ;;  %v9021_v36 = vmax.f32 %v6876_v0, 0.0 }
 0x776   : > { %9015 = vst [vmem:[#allocation226_spill] sm:$0xff] %v6897_v23  ;;  %v8670_v41 = vmax.f32 %v6897_v23, 0.0  ;;  %9017 = vst [vmem:[#allocation228_spill] sm:$0xff] %v6911_v47  ;;  %v9025_v6 = vmax.f32 %v6864_v56, 0.0 }
 0x777   : > { %9016 = vst [vmem:[#allocation227_spill] sm:$0xff] %v6900_v54  ;;  %v8669_v12 = vmax.f32 %v6900_v54, 0.0  ;;  %9018 = vst [vmem:[#allocation229_spill] sm:$0xff] %v6914_v40  ;;  %v2669_v59 = vpack.c.bf16 %v9019_v3, %v8672_v37  ;;  %v2671_v23 = vpack.c.bf16 %v9021_v36, %v9020_v35  ;;  %v8674_v3 = vmax.f32 %v6911_v47, 0.0 }
 0x778   : > { %v2670_v38 = vpack.c.bf16 %v8670_v41, %v8671_v29  ;;  %v9024_v29 = vmax.f32 %v6882_v52, 0.0  ;;  %v8673_v36 = vmax.f32 %v6914_v40, 0.0  ;;  %v554_v35 = vsel %vm538_vm9, %v488_v51, %v546_v20 }
 0x779   : > { %v2672_v32 = vpack.c.bf16 %v8669_v12, %v8668_v24  ;;  %v9022_v24 = vmax.f32 %v6879_v58, 0.0  ;;  %v9023_v12 = vmax.f32 %v6861_v48, 0.0  ;;  %v556_v37 = vsel %vm540_vm10, %v531_v21, %v548_v42 }
 0x77a   : > { %v2668_v39 = vpack.c.bf16 %v9025_v6, %v9024_v29  ;;  %2685 = vmatprep.subr.bf16.mxu0 %v2670_v38  ;;  %v9027_v38 = vmax.f32 %v6894_v57, 0.0  ;;  %v552_v20 = vsel %vm536_vm12, %v6850_v26, %v544_v19  ;;  %v9028_v42 = vpack.c.bf16 %v5686_v1, %v5682_v62  ;;  %v9059_v57 = vld [vmem:[#allocation57_spill] sm:$0xff] }
 0x77b   : > { %v2666_v41 = vpack.c.bf16 %v9023_v12, %v9022_v24  ;;  %2738 = vmatprep.subr.bf16.mxu1 %v2672_v32  ;;  %2686 = vmatpush1.bf16.msra.mxu0 %v2669_v59  ;;  %v9026_v24 = vmax.f32 %v6891_v49, 0.0  ;;  %v550_v59 = vsel %vm534_vm11, %v6846_v46, %v6857_v7  ;;  %v560_v51 = vpack.c.bf16 %v556_v37, %v552_v20  ;;  %v9031_v20 = vld [vmem:[#allocation114_spill] sm:$0xff]  ;;  %v9061_v49 = vld [vmem:[#allocation112_spill] sm:$0xff] }
 0x77c   : > { %2739 = vmatpush1.bf16.msra.mxu1 %v2671_v23  ;;  %v2667_v29 = vpack.c.bf16 %v9027_v38, %v8673_v36  ;;  %v558_v21 = vpack.c.bf16 %v554_v35, %v550_v59  ;;  %v9029_v7 = vpack.c.bf16 %v5688_v2, %v5684_v63  ;;  %v2879_v62 = vmax.f32 %v5832_v5, %v5992_v9  ;;  %v9030_v38 = vld [vmem:[#allocation170_spill] sm:$0xff] }
 0x77d   : > { %2687 = vmatprep.subr.bf16.mxu0 %v2666_v41  ;;  %2740 = vmatprep.subr.bf16.mxu1 %v2668_v39  ;;  %v2665_v12 = vpack.c.bf16 %v9026_v24, %v8674_v3  ;;  %v2881_v19 = vmax.f32 %v5834_v22, %v5994_v43  ;;  %v2880_v23 = vmax.f32 %v5836_v33, %v5996_v53 }
 0x77e   : > { %v2887_v63 = vmax.f32 %v2879_v62, %v6152_v4  ;;  %v2884_v32 = vmax.f32 %v5844_v13, %v6004_v45 }
 0x77f   : > { %2688 = vmatpush1.bf16.msra.mxu0 %v2665_v12  ;;  %v2888_v39 = vmax.f32 %v2880_v23, %v6156_v30 }
 0x780   : > { %2741 = vmatpush1.bf16.msra.mxu1 %v2667_v29  ;;  %2807 = vmatprep.subr.bf16.mxu0 %v558_v21  ;;  %v2895_v1 = vmax.f32 %v2887_v63, %v6317_v31  ;;  %v2892_v24 = vmax.f32 %v2884_v32, %v6164_v18 }
 0x781   : > { %2850 = vmatprep.subr.bf16.mxu1 %v560_v51  ;;  %v2896_v12 = vmax.f32 %v2888_v39, %v6321_v14  ;;  %v9032_v51 = vld [vmem:[#allocation140_spill] sm:$0xff] }
 0x782   : > { %4877 = vmatmul.mubr.msk.bf16.vlgmr.msra.gmra.mxu0 %vm783_vm8, %v6621_v27  ;;  %v2903_v2 = vmax.f32 %v2895_v1, %v6482_v17  ;;  %v2900_v21 = vmax.f32 %v2892_v24, %v9031_v20 }
 0x783   : > { %4879 = vmatmul.mubr.msk.bf16.vlgmr.msra.gmra.mxu1 %vm783_vm8, %v6621_v27  ;;  %2808 = vmatpush1.bf16.msra.mxu0 %v9028_v42  ;;  %v2904_v42 = vmax.f32 %v2896_v12, %v9032_v51  ;;  %v9036_v12 = vld [vmem:[#allocation55_spill] sm:$0xff] }
 0x784   : > { %2851 = vmatpush1.bf16.msra.mxu1 %v9029_v7  ;;  %2715 = vmatprep.mubr.bf16.mxu0 %v8783_v11  ;;  %v2911_v27 = vmax.f32 %v2903_v2, %v6652_v60 }
 0x785   : > { %2768 = vmatprep.mubr.bf16.mxu1 %v8783_v11 }
 0x786   : > { %v2919_v26 = vmax.f32 %v2911_v27, %v6812_v34 }
 0x78a   : > { %4878 = vmatmul.mubr.msk.bf16.gmra.mxu0 %vm783_vm8, %v6632_v55 }
 0x78b   : > { %4880 = vmatmul.mubr.msk.bf16.gmra.mxu1 %vm783_vm8, %v6632_v55  ;;  %2825 = vmatprep.mubr.bf16.mxu0 %v8783_v11  ;;  %v2889_v55 = vmax.f32 %v2881_v19, %v6154_v50  ;;  %v9033_v19 = vld [vmem:[#allocation144_spill] sm:$0xff] }
 0x78c   : > { %2868 = vmatprep.mubr.bf16.mxu1 %v8783_v11  ;;  %v2908_v27 = vmax.f32 %v2900_v21, %v9033_v19 }
 0x78d   : > { %v2897_v41 = vmax.f32 %v2889_v55, %v6319_v15  ;;  %v9034_v55 = vld [vmem:[#allocation171_spill] sm:$0xff] }
 0x78f   : > { %v2905_v6 = vmax.f32 %v2897_v41, %v6484_v28 }
 0x791   : > { %v2913_v29 = vmax.f32 %v2905_v6, %v9030_v38 }
 0x793   : > { %v2921_v63 = vmax.f32 %v2913_v29, %v6814_v8  ;;  %v9037_v29 = vld [vmem:[#allocation27_spill] sm:$0xff] }
 0x794   : > { %v2882_v21 = vmax.f32 %v9037_v29, %v9036_v12 }
 0x842   : > { %v2707_v46 = vpop.f32.mrf.mxu0 }
 0x843   : > { %v2927_v37 = vmax.f32 %v2919_v26, %v2707_v46  ;;  %v7011_v62 = vpop.f32.mrf.mxu1  ;;  %v2912_v26 = vmax.f32 %v2904_v42, %v9034_v55 }
 0x844   : > { %v7002_v35 = vpop.f32.mrf.mxu0  ;;  %v7022_v32 = vmax.f32 %v2921_v63, %v7011_v62 }
 0x845   : > { %v2935_v59 = vsub.f32 %v5832_v5, %v2927_v37  ;;  %v2983_v7 = vsub.f32 %v5992_v9, %v2927_v37  ;;  %v3031_v1 = vsub.f32 %v6152_v4, %v2927_v37  ;;  %v3079_v5 = vsub.f32 %v6317_v31, %v2927_v37  ;;  %v9035_v9 = vld [vmem:[#allocation175_spill] sm:$0xff] }
 0x846   : > { %v7015_v2 = vpop.f32.mrf.mxu0  ;;  %v3127_v41 = vsub.f32 %v6482_v17, %v2927_v37  ;;  %v2916_v39 = vmax.f32 %v2908_v27, %v9035_v9  ;;  %v2920_v6 = vmax.f32 %v2912_v26, %v6816_v61  ;;  %v3175_v4 = vsub.f32 %v6652_v60, %v2927_v37  ;;  %v9039_v27 = vld [vmem:[#allocation83_spill] sm:$0xff] }
 0x847   : > { %v2943_v23 = vmul.f32 1.442695, %v2935_v59  ;;  %v2991_v24 = vmul.f32 1.442695, %v2983_v7  ;;  %v3039_v36 = vmul.f32 1.442695, %v3031_v1  ;;  %v3223_v42 = vsub.f32 %v6812_v34, %v2927_v37 }
 0x848   : > { %v7030_v31 = vpop.f32.mrf.mxu0  ;;  %v9038_v59 = vld [vmem:[#allocation204_spill] sm:$0xff]  ;;  %v3087_v3 = vmul.f32 1.442695, %v3079_v5  ;;  %v3271_v63 = vsub.f32 %v2707_v46, %v2927_v37  ;;  %v7034_v25 = vmax.f32 %v2920_v6, %v7002_v35  ;;  %v2890_v26 = vmax.f32 %v2882_v21, %v9039_v27  ;;  %v9040_v5 = vld [vmem:[#allocation58_spill] sm:$0xff] }
 0x849   : > { %v2924_v17 = vmax.f32 %v2916_v39, %v9038_v59  ;;  %5054 = vpow2.f32 %v2943_v23  ;;  %v3135_v7 = vmul.f32 1.442695, %v3127_v41  ;;  %v2937_v60 = vsub.f32 %v5834_v22, %v7022_v32  ;;  %v9041_v46 = vld [vmem:[#allocation30_spill] sm:$0xff]  ;;  %v9042_v41 = vld [vmem:[#allocation111_spill] sm:$0xff] }
 0x84a   : > { %5056 = vpow2.f32 %v2991_v24  ;;  %v3183_v1 = vmul.f32 1.442695, %v3175_v4  ;;  %v2985_v34 = vsub.f32 %v5994_v43, %v7022_v32  ;;  %v2886_v37 = vmax.f32 %v9041_v46, %v9040_v5  ;;  %v7051_v4 = vpop.f32.mrf.mxu1  ;;  %v9043_v43 = vld [vmem:[#allocation86_spill] sm:$0xff] }
 0x84b   : > { %v7042_v0 = vmax.f32 %v2924_v17, %v7030_v31  ;;  %5058 = vpow2.f32 %v3039_v36  ;;  %v3231_v39 = vmul.f32 1.442695, %v3223_v42  ;;  %v3033_v23 = vsub.f32 %v6154_v50, %v7022_v32  ;;  %v9044_v42 = vld [vmem:[#allocation141_spill] sm:$0xff] }
 0x84c   : > { %v2898_v6 = vmax.f32 %v2890_v26, %v9042_v41  ;;  %5060 = vpow2.f32 %v3087_v3  ;;  %v3279_v22 = vmul.f32 1.442695, %v3271_v63  ;;  %v2936_v24 = vsub.f32 %v5836_v33, %v7034_v25  ;;  %v9045_v63 = vld [vmem:[#allocation115_spill] sm:$0xff] }
 0x84d   : > { %v2894_v21 = vmax.f32 %v2886_v37, %v9043_v43  ;;  %5062 = vpow2.f32 %v3135_v7  ;;  %v2947_v17 = vmul.f32 1.442695, %v2937_v60  ;;  %v2984_v36 = vsub.f32 %v5996_v53, %v7034_v25  ;;  %v9046_v37 = vld [vmem:[#allocation172_spill] sm:$0xff] }
 0x84e   : > { %v2906_v16 = vmax.f32 %v2898_v6, %v9044_v42  ;;  %5064 = vpow2.f32 %v3183_v1  ;;  %v2995_v50 = vmul.f32 1.442695, %v2985_v34  ;;  %v2940_v3 = vsub.f32 %v5844_v13, %v7042_v0  ;;  %v7065_v6 = vpop.f32.mrf.mxu1  ;;  %v9047_v1 = vld [vmem:[#allocation145_spill] sm:$0xff] }
 0x84f   : > { %v2902_v26 = vmax.f32 %v2894_v21, %v9045_v63  ;;  %5066 = vpow2.f32 %v3231_v39  ;;  %v3043_v33 = vmul.f32 1.442695, %v3033_v23  ;;  %v2988_v10 = vsub.f32 %v6004_v45, %v7042_v0  ;;  %v9048_v23 = vld [vmem:[#allocation201_spill] sm:$0xff] }
 0x850   : > { %v2914_v7 = vmax.f32 %v2906_v16, %v9046_v37  ;;  %5068 = vpow2.f32 %v3279_v22  ;;  %v3081_v53 = vsub.f32 %v6319_v15, %v7022_v32  ;;  %v2945_v60 = vmul.f32 1.442695, %v2936_v24  ;;  %v9049_v22 = vld [vmem:[#allocation176_spill] sm:$0xff] }
 0x851   : > { %v2910_v34 = vmax.f32 %v2902_v26, %v9047_v1  ;;  %5070 = vpow2.f32 %v2947_v17  ;;  %v3129_v13 = vsub.f32 %v6484_v28, %v7022_v32  ;;  %v2993_v39 = vmul.f32 1.442695, %v2984_v36  ;;  %v7081_v36 = vpop.f32.mrf.mxu1 }
 0x852   : > { %v2922_v21 = vmax.f32 %v2914_v7, %v9048_v23  ;;  %5072 = vpow2.f32 %v2995_v50  ;;  %v3177_v45 = vsub.f32 %v9030_v38, %v7022_v32  ;;  %v2953_v16 = vmul.f32 1.442695, %v2940_v3  ;;  %v9050_v50 = vld [vmem:[#allocation205_spill] sm:$0xff] }
 0x853   : > { %v2918_v44 = vmax.f32 %v2910_v34, %v9049_v22  ;;  %5074 = vpow2.f32 %v3043_v33  ;;  %v3032_v15 = vsub.f32 %v6156_v30, %v7034_v25  ;;  %v3001_v24 = vmul.f32 1.442695, %v2988_v10 }
 0x854   : > { %v3091_v26 = vmul.f32 1.442695, %v3081_v53  ;;  %v3225_v17 = vsub.f32 %v6814_v8, %v7022_v32  ;;  %5076 = vpow2.f32 %v2945_v60  ;;  %v7079_v28 = vmax.f32 %v2922_v21, %v7051_v4 }
 0x855   : > { %v2926_v38 = vmax.f32 %v2918_v44, %v9050_v50  ;;  %v3139_v3 = vmul.f32 1.442695, %v3129_v13  ;;  %5078 = vpow2.f32 %v2993_v39  ;;  %v3036_v33 = vsub.f32 %v6164_v18, %v7042_v0 }
 0x856   : > { %v7086_v7 = vpop.eup %5054  ;;  %v3187_v30 = vmul.f32 1.442695, %v3177_v45  ;;  %v3080_v10 = vsub.f32 %v6321_v14, %v7034_v25  ;;  %5080 = vpow2.f32 %v2953_v16  ;;  %v3041_v53 = vmul.f32 1.442695, %v3032_v15  ;;  %v9054_v16 = vld [vmem:[#allocation28_spill] sm:$0xff] }
 0x857   : > { %v7090_v8 = vpop.eup %5056  ;;  %v3128_v60 = vsub.f32 %v9032_v51, %v7034_v25  ;;  %5082 = vpow2.f32 %v3001_v24  ;;  %v7095_v44 = vmax.f32 %v2926_v38, %v7081_v36  ;;  %v3235_v18 = vmul.f32 1.442695, %v3225_v17  ;;  %v9053_v51 = vld [vmem:[#allocation56_spill] sm:$0xff] }
 0x858   : > { %9051 = vst [vmem:[#allocation170_spill] sm:$0xff] %v7090_v8  ;;  %v7097_v34 = vpop.eup %5058  ;;  %5084 = vpow2.f32 %v3091_v26  ;;  %v2938_v13 = vsub.f32 %v9037_v29, %v7079_v28  ;;  %v3049_v14 = vmul.f32 1.442695, %v3036_v33  ;;  %v3084_v21 = vsub.f32 %v9031_v20, %v7042_v0  ;;  %v9057_v20 = vld [vmem:[#allocation84_spill] sm:$0xff] }
 0x859   : > { %v7101_v39 = vpop.eup %5060  ;;  %5086 = vpow2.f32 %v3139_v3  ;;  %v2883_v15 = vmax.f32 %v9054_v16, %v9053_v51  ;;  %v3089_v24 = vmul.f32 1.442695, %v3080_v10  ;;  %v2986_v26 = vsub.f32 %v9036_v12, %v7079_v28  ;;  %v9060_v12 = vld [vmem:[#allocation29_spill] sm:$0xff] }
 0x85a   : > { %v7105_v45 = vpop.eup %5062  ;;  %5088 = vpow2.f32 %v3187_v30  ;;  %v3137_v29 = vmul.f32 1.442695, %v3128_v60  ;;  %v2942_v38 = vsub.f32 %v9041_v46, %v7095_v44  ;;  %v2949_v54 = vmul.f32 1.442695, %v2938_v13 }
 0x85b   : > { %9052 = vst [vmem:[#allocation114_spill] sm:$0xff] %v7105_v45  ;;  %v7111_v17 = vpop.eup %5064  ;;  %5090 = vpow2.f32 %v3041_v53  ;;  %v2891_v33 = vmax.f32 %v2883_v15, %v9057_v20  ;;  %v2990_v30 = vsub.f32 %v9040_v5, %v7095_v44  ;;  %v2885_v40 = vmax.f32 %v9060_v12, %v9059_v57  ;;  %v9063_v15 = vld [vmem:[#allocation85_spill] sm:$0xff] }
 0x85c   : > { %9055 = vst [vmem:[#allocation140_spill] sm:$0xff] %v7111_v17  ;;  %v7115_v3 = vpop.eup %5066  ;;  %5092 = vpow2.f32 %v3235_v18  ;;  %v3097_v53 = vmul.f32 1.442695, %v3084_v21  ;;  %v3132_v60 = vsub.f32 %v9033_v19, %v7042_v0  ;;  %v3176_v18 = vsub.f32 %v9034_v55, %v7034_v25  ;;  %v9065_v19 = vld [vmem:[#allocation142_spill] sm:$0xff] }
 0x85d   : > { %9056 = vst [vmem:[#allocation144_spill] sm:$0xff] %v7115_v3  ;;  %v7120_v10 = vpop.eup %5068  ;;  %5094 = vpow2.f32 %v3049_v14  ;;  %v2899_v47 = vmax.f32 %v2891_v33, %v9061_v49  ;;  %v2997_v13 = vmul.f32 1.442695, %v2986_v26  ;;  %v2893_v56 = vmax.f32 %v2885_v40, %v9063_v15  ;;  %v9066_v26 = vld [vmem:[#allocation113_spill] sm:$0xff] }
 0x85e   : > { %9058 = vst [vmem:[#allocation171_spill] sm:$0xff] %v7120_v10  ;;  %v7126_v46 = vpop.eup %5070  ;;  %5096 = vpow2.f32 %v3089_v24  ;;  %v3224_v14 = vsub.f32 %v6816_v61, %v7034_v25  ;;  %v2957_v21 = vmul.f32 1.442695, %v2942_v38  ;;  %v3034_v24 = vsub.f32 %v9039_v27, %v7079_v28  ;;  %v9067_v38 = vld [vmem:[#allocation173_spill] sm:$0xff]  ;;  %v9068_v27 = vld [vmem:[#allocation143_spill] sm:$0xff] }
 0x85f   : > { %v7131_v5 = vpop.eup %5072  ;;  %5098 = vpow2.f32 %v3137_v29  ;;  %v2907_v10 = vmax.f32 %v2899_v47, %v9065_v19  ;;  %v3005_v33 = vmul.f32 1.442695, %v2990_v30  ;;  %v2901_v3 = vmax.f32 %v2893_v56, %v9066_v26 }
 0x860   : > { %9062 = vst [vmem:[#allocation175_spill] sm:$0xff] %v7131_v5  ;;  %v7136_v52 = vpop.eup %5074  ;;  %5100 = vpow2.f32 %v2949_v54  ;;  %v3145_v40 = vmul.f32 1.442695, %v3132_v60  ;;  %v3180_v29 = vsub.f32 %v9035_v9, %v7042_v0  ;;  %v3185_v48 = vmul.f32 1.442695, %v3176_v18  ;;  %v9069_v9 = vld [vmem:[#allocation202_spill] sm:$0xff] }
 0x861   : > { %9064 = vst [vmem:[#allocation55_spill] sm:$0xff] %v7136_v52  ;;  %v7141_v55 = vpop.eup %5076  ;;  %5102 = vpow2.f32 %v3097_v53  ;;  %v2915_v17 = vmax.f32 %v2907_v10, %v9067_v38  ;;  %v3038_v54 = vsub.f32 %v9043_v43, %v7095_v44  ;;  %v2909_v30 = vmax.f32 %v2901_v3, %v9068_v27 }
 0x862   : > { %v7146_v61 = vpop.eup %5078  ;;  %5104 = vpow2.f32 %v2997_v13  ;;  %v3233_v58 = vmul.f32 1.442695, %v3224_v14  ;;  %v3272_v56 = vsub.f32 %v7002_v35, %v7034_v25  ;;  %v3045_v45 = vmul.f32 1.442695, %v3034_v24 }
 0x863   : > { %v7151_v47 = vpop.eup %5080  ;;  %5106 = vpow2.f32 %v2957_v21  ;;  %v2923_v60 = vmax.f32 %v2915_v17, %v9069_v9  ;;  %v3082_v10 = vsub.f32 %v9042_v41, %v7079_v28  ;;  %v3008_v43 = vadd.f32 %v7146_v61, %v7141_v55 }
 0x864   : > { %v7156_v53 = vpop.eup %5082  ;;  %5108 = vpow2.f32 %v3005_v33  ;;  %v3193_v3 = vmul.f32 1.442695, %v3180_v29  ;;  %v3228_v25 = vsub.f32 %v9038_v59, %v7042_v0  ;;  %v3053_v13 = vmul.f32 1.442695, %v3038_v54 }
 0x865   : > { %v7161_v18 = vpop.eup %5084  ;;  %5110 = vpow2.f32 %v3145_v40  ;;  %v7170_v17 = vmax.f32 %v2923_v60, %v7015_v2  ;;  %v3086_v41 = vsub.f32 %v9045_v63, %v7095_v44  ;;  %v3281_v21 = vmul.f32 1.442695, %v3272_v56 }
 0x866   : > { %9070 = vst [vmem:[#allocation27_spill] sm:$0xff] %v7161_v18  ;;  %v7167_v35 = vpop.eup %5086  ;;  %5112 = vpow2.f32 %v3185_v48  ;;  %v3130_v24 = vsub.f32 %v9044_v42, %v7079_v28  ;;  %v3012_v59 = vadd.f32 %v7156_v53, %v7151_v47  ;;  %v9073_v48 = vld [vmem:[#allocation174_spill] sm:$0xff]  ;;  %v3093_v29 = vmul.f32 1.442695, %v3082_v10 }
 0x867   : > { %9071 = vst [vmem:[#allocation204_spill] sm:$0xff] %v7167_v35  ;;  %v7174_v14 = vpop.eup %5088  ;;  %5114 = vpow2.f32 %v3233_v58  ;;  %v2917_v40 = vmax.f32 %v2909_v30, %v9073_v48  ;;  %v3178_v54 = vsub.f32 %v9046_v37, %v7079_v28  ;;  %v3241_v56 = vmul.f32 1.442695, %v3228_v25 }
 0x868   : > { %9072 = vst [vmem:[#allocation83_spill] sm:$0xff] %v7174_v14  ;;  %v7180_v33 = vpop.eup %5090  ;;  %5116 = vpow2.f32 %v3045_v45  ;;  %v3276_v42 = vsub.f32 %v7030_v31, %v7042_v0  ;;  %v9074_v14 = vld [vmem:[#allocation203_spill] sm:$0xff]  ;;  %v3101_v30 = vmul.f32 1.442695, %v3086_v41  ;;  %v3134_v45 = vsub.f32 %v9047_v1, %v7095_v44 }
 0x869   : > { %v7185_v63 = vpop.eup %5092  ;;  %v3056_v58 = vadd.f32 %v7180_v33, %v3008_v43  ;;  %5118 = vpow2.f32 %v3193_v3  ;;  %v2925_v35 = vmax.f32 %v2917_v40, %v9074_v14  ;;  %v3141_v37 = vmul.f32 1.442695, %v3130_v24 }
 0x86a   : > { %v7190_v60 = vpop.eup %5094  ;;  %5120 = vpow2.f32 %v3053_v13  ;;  %v2939_v43 = vsub.f32 %v9054_v16, %v7170_v17  ;;  %v3189_v0 = vmul.f32 1.442695, %v3178_v54  ;;  %v2987_v31 = vsub.f32 %v9053_v51, %v7170_v17 }
 0x86b   : > { %v7195_v10 = vpop.eup %5096  ;;  %5122 = vpow2.f32 %v3281_v21  ;;  %v3060_v3 = vadd.f32 %v7190_v60, %v3012_v59  ;;  %v7205_v13 = vmax.f32 %v2925_v35, %v7065_v6  ;;  %v3226_v21 = vsub.f32 %v9048_v23, %v7079_v28 }
 0x86c   : > { %v7200_v25 = vpop.eup %5098  ;;  %5124 = vpow2.f32 %v3093_v29  ;;  %v3104_v41 = vadd.f32 %v7195_v10, %v3056_v58  ;;  %v3289_v16 = vmul.f32 1.442695, %v3276_v42  ;;  %v3149_v40 = vmul.f32 1.442695, %v3134_v45 }
 0x86d   : > { %v7207_v1 = vpop.eup %5100  ;;  %5126 = vpow2.f32 %v3241_v56  ;;  %v3182_v51 = vsub.f32 %v9049_v22, %v7095_v44  ;;  %v2951_v29 = vmul.f32 1.442695, %v2939_v43  ;;  %v3035_v54 = vsub.f32 %v9057_v20, %v7170_v17 }
 0x86e   : > { %v7212_v24 = vpop.eup %5102  ;;  %5128 = vpow2.f32 %v3101_v30  ;;  %v3007_v56 = vadd.f32 %v7090_v8, %v7086_v7  ;;  %v2999_v42 = vmul.f32 1.442695, %v2987_v31  ;;  %v2941_v30 = vsub.f32 %v9060_v12, %v7205_v13 }
 0x86f   : > { %v7218_v35 = vpop.eup %5104  ;;  %5130 = vpow2.f32 %v3141_v37  ;;  %v3108_v23 = vadd.f32 %v7212_v24, %v3060_v3  ;;  %v3152_v45 = vadd.f32 %v7200_v25, %v3104_v41  ;;  %v3237_v37 = vmul.f32 1.442695, %v3226_v21 }
 0x870   : > { %v7223_v58 = vpop.eup %5106  ;;  %5132 = vpow2.f32 %v3189_v0  ;;  %v2989_v20 = vsub.f32 %v9059_v57, %v7205_v13  ;;  %v3010_v3 = vadd.f32 %v7218_v35, %v7207_v1  ;;  %v3197_v0 = vmul.f32 1.442695, %v3182_v51 }
 0x871   : > { %v7229_v22 = vpop.eup %5108  ;;  %5134 = vpow2.f32 %v3289_v16  ;;  %v3230_v31 = vsub.f32 %v9050_v50, %v7095_v44  ;;  %v3274_v41 = vsub.f32 %v7051_v4, %v7079_v28  ;;  %v3047_v21 = vmul.f32 1.442695, %v3035_v54 }
 0x872   : > { %v7234_v43 = vpop.eup %5110  ;;  %5136 = vpow2.f32 %v3149_v40  ;;  %v3083_v59 = vsub.f32 %v9061_v49, %v7170_v17  ;;  %v2955_v40 = vmul.f32 1.442695, %v2941_v30  ;;  %v3014_v51 = vadd.f32 %v7229_v22, %v7223_v58 }
 0x873   : > { %v7240_v12 = vpop.eup %5112  ;;  %5138 = vpow2.f32 %v2951_v29  ;;  %v3156_v57 = vadd.f32 %v7234_v43, %v3108_v23  ;;  %v3055_v8 = vadd.f32 %v7097_v34, %v3007_v56  ;;  %v3003_v28 = vmul.f32 1.442695, %v2989_v20 }
 0x874   : > { %v7245_v16 = vpop.eup %5114  ;;  %5140 = vpow2.f32 %v2999_v42  ;;  %v3200_v4 = vadd.f32 %v7240_v12, %v3152_v45  ;;  %v3245_v23 = vmul.f32 1.442695, %v3230_v31  ;;  %v3278_v49 = vsub.f32 %v7081_v36, %v7095_v44  ;;  %v5044_v42 = vld [vmem:[%s8410_s5 + $0x8] sm:$0xff]  }
 0x875   : > { %v7251_v50 = vpop.eup %5116  ;;  %5142 = vpow2.f32 %v3237_v37  ;;  %v3285_v56 = vmul.f32 1.442695, %v3274_v41  ;;  %v3131_v45 = vsub.f32 %v9065_v19, %v7170_v17  ;;  %v3037_v36 = vsub.f32 %v9063_v15, %v7205_v13  ;;  %4884 = vmatmul.mubr.msk.bf16.vlgmr.msra.gmra.mxu0 %vm2789_vm13, %v5044_v42  ;;  %4885 = vmatmul.mubr.msk.bf16.vlgmr.msra.gmra.mxu1 %vm2789_vm13, %v5044_v42 }
 0x876   : > { %v7255_v29 = vpop.eup %5118  ;;  %v3058_v54 = vadd.f32 %v7251_v50, %v3010_v3  ;;  %5144 = vpow2.f32 %v3197_v0  ;;  %v3095_v3 = vmul.f32 1.442695, %v3083_v59  ;;  %v3009_v31 = vadd.f32 %v7131_v5, %v7126_v46  ;;  %3381 = vmatprep.mubr.bf16.mxu0 %v8783_v11  ;;  %3424 = vmatprep.mubr.bf16.mxu1 %v8783_v11 }
 0x877   : > { %v7263_v30 = vpop.eup %5120  ;;  %5146 = vpow2.f32 %v3047_v21  ;;  %v3204_v37 = vadd.f32 %v7255_v29, %v3156_v57  ;;  %v3248_v41 = vadd.f32 %v7245_v16, %v3200_v4  ;;  %v3085_v59 = vsub.f32 %v9066_v26, %v7205_v13 }
 0x878   : > { %v7268_v20 = vpop.eup %5122  ;;  %5148 = vpow2.f32 %v2955_v40  ;;  %v3062_v44 = vadd.f32 %v7263_v30, %v3014_v51  ;;  %v3293_v15 = vmul.f32 1.442695, %v3278_v49  ;;  %v3103_v40 = vadd.f32 %v7101_v39, %v3055_v8 }
 0x879   : > { %v7273_v0 = vpop.eup %5124  ;;  %5150 = vpow2.f32 %v3003_v28  ;;  %v3143_v51 = vmul.f32 1.442695, %v3131_v45  ;;  %v3179_v4 = vsub.f32 %v9067_v38, %v7170_v17  ;;  %v3057_v42 = vadd.f32 %v7136_v52, %v3009_v31  ;;  %v9076_v31 = vld [vmem:[#allocation114_spill] sm:$0xff] }
 0x87a   : > { %v7278_v19 = vpop.eup %5126  ;;  %v3106_v21 = vadd.f32 %v7273_v0, %v3058_v54  ;;  %5152 = vpow2.f32 %v3245_v23  ;;  %v3227_v54 = vsub.f32 %v9069_v9, %v7170_v17  ;;  %v3051_v23 = vmul.f32 1.442695, %v3037_v36 }
 0x87b   : > { %v7285_v57 = vpop.eup %5128  ;;  %v3252_v28 = vadd.f32 %v7278_v19, %v3204_v37  ;;  %5154 = vpow2.f32 %v3285_v56  ;;  %v3296_v38 = vadd.f32 %v7268_v20, %v3248_v41  ;;  %v3275_v45 = vsub.f32 %v7015_v2, %v7170_v17  ;;  %v9077_v41 = vld [vmem:[#allocation17_spill] sm:$0xff] }
 0x87c   : > { %v7293_v26 = vpop.eup %5130  ;;  %v3110_v49 = vadd.f32 %v7285_v57, %v3062_v44  ;;  %5156 = vpow2.f32 %v3095_v3  ;;  %v9075_v56 = vsub.f32 %v7011_v62, %v7022_v32  ;;  %v3099_v36 = vmul.f32 1.442695, %v3085_v59 }
 0x87d   : > { %v7298_v8 = vpop.eup %5132  ;;  %v3154_v9 = vadd.f32 %v7293_v26, %v3106_v21  ;;  %5158 = vpow2.f32 %v3293_v15  ;;  %v7315_v52 = vadd.f32 %v9076_v31, %v3103_v40  ;;  %v3133_v2 = vsub.f32 %v9068_v27, %v7205_v13 }
 0x87e   : > { %v7304_v37 = vpop.eup %5134  ;;  %v7309_v11 = vmul.f32 1.442695, %v9075_v56  ;;  %5160 = vpow2.f32 %v3143_v51  ;;  %v3191_v62 = vmul.f32 1.442695, %v3179_v4  ;;  %v9078_v21 = vmax.f32 %v9077_v41, 0.0  ;;  %v9079_v4 = vld [vmem:[#allocation11_spill] sm:$0xff] }
 0x87f   : > { %v7312_v44 = vpop.eup %5136  ;;  %v3300_v17 = vadd.f32 %v7304_v37, %v3252_v28  ;;  %5162 = vpow2.f32 %v3051_v23  ;;  %v7329_v40 = vadd.f32 %v7161_v18, %v3057_v42  ;;  %v3239_v51 = vmul.f32 1.442695, %v3227_v54  ;;  %v9081_v41 = vld [vmem:[#allocation45_spill] sm:$0xff] }
 0x880   : > { %v7320_v3 = vpop.eup %5138  ;;  %v3158_v32 = vadd.f32 %v7312_v44, %v3110_v49  ;;  %v2968_v59 = vmul.f32 %v7141_v55, %v9078_v21  ;;  %5164 = vrcp.f32 %v3296_v38  ;;  %v3287_v27 = vmul.f32 1.442695, %v3275_v45  ;;  %v9083_v38 = vld [vmem:[#allocation39_spill] sm:$0xff] }
 0x881   : > { %v7326_v15 = vpop.eup %5140  ;;  %v3202_v28 = vadd.f32 %v7298_v8, %v3154_v9  ;;  %5166 = vpow2.f32 %v3099_v36  ;;  %v9080_v23 = vmax.f32 %v9079_v4, 0.0  ;;  %v9082_v5 = vmax.f32 %v9081_v41, 0.0 }
 0x882   : > { %v7331_v56 = vpop.eup %5142  ;;  %v3147_v42 = vmul.f32 1.442695, %v3133_v2  ;;  %v3181_v54 = vsub.f32 %v9073_v48, %v7205_v13  ;;  %5168 = vrcp.f32 %v3300_v17  ;;  %v9084_v45 = vmax.f32 %v9083_v38, 0.0 }
 0x883   : > { %v2972_v49 = vmul.f32 %v7151_v47, %v9080_v23  ;;  %v3016_v55 = vmul.f32 %v7146_v61, %v9082_v5  ;;  %v7340_v21 = vpop.eup %5144  ;;  %v3011_v47 = vadd.f32 %v7326_v15, %v7320_v3  ;;  %v9085_v5 = vld [vmem:[#allocation73_spill] sm:$0xff]  ;;  %5170 = vpow2.f32 %v3191_v62 }
 0x884   : > { %v3020_v9 = vmul.f32 %v7156_v53, %v9084_v45  ;;  %v7347_v36 = vpop.eup %5146  ;;  %v3206_v4 = vadd.f32 %v7340_v21, %v3158_v32  ;;  %v9086_v61 = vmax.f32 %v9085_v5, 0.0  ;;  %v3229_v48 = vsub.f32 %v9074_v14, %v7205_v13  ;;  %v9087_v53 = vld [vmem:[#allocation67_spill] sm:$0xff] }
 0x885   : > { %v3024_v23 = vadd.f32 %v3016_v55, %v2968_v59  ;;  %v7355_v41 = vpop.eup %5148  ;;  %v9088_v38 = vmax.f32 %v9087_v53, 0.0  ;;  %v3250_v32 = vadd.f32 %v7331_v56, %v3202_v28  ;;  %5172 = vpow2.f32 %v3239_v51  ;;  %v9089_v55 = vld [vmem:[#allocation101_spill] sm:$0xff]  ;;  %v9093_v51 = vld [vmem:[#allocation130_spill] sm:$0xff] }
 0x886   : > { %v3064_v2 = vmul.f32 %v7180_v33, %v9086_v61  ;;  %v3028_v17 = vadd.f32 %v3020_v9, %v2972_v49  ;;  %v7362_v18 = vpop.eup %5150  ;;  %v9090_v5 = vmax.f32 %v9089_v55, 0.0  ;;  %5174 = vpow2.f32 %v3147_v42  ;;  %v9091_v49 = vld [vmem:[#allocation95_spill] sm:$0xff] }
 0x887   : > { %v3068_v45 = vmul.f32 %v7190_v60, %v9088_v38  ;;  %v7368_v61 = vpop.eup %5152  ;;  %v3195_v62 = vmul.f32 1.442695, %v3181_v54  ;;  %v9092_v9 = vmax.f32 %v9091_v49, 0.0  ;;  %v3059_v60 = vadd.f32 %v7347_v36, %v3011_v47  ;;  %v9095_v54 = vld [vmem:[#allocation124_spill] sm:$0xff] }
 0x888   : > { %v3072_v59 = vadd.f32 %v3064_v2, %v3024_v23  ;;  %v3112_v33 = vmul.f32 %v7195_v10, %v9090_v5  ;;  %v3254_v38 = vadd.f32 %v7368_v61, %v3206_v4  ;;  %v9094_v23 = vmax.f32 %v9093_v51, 0.0  ;;  %v7378_v55 = vpop.eup %5154 }
 0x889   : > { %v3076_v14 = vadd.f32 %v3068_v45, %v3028_v17  ;;  %v3116_v53 = vmul.f32 %v7212_v24, %v9092_v9  ;;  %5176 = vpow2.f32 %v3287_v27  ;;  %v3243_v10 = vmul.f32 1.442695, %v3229_v48  ;;  %v7383_v5 = vpop.eup %5156 }
 0x88a   : > { %v3120_v28 = vadd.f32 %v3112_v33, %v3072_v59  ;;  %v3160_v2 = vmul.f32 %v7200_v25, %v9094_v23  ;;  %v9096_v17 = vmax.f32 %v9095_v54, 0.0  ;;  %v3298_v24 = vadd.f32 %v7378_v55, %v3250_v32  ;;  %v9097_v59 = vld [vmem:[#allocation160_spill] sm:$0xff]  ;;  %v7391_v49 = vpop.eup %5158  ;;  %v9101_v23 = vld [vmem:[#allocation191_spill] sm:$0xff] }
 0x88b   : > { %v3124_v42 = vadd.f32 %v3116_v53, %v3076_v14  ;;  %v3013_v47 = vadd.f32 %v7362_v18, %v7355_v41  ;;  %v9098_v33 = vmax.f32 %v9097_v59, 0.0  ;;  %5178 = vpow2.f32 %v3195_v62  ;;  %v7398_v32 = vpop.eup %5160  ;;  %v9107_v59 = vld [vmem:[#allocation12_spill] sm:$0xff] }
 0x88c   : > { %v3164_v45 = vmul.f32 %v7234_v43, %v9096_v17  ;;  %v3168_v4 = vadd.f32 %v3160_v2, %v3120_v28  ;;  %v3277_v27 = vsub.f32 %v7065_v6, %v7205_v13  ;;  %v9099_v43 = vld [vmem:[#allocation154_spill] sm:$0xff]  ;;  %v3107_v53 = vadd.f32 %v7383_v5, %v3059_v60  ;;  %v7405_v62 = vpop.eup %5162  ;;  %v9103_v13 = vld [vmem:[#allocation185_spill] sm:$0xff] }
 0x88d   : > { %v3208_v25 = vmul.f32 %v7240_v12, %v9098_v33  ;;  %v9100_v14 = vmax.f32 %v9099_v43, 0.0  ;;  %v3302_v28 = vadd.f32 %v7391_v49, %v3254_v38  ;;  %v9102_v12 = vmax.f32 %v9101_v23, 0.0  ;;  %v5165_v60 = vpop.eup %5164  ;;  %v9113_v23 = vld [vmem:[#allocation46_spill] sm:$0xff] }
 0x88e   : > { %v3172_v48 = vadd.f32 %v3164_v45, %v3124_v42  ;;  %5180 = vpow2.f32 %v3243_v10  ;;  %v9104_v42 = vmax.f32 %v9103_v13, 0.0  ;;  %v3061_v38 = vadd.f32 %v7405_v62, %v3013_v47 }
 0x88f   : > { %v3212_v9 = vmul.f32 %v7255_v29, %v9100_v14  ;;  %v3216_v51 = vadd.f32 %v3208_v25, %v3168_v4  ;;  %v3256_v2 = vmul.f32 %v7245_v16, %v9102_v12  ;;  %v9105_v29 = vld [vmem:[#allocation18_spill] sm:$0xff]  ;;  %5182 = vrcp.f32 %v3298_v24  ;;  %v7417_v25 = vpop.eup %5166 }
 0x890   : > { %v3260_v54 = vmul.f32 %v7278_v19, %v9104_v42  ;;  %v9106_v17 = vmax.f32 %v9105_v29, 0.0  ;;  %v9108_v33 = vmax.f32 %v9107_v59, 0.0  ;;  %v9111_v14 = vld [vmem:[#allocation214_spill] sm:$0xff]  ;;  %v9114_v24 = vmax.f32 %v9113_v23, 0.0 }
 0x891   : > { %v3220_v6 = vadd.f32 %v3212_v9, %v3172_v48  ;;  %v3264_v4 = vadd.f32 %v3256_v2, %v3216_v51  ;;  %v9109_v48 = vld [vmem:[#allocation220_spill] sm:$0xff]  ;;  %v9112_v9 = vmax.f32 %v9111_v14, 0.0  ;;  %v5169_v51 = vpop.eup %5168  ;;  %v3155_v12 = vadd.f32 %v7398_v32, %v3107_v53  ;;  %v9117_v29 = vld [vmem:[#allocation74_spill] sm:$0xff] }
 0x892   : > { %v2970_v45 = vmul.f32 %v7207_v1, %v9106_v17  ;;  %v2974_v16 = vmul.f32 %v7223_v58, %v9108_v33  ;;  %v9110_v43 = vmax.f32 %v9109_v48, 0.0  ;;  %v3018_v47 = vmul.f32 %v7218_v35, %v9114_v24  ;;  %v9115_v58 = vld [vmem:[#allocation40_spill] sm:$0xff]  ;;  %v7435_v59 = vpop.eup %5170 }
 0x893   : > { %v3268_v10 = vadd.f32 %v3260_v54, %v3220_v6  ;;  %v3308_v1 = vmul.f32 %v7304_v37, %v9112_v9  ;;  %v3291_v2 = vmul.f32 1.442695, %v3277_v27  ;;  %5184 = vrcp.f32 %v3302_v28  ;;  %v9119_v35 = vld [vmem:[#allocation140_spill] sm:$0xff]  ;;  %v7441_v28 = vpop.eup %5172 }
 0x894   : > { %v3304_v19 = vmul.f32 %v7268_v20, %v9110_v43  ;;  %v9116_v13 = vmax.f32 %v9115_v58, 0.0  ;;  %v3026_v20 = vadd.f32 %v3018_v47, %v2970_v45  ;;  %v9118_v17 = vmax.f32 %v9117_v29, 0.0  ;;  %v9127_v58 = vld [vmem:[#allocation131_spill] sm:$0xff] }
 0x895   : > { %v3316_v54 = vadd.f32 %v3308_v1, %v3268_v10  ;;  %v3199_v33 = vadd.f32 %v9119_v35, %v7315_v52  ;;  %5186 = vpow2.f32 %v7309_v11  ;;  %v3109_v27 = vadd.f32 %v7417_v25, %v3061_v38  ;;  %v9120_v10 = vld [vmem:[#allocation68_spill] sm:$0xff]  ;;  %v9123_v11 = vld [vmem:[#allocation102_spill] sm:$0xff] }
 0x896   : > { %v3022_v6 = vmul.f32 %v7229_v22, %v9116_v13  ;;  %v3312_v42 = vadd.f32 %v3304_v19, %v3264_v4  ;;  %v3066_v37 = vmul.f32 %v7251_v50, %v9118_v17  ;;  %v9121_v45 = vmax.f32 %v9120_v10, 0.0  ;;  %v7446_v50 = vpop.eup %5174  ;;  %v9122_v19 = vld [vmem:[#allocation204_spill] sm:$0xff] }
 0x897   : > { %v3332_v4 = vmul.f32 %v5169_v51, %v3316_v54  ;;  %v3153_v14 = vadd.f32 %v9122_v19, %v7329_v40  ;;  %v3203_v52 = vadd.f32 %v7435_v59, %v3155_v12  ;;  %5188 = vpow2.f32 %v3291_v2  ;;  %v9125_v1 = vld [vmem:[#allocation96_spill] sm:$0xff] }
 0x898   : > { %v3030_v53 = vadd.f32 %v3022_v6, %v2974_v16  ;;  %v3328_v22 = vmul.f32 %v5165_v60, %v3312_v42  ;;  %v3070_v48 = vmul.f32 %v7263_v30, %v9121_v45  ;;  %v3074_v43 = vadd.f32 %v3066_v37, %v3026_v20  ;;  %v7457_v30 = vpop.eup %5176  ;;  %v9129_v2 = vld [vmem:[#allocation144_spill] sm:$0xff] }
 0x899   : > { %v9124_v38 = vmax.f32 %v9123_v11, 0.0  ;;  %v9126_v23 = vmax.f32 %v9125_v1, 0.0  ;;  %v3157_v47 = vadd.f32 %v7446_v50, %v3109_v27  ;;  %v9128_v40 = vmax.f32 %v9127_v58, 0.0  ;;  %v7467_v20 = vpop.eup %5178  ;;  %v9133_v27 = vld [vmem:[#allocation161_spill] sm:$0xff] }
 0x89a   : > { %v3336_v9 = vpack.c.bf16 %v3332_v4, %v3328_v22  ;;  %v3078_v60 = vadd.f32 %v3070_v48, %v3030_v53  ;;  %v3247_v13 = vadd.f32 %v9129_v2, %v3199_v33  ;;  %v3251_v17 = vadd.f32 %v7441_v28, %v3203_v52  ;;  %v9135_v4 = vld [vmem:[#allocation155_spill] sm:$0xff] }
 0x89b   : > { %v3114_v16 = vmul.f32 %v7273_v0, %v9124_v38  ;;  %v3118_v24 = vmul.f32 %v7285_v57, %v9126_v23  ;;  %v3162_v12 = vmul.f32 %v7293_v26, %v9128_v40  ;;  %v9130_v0 = vld [vmem:[#allocation125_spill] sm:$0xff]  ;;  %v9132_v57 = vld [vmem:[#allocation83_spill] sm:$0xff]  ;;  %v9134_v53 = vmax.f32 %v9133_v27, 0.0  ;;  %v7477_v45 = vpop.eup %5180 }
 0x89c   : > { %3363 = vmatprep.subr.bf16.mxu0 %v3336_v9  ;;  %v9131_v42 = vmax.f32 %v9130_v0, 0.0  ;;  %v3201_v29 = vadd.f32 %v9132_v57, %v3153_v14  ;;  %v9136_v33 = vmax.f32 %v9135_v4, 0.0  ;;  %v5183_v52 = vpop.eup %5182  ;;  %v9139_v38 = vld [vmem:[#allocation171_spill] sm:$0xff]  ;;  %v9150_v27 = vld [vmem:[#allocation53_spill] sm:$0xff] }
 0x89d   : > { %v3122_v51 = vadd.f32 %v3114_v16, %v3074_v43  ;;  %v3126_v6 = vadd.f32 %v3118_v24, %v3078_v60  ;;  %v3210_v22 = vmul.f32 %v7298_v8, %v9134_v53  ;;  %v9137_v43 = vld [vmem:[#allocation192_spill] sm:$0xff]  ;;  %v3295_v16 = vadd.f32 %v9139_v38, %v3247_v13  ;;  %v9140_v60 = vld [vmem:[#allocation186_spill] sm:$0xff]  ;;  %v9146_v0 = vld [vmem:[#allocation215_spill] sm:$0xff] }
 0x89e   : > { %v3166_v54 = vmul.f32 %v7312_v44, %v9131_v42  ;;  %v3214_v10 = vmul.f32 %v7340_v21, %v9136_v33  ;;  %v3205_v44 = vadd.f32 %v7467_v20, %v3157_v47  ;;  %v9138_v11 = vmax.f32 %v9137_v43, 0.0 }
 0x89f   : > { %v3170_v37 = vadd.f32 %v3162_v12, %v3122_v51  ;;  %v9141_v8 = vmax.f32 %v9140_v60, 0.0  ;;  %v3249_v23 = vadd.f32 %v7185_v63, %v3201_v29  ;;  %v3299_v21 = vadd.f32 %v7457_v30, %v3251_v17  ;;  %v9142_v51 = vld [vmem:[#allocation25_spill] sm:$0xff] }
 0x8a0   : > { %v3174_v26 = vadd.f32 %v3166_v54, %v3126_v6  ;;  %v3258_v14 = vmul.f32 %v7331_v56, %v9138_v11  ;;  %v9143_v47 = vmax.f32 %v9142_v51, 0.0  ;;  %v5185_v40 = vpop.eup %5184  ;;  %v9144_v56 = vld [vmem:[#allocation221_spill] sm:$0xff]  ;;  %v9147_v42 = vmax.f32 %v9146_v0, 0.0 }
 0x8a1   : > { %v3218_v48 = vadd.f32 %v3210_v22, %v3170_v37  ;;  %v3262_v1 = vmul.f32 %v7368_v61, %v9141_v8  ;;  %v9145_v6 = vmax.f32 %v9144_v56, 0.0  ;;  %v9148_v61 = vld [vmem:[#allocation21_spill] sm:$0xff]  ;;  %v3253_v17 = vadd.f32 %v7477_v45, %v3205_v44  ;;  %v9152_v22 = vld [vmem:[#allocation170_spill] sm:$0xff] }
 0x8a2   : > { %v3222_v9 = vadd.f32 %v3214_v10, %v3174_v26  ;;  %v2967_v58 = vmul.f32 %v7086_v7, %v9143_v47  ;;  %v3310_v54 = vmul.f32 %v7391_v49, %v9147_v42  ;;  %v9149_v37 = vmax.f32 %v9148_v61, 0.0  ;;  %v7505_v26 = vpop.eup %5186  ;;  %v9165_v42 = vld [vmem:[#allocation134_spill] sm:$0xff] }
 0x8a3   : > { %v3266_v24 = vadd.f32 %v3258_v14, %v3218_v48  ;;  %v3306_v13 = vmul.f32 %v7378_v55, %v9145_v6  ;;  %v9151_v53 = vmax.f32 %v9150_v27, 0.0  ;;  %5190 = vrcp.f32 %v3295_v16  ;;  %v9153_v55 = vld [vmem:[#allocation49_spill] sm:$0xff]  ;;  %v9163_v6 = vld [vmem:[#allocation138_spill] sm:$0xff] }
 0x8a4   : > { %v3270_v12 = vadd.f32 %v3262_v1, %v3222_v9  ;;  %v2971_v29 = vmul.f32 %v7320_v3, %v9149_v37  ;;  %v9154_v10 = vmax.f32 %v9153_v55, 0.0  ;;  %v3297_v49 = vadd.f32 %v7505_v26, %v3249_v23  ;;  %v7511_v3 = vpop.eup %5188  ;;  %v9155_v9 = vld [vmem:[#allocation81_spill] sm:$0xff]  ;;  %v9169_v27 = vld [vmem:[#allocation26_spill] sm:$0xff] }
 0x8a5   : > { %v3015_v7 = vmul.f32 %v9152_v22, %v9151_v53  ;;  %v3314_v4 = vadd.f32 %v3306_v13, %v3266_v24  ;;  %5192 = vrcp.f32 %v3299_v21  ;;  %v9156_v60 = vmax.f32 %v9155_v9, 0.0  ;;  %v9157_v1 = vld [vmem:[#allocation77_spill] sm:$0xff]  ;;  %v9171_v22 = vld [vmem:[#allocation22_spill] sm:$0xff]  ;;  %v9180_v9 = vld [vmem:[#allocation199_spill] sm:$0xff] }
 0x8a6   : > { %v3318_v33 = vadd.f32 %v3310_v54, %v3270_v12  ;;  %v3019_v48 = vmul.f32 %v7326_v15, %v9154_v10  ;;  %v3301_v16 = vadd.f32 %v7511_v3, %v3253_v17  ;;  %v9158_v24 = vmax.f32 %v9157_v1, 0.0  ;;  %v9159_v23 = vld [vmem:[#allocation109_spill] sm:$0xff]  ;;  %v9184_v1 = vld [vmem:[#allocation82_spill] sm:$0xff] }
 0x8a7   : > { %v3023_v43 = vadd.f32 %v3015_v7, %v2967_v58  ;;  %v3330_v44 = vmul.f32 %v5183_v52, %v3314_v4  ;;  %v3063_v8 = vmul.f32 %v7097_v34, %v9156_v60  ;;  %v9160_v21 = vmax.f32 %v9159_v23, 0.0  ;;  %v9161_v52 = vld [vmem:[#allocation105_spill] sm:$0xff] }
 0x8a8   : > { %v3334_v11 = vmul.f32 %v5185_v40, %v3318_v33  ;;  %v3027_v14 = vadd.f32 %v3019_v48, %v2971_v29  ;;  %v3067_v51 = vmul.f32 %v7347_v36, %v9158_v24  ;;  %v9162_v40 = vmax.f32 %v9161_v52, 0.0  ;;  %v9173_v33 = vld [vmem:[#allocation164_spill] sm:$0xff]  ;;  %v9175_v48 = vld [vmem:[#allocation54_spill] sm:$0xff] }
 0x8a9   : > { %v3071_v47 = vadd.f32 %v3063_v8, %v3023_v43  ;;  %v3111_v58 = vmul.f32 %v7101_v39, %v9160_v21  ;;  %5194 = vrcp.f32 %v3297_v49  ;;  %v9164_v13 = vmax.f32 %v9163_v6, 0.0  ;;  %v9167_v39 = vld [vmem:[#allocation168_spill] sm:$0xff]  ;;  %v9177_v49 = vld [vmem:[#allocation175_spill] sm:$0xff]  ;;  %v9187_v21 = vld [vmem:[#allocation78_spill] sm:$0xff] }
 0x8aa   : > { %v3338_v15 = vpack.c.bf16 %v3334_v11, %v3330_v44  ;;  %v3075_v12 = vadd.f32 %v3067_v51, %v3027_v14  ;;  %v3115_v56 = vmul.f32 %v7383_v5, %v9162_v40  ;;  %5196 = vrcp.f32 %v3301_v16  ;;  %v9178_v44 = vld [vmem:[#allocation50_spill] sm:$0xff]  ;;  %v9182_v8 = vld [vmem:[#allocation195_spill] sm:$0xff]  ;;  %v9189_v52 = vld [vmem:[#allocation228_spill] sm:$0xff] }
 0x8ab   : > { %v3119_v34 = vadd.f32 %v3111_v58, %v3071_v47  ;;  %v3159_v0 = vmul.f32 %v9076_v31, %v9164_v13  ;;  %v9166_v54 = vmax.f32 %v9165_v42, 0.0  ;;  %v9168_v29 = vmax.f32 %v9167_v39, 0.0  ;;  %v9193_v6 = vld [vmem:[#allocation110_spill] sm:$0xff] }
 0x8ac   : > { %3406 = vmatprep.subr.bf16.mxu1 %v3338_v15  ;;  %v3123_v36 = vadd.f32 %v3115_v56, %v3075_v12  ;;  %v9170_v5 = vmax.f32 %v9169_v27, 0.0  ;;  %v9172_v7 = vmax.f32 %v9171_v22, 0.0  ;;  %v9174_v55 = vmax.f32 %v9173_v33, 0.0  ;;  %v9191_v56 = vld [vmem:[#allocation224_spill] sm:$0xff]  ;;  %v9196_v39 = vld [vmem:[#allocation106_spill] sm:$0xff] }
 0x8ad   : > { %v3163_v61 = vmul.f32 %v7398_v32, %v9166_v54  ;;  %v3167_v37 = vadd.f32 %v3159_v0, %v3119_v34  ;;  %v3207_v17 = vmul.f32 %v9119_v35, %v9168_v29  ;;  %v9176_v32 = vmax.f32 %v9175_v48, 0.0  ;;  %v9195_v0 = vld [vmem:[#allocation27_spill] sm:$0xff] }
 0x8ae   : > { %v2969_v53 = vmul.f32 %v7126_v46, %v9170_v5  ;;  %v2973_v4 = vmul.f32 %v7355_v41, %v9172_v7  ;;  %v3211_v10 = vmul.f32 %v7435_v59, %v9174_v55  ;;  %v9179_v11 = vmax.f32 %v9178_v44, 0.0  ;;  %v9186_v59 = vld [vmem:[#allocation55_spill] sm:$0xff]  ;;  %v9204_v44 = vld [vmem:[#allocation165_spill] sm:$0xff] }
 0x8af   : > { %v3171_v31 = vadd.f32 %v3163_v61, %v3123_v36  ;;  %v3017_v43 = vmul.f32 %v9177_v49, %v9176_v32  ;;  %v3215_v14 = vadd.f32 %v3207_v17, %v3167_v37  ;;  %v9181_v46 = vmax.f32 %v9180_v9, 0.0  ;;  %v9198_v5 = vld [vmem:[#allocation139_spill] sm:$0xff] }
 0x8b0   : > { %v3021_v35 = vmul.f32 %v7362_v18, %v9179_v11  ;;  %v9183_v41 = vmax.f32 %v9182_v8, 0.0  ;;  %v9185_v24 = vmax.f32 %v9184_v1, 0.0  ;;  %v9188_v58 = vmax.f32 %v9187_v21, 0.0  ;;  %v5191_v42 = vpop.eup %5190 }
 0x8b1   : > { %v3255_v60 = vmul.f32 %v9129_v2, %v9181_v46  ;;  %v3219_v15 = vadd.f32 %v3211_v10, %v3171_v31  ;;  %v3025_v47 = vadd.f32 %v3017_v43, %v2969_v53  ;;  %v9190_v40 = vmax.f32 %v9189_v52, 0.0  ;;  %v9202_v10 = vld [vmem:[#allocation169_spill] sm:$0xff] }
 0x8b2   : > { %v3259_v16 = vmul.f32 %v7441_v28, %v9183_v41  ;;  %v3065_v51 = vmul.f32 %v9186_v59, %v9185_v24  ;;  %v3029_v23 = vadd.f32 %v3021_v35, %v2973_v4  ;;  %v3069_v18 = vmul.f32 %v7405_v62, %v9188_v58  ;;  %v5193_v17 = vpop.eup %5192  ;;  %v9200_v4 = vld [vmem:[#allocation135_spill] sm:$0xff]  ;;  %v9208_v41 = vld [vmem:[#allocation196_spill] sm:$0xff] }
 0x8b3   : > { %v3263_v12 = vadd.f32 %v3255_v60, %v3215_v14  ;;  %v3303_v2 = vmul.f32 %v9139_v38, %v9190_v40  ;;  %v9192_v34 = vmax.f32 %v9191_v56, 0.0  ;;  %v9194_v13 = vmax.f32 %v9193_v6, 0.0  ;;  %v5045_v24 = vld [vmem:[%s8410_s5] sm:$0xff]  }
 0x8b4   : > { %v3267_v54 = vadd.f32 %v3259_v16, %v3219_v15  ;;  %v3073_v61 = vadd.f32 %v3065_v51, %v3025_v47  ;;  %v3077_v37 = vadd.f32 %v3069_v18, %v3029_v23  ;;  %v9197_v29 = vmax.f32 %v9196_v39, 0.0  ;;  %v9210_v51 = vld [vmem:[#allocation229_spill] sm:$0xff]  ;;  %v2717_v39 = vpop.f32.mrf.mxu0 }
 0x8b5   : > { %v3307_v28 = vmul.f32 %v7457_v30, %v9192_v34  ;;  %v3113_v36 = vmul.f32 %v9195_v0, %v9194_v13  ;;  %v3311_v27 = vadd.f32 %v3303_v2, %v3263_v12  ;;  %v9199_v38 = vmax.f32 %v9198_v5, 0.0  ;;  %v9212_v47 = vld [vmem:[#allocation225_spill] sm:$0xff]  ;;  %v9215_v2 = vld [vmem:[#allocation59_spill] sm:$0xff]  ;;  %v9219_v13 = vld [vmem:[#allocation146_spill] sm:$0xff] }
 0x8b6   : > { %v3117_v62 = vmul.f32 %v7417_v25, %v9197_v29  ;;  %v9201_v31 = vmax.f32 %v9200_v4, 0.0  ;;  %v9203_v48 = vmax.f32 %v9202_v10, 0.0  ;;  %v9205_v11 = vmax.f32 %v9204_v44, 0.0  ;;  %v5195_v46 = vpop.eup %5194  ;;  %v9217_v34 = vld [vmem:[#allocation87_spill] sm:$0xff]  ;;  %v9223_v29 = vld [vmem:[#allocation88_spill] sm:$0xff]  ;;  %v9225_v5 = vld [vmem:[#allocation117_spill] sm:$0xff] }
 0x8b7   : > { %v3161_v53 = vmul.f32 %v9122_v19, %v9199_v38  ;;  %v3315_v22 = vadd.f32 %v3307_v28, %v3267_v54  ;;  %v3121_v30 = vadd.f32 %v3113_v36, %v3073_v61  ;;  %v3327_v55 = vmul.f32 %v5191_v42, %v3311_v27  ;;  %v9206_v19 = vld [vmem:[#allocation200_spill] sm:$0xff]  ;;  %v9222_v61 = vld [vmem:[#allocation177_spill] sm:$0xff] }
 0x8b8   : > { %v3125_v7 = vadd.f32 %v3117_v62, %v3077_v37  ;;  %v3165_v33 = vmul.f32 %v7446_v50, %v9201_v31  ;;  %v3209_v32 = vmul.f32 %v9132_v57, %v9203_v48  ;;  %v3213_v35 = vmul.f32 %v7467_v20, %v9205_v11  ;;  %v5197_v57 = vpop.eup %5196  ;;  %v9220_v36 = vld [vmem:[#allocation60_spill] sm:$0xff]  ;;  %v9228_v4 = vld [vmem:[#allocation33_spill] sm:$0xff]  ;;  %v9230_v48 = vld [vmem:[#allocation62_spill] sm:$0xff] }
 0x8b9   : > { %v3331_v49 = vmul.f32 %v5193_v17, %v3315_v22  ;;  %v3169_v25 = vadd.f32 %v3161_v53, %v3121_v30  ;;  %v9207_v14 = vmax.f32 %v9206_v19, 0.0  ;;  %v9209_v16 = vmax.f32 %v9208_v41, 0.0  ;;  %v9221_v42 = vld [vmem:[#allocation32_spill] sm:$0xff]  ;;  %v9224_v17 = vld [vmem:[#allocation206_spill] sm:$0xff]  ;;  %v9226_v22 = vld [vmem:[#allocation147_spill] sm:$0xff] }
 0x8ba   : > { %v3173_v43 = vadd.f32 %v3165_v33, %v3125_v7  ;;  %v9211_v15 = vmax.f32 %v9210_v51, 0.0  ;;  %v9213_v23 = vmax.f32 %v9212_v47, 0.0  ;;  %v9214_v52 = vmov 0   ;;  %v9227_v7 = vld [vmem:[#allocation61_spill] sm:$0xff]  ;;  %v9229_v33 = vld [vmem:[#allocation178_spill] sm:$0xff]  ;;  %v9234_v11 = vld [vmem:[#allocation64_spill] sm:$0xff] }
 0x8bb   : > { %v3257_v9 = vmul.f32 %v7185_v63, %v9207_v14  ;;  %v3335_v60 = vpack.c.bf16 %v3331_v49, %v3327_v55  ;;  %v3217_v8 = vadd.f32 %v3209_v32, %v3169_v25  ;;  %v3261_v1 = vmul.f32 %v7477_v45, %v9209_v16  ;;  %v9231_v32 = vld [vmem:[#allocation34_spill] sm:$0xff]  ;;  %v9232_v25 = vld [vmem:[#allocation63_spill] sm:$0xff] }
 0x8bc   : > { %v3221_v50 = vadd.f32 %v3213_v35, %v3173_v43  ;;  %v3305_v63 = vmul.f32 %v7505_v26, %v9211_v15  ;;  %v3309_v21 = vmul.f32 %v7511_v3, %v9213_v23  ;;  %v9216_v26 = vld [vmem:[#allocation31_spill] sm:$0xff]  ;;  %v9218_v3 = vld [vmem:[#allocation116_spill] sm:$0xff]  ;;  %v3598_v54 = vmax.f32 %v9221_v42, %v9220_v36  ;;  %v9242_v51 = vld [vmem:[#allocation90_spill] sm:$0xff] }
 0x8bd   : > { %3364 = vmatpush1.bf16.msra.mxu0 %v3335_v60  ;;  %v3265_v59 = vadd.f32 %v3257_v9, %v3217_v8  ;;  %v3596_v56 = vmax.f32 %v9216_v26, %v9215_v2  ;;  %v3597_v31 = vmax.f32 %v9228_v4, %v9227_v7  ;;  %v3599_v49 = vmax.f32 %v9231_v32, %v9230_v48  ;;  %v9233_v43 = vld [vmem:[#allocation35_spill] sm:$0xff]  ;;  %v9235_v35 = vld [vmem:[#allocation36_spill] sm:$0xff]  ;;  %v7628_v9 = vpop.f32.mrf.mxu1  ;;  %v9237_v60 = vld [vmem:[#allocation37_spill] sm:$0xff] }
 0x8be   : > { %v3269_v20 = vadd.f32 %v3261_v1, %v3221_v50  ;;  %v3606_v62 = vmax.f32 %v3598_v54, %v9223_v29  ;;  %v3600_v44 = vmax.f32 %v9233_v43, %v9232_v25  ;;  %v3602_v19 = vmax.f32 %v9235_v35, %v9234_v11  ;;  %v9238_v50 = vld [vmem:[#allocation89_spill] sm:$0xff]  ;;  %v9239_v16 = vld [vmem:[#allocation207_spill] sm:$0xff]  ;;  %v9248_v54 = vld [vmem:[#allocation148_spill] sm:$0xff] }
 0x8bf   : > { %v3313_v58 = vadd.f32 %v3305_v63, %v3265_v59  ;;  %v3604_v28 = vmax.f32 %v3596_v56, %v9217_v34  ;;  %v3605_v41 = vmax.f32 %v3597_v31, %v9238_v50  ;;  %v9241_v59 = vld [vmem:[#allocation38_spill] sm:$0xff]  ;;  %v3607_v15 = vmax.f32 %v3599_v49, %v9242_v51  ;;  %v9243_v63 = vld [vmem:[#allocation91_spill] sm:$0xff] }
 0x8c0   : > { %v3317_v18 = vadd.f32 %v3309_v21, %v3269_v20  ;;  %4887 = vmatmul.mubr.msk.bf16.vlgmr.msra.gmra.mxu0 %vm2789_vm13, %v5045_v24  ;;  %v3614_v38 = vmax.f32 %v3606_v62, %v9225_v5  ;;  %v3608_v47 = vmax.f32 %v3600_v44, %v9243_v63  ;;  %v9244_v21 = vld [vmem:[#allocation118_spill] sm:$0xff] }
 0x8c1   : > { %v3329_v45 = vmul.f32 %v5195_v46, %v3313_v58  ;;  %3522 = vmatprep.mubr.bf16.mxu0 %v9214_v52  ;;  %v3612_v6 = vmax.f32 %v3604_v28, %v9218_v3  ;;  %v9236_v46 = vld [vmem:[#allocation65_spill] sm:$0xff]  ;;  %v3613_v58 = vmax.f32 %v3605_v41, %v9244_v21 }
 0x8c2   : > { %v3333_v12 = vmul.f32 %v5197_v57, %v3317_v18  ;;  %v3622_v30 = vmax.f32 %v3614_v38, %v9226_v22  ;;  %v3601_v8 = vmax.f32 %v9237_v60, %v9236_v46 }
 0x8c3   : > { %v3620_v0 = vmax.f32 %v3612_v6, %v9219_v13  ;;  %v9247_v6 = vld [vmem:[#allocation94_spill] sm:$0xff] }
 0x8c4   : > { %v3337_v40 = vpack.c.bf16 %v3333_v12, %v3329_v45  ;;  %v3630_v55 = vmax.f32 %v3622_v30, %v9229_v33 }
 0x8c5   : > { %v3628_v37 = vmax.f32 %v3620_v0, %v9222_v61 }
 0x8c6   : > { %3407 = vmatpush1.bf16.msra.mxu1 %v3337_v40  ;;  %v3638_v1 = vmax.f32 %v3630_v55, %v9239_v16  ;;  %v9245_v40 = vld [vmem:[#allocation92_spill] sm:$0xff] }
 0x8c7   : > { %v3636_v27 = vmax.f32 %v3628_v37, %v9224_v17  ;;  %v3621_v37 = vmax.f32 %v3613_v58, %v9248_v54 }
 0x8c8   : > { %v3646_v12 = vmax.f32 %v3638_v1, %v7628_v9  ;;  %v7657_v1 = vpop.f32.mrf.mxu0 }
 0x8c9   : > { %4888 = vmatmul.mubr.msk.bf16.vlgmr.msra.gmra.mxu1 %vm2789_vm13, %v5045_v24  ;;  %v3644_v53 = vmax.f32 %v3636_v27, %v2717_v39  ;;  %v9240_v24 = vld [vmem:[#allocation66_spill] sm:$0xff]  ;;  %v9249_v27 = vld [vmem:[#allocation119_spill] sm:$0xff] }
 0x8ca   : > { %3575 = vmatprep.mubr.bf16.mxu1 %v9214_v52  ;;  %v3603_v20 = vmax.f32 %v9241_v59, %v9240_v24  ;;  %v3615_v38 = vmax.f32 %v3607_v15, %v9249_v27  ;;  %v3702_v41 = vsub.f32 %v9220_v36, %v3646_v12  ;;  %v3846_v58 = vsub.f32 %v9226_v22, %v3646_v12 }
 0x8cb   : > { %v3652_v10 = vsub.f32 %v9216_v26, %v3644_v53  ;;  %v3700_v14 = vsub.f32 %v9215_v2, %v3644_v53  ;;  %v3748_v57 = vsub.f32 %v9217_v34, %v3644_v53  ;;  %v3796_v23 = vsub.f32 %v9218_v3, %v3644_v53  ;;  %v9246_v26 = vld [vmem:[#allocation93_spill] sm:$0xff] }
 0x8cc   : > { %v3844_v45 = vsub.f32 %v9219_v13, %v3644_v53  ;;  %v3610_v2 = vmax.f32 %v3602_v19, %v9245_v40  ;;  %v3609_v56 = vmax.f32 %v3601_v8, %v9246_v26  ;;  %v3892_v28 = vsub.f32 %v9222_v61, %v3644_v53  ;;  %v9250_v13 = vld [vmem:[#allocation120_spill] sm:$0xff]  ;;  %v9252_v19 = vld [vmem:[#allocation121_spill] sm:$0xff] }
 0x8cd   : > { %v3660_v18 = vmul.f32 1.442695, %v3652_v10  ;;  %v3708_v34 = vmul.f32 1.442695, %v3700_v14  ;;  %v7647_v0 = vmax.f32 %v3603_v20, %v9247_v6  ;;  %v3756_v3 = vmul.f32 1.442695, %v3748_v57 }
 0x8ce   : > { %v3940_v62 = vsub.f32 %v9224_v17, %v3644_v53  ;;  %v3616_v30 = vmax.f32 %v3608_v47, %v9250_v13  ;;  %v3804_v31 = vmul.f32 1.442695, %v3796_v23  ;;  %v3988_v55 = vsub.f32 %v2717_v39, %v3644_v53  ;;  %v9251_v10 = vld [vmem:[#allocation179_spill] sm:$0xff]  ;;  %v9253_v17 = vld [vmem:[#allocation208_spill] sm:$0xff]  ;;  %v9254_v53 = vld [vmem:[#allocation122_spill] sm:$0xff] }
 0x8cf   : > { %v3629_v49 = vmax.f32 %v3621_v37, %v9251_v10  ;;  %5198 = vpow2.f32 %v3660_v18  ;;  %v3852_v44 = vmul.f32 1.442695, %v3844_v45  ;;  %v3654_v61 = vsub.f32 %v9221_v42, %v3646_v12  ;;  %v9255_v18 = vld [vmem:[#allocation123_spill] sm:$0xff]  ;;  %v9257_v37 = vld [vmem:[#allocation150_spill] sm:$0xff] }
 0x8d0   : > { %v3618_v14 = vmax.f32 %v3610_v2, %v9252_v19  ;;  %5200 = vpow2.f32 %v3708_v34  ;;  %v3900_v8 = vmul.f32 1.442695, %v3892_v28  ;;  %v3948_v20 = vmul.f32 1.442695, %v3940_v62  ;;  %v9256_v34 = vld [vmem:[#allocation149_spill] sm:$0xff] }
 0x8d1   : > { %v3637_v57 = vmax.f32 %v3629_v49, %v9253_v17  ;;  %5202 = vpow2.f32 %v3756_v3  ;;  %v3750_v39 = vsub.f32 %v9223_v29, %v3646_v12  ;;  %v3617_v15 = vmax.f32 %v3609_v56, %v9254_v53 }
 0x8d2   : > { %5204 = vpow2.f32 %v3804_v31  ;;  %v3996_v47 = vmul.f32 1.442695, %v3988_v55  ;;  %v3798_v42 = vsub.f32 %v9225_v5, %v3646_v12  ;;  %v3664_v23 = vmul.f32 1.442695, %v3654_v61  ;;  %v9258_v31 = vld [vmem:[#allocation180_spill] sm:$0xff]  ;;  %v7680_v61 = vpop.f32.mrf.mxu1 }
 0x8d3   : > { %5206 = vpow2.f32 %v3852_v44  ;;  %v7665_v36 = vmax.f32 %v3637_v57, %v7657_v1  ;;  %v3619_v45 = vmax.f32 %v7647_v0, %v9255_v18  ;;  %v3712_v2 = vmul.f32 1.442695, %v3702_v41  ;;  %v9261_v41 = vld [vmem:[#allocation152_spill] sm:$0xff] }
 0x8d4   : > { %5208 = vpow2.f32 %v3900_v8  ;;  %v3894_v29 = vsub.f32 %v9229_v33, %v3646_v12  ;;  %v3623_v56 = vmax.f32 %v3615_v38, %v9256_v34  ;;  %v3760_v28 = vmul.f32 1.442695, %v3750_v39  ;;  %v9259_v33 = vld [vmem:[#allocation151_spill] sm:$0xff] }
 0x8d5   : > { %5210 = vpow2.f32 %v3948_v20  ;;  %v3942_v5 = vsub.f32 %v9239_v16, %v3646_v12  ;;  %v3624_v3 = vmax.f32 %v3616_v30, %v9257_v37  ;;  %v3808_v22 = vmul.f32 1.442695, %v3798_v42  ;;  %v9260_v30 = vld [vmem:[#allocation209_spill] sm:$0xff] }
 0x8d6   : > { %5212 = vpow2.f32 %v3996_v47  ;;  %v3990_v62 = vsub.f32 %v7628_v9, %v3646_v12  ;;  %v3631_v55 = vmax.f32 %v3623_v56, %v9258_v31  ;;  %v3856_v0 = vmul.f32 1.442695, %v3846_v58  ;;  %v9262_v42 = vld [vmem:[#allocation153_spill] sm:$0xff] }
 0x8d7   : > { %5214 = vpow2.f32 %v3664_v23  ;;  %v3653_v49 = vsub.f32 %v9228_v4, %v7665_v36  ;;  %v3626_v44 = vmax.f32 %v3618_v14, %v9259_v33  ;;  %v3904_v38 = vmul.f32 1.442695, %v3894_v29 }
 0x8d8   : > { %5216 = vpow2.f32 %v3712_v2  ;;  %v3701_v16 = vsub.f32 %v9227_v7, %v7665_v36  ;;  %v3639_v8 = vmax.f32 %v3631_v55, %v9260_v30  ;;  %v3952_v9 = vmul.f32 1.442695, %v3942_v5 }
 0x8d9   : > { %5218 = vpow2.f32 %v3760_v28  ;;  %v3749_v12 = vsub.f32 %v9238_v50, %v7665_v36  ;;  %v3625_v57 = vmax.f32 %v3617_v15, %v9261_v41  ;;  %v4000_v4 = vmul.f32 1.442695, %v3990_v62  ;;  %v9264_v28 = vld [vmem:[#allocation182_spill] sm:$0xff] }
 0x8da   : > { %5220 = vpow2.f32 %v3808_v22  ;;  %v3797_v14 = vsub.f32 %v9244_v21, %v7665_v36  ;;  %v3662_v20 = vmul.f32 1.442695, %v3653_v49  ;;  %v3845_v7 = vsub.f32 %v9248_v54, %v7665_v36  ;;  %v9263_v21 = vld [vmem:[#allocation181_spill] sm:$0xff] }
 0x8db   : > { %5222 = vpow2.f32 %v3856_v0  ;;  %v7691_v39 = vmax.f32 %v3639_v8, %v7680_v61  ;;  %v3627_v23 = vmax.f32 %v3619_v45, %v9262_v42  ;;  %v3710_v50 = vmul.f32 1.442695, %v3701_v16  ;;  %v7718_v8 = vpop.f32.mrf.mxu0 }
 0x8dc   : > { %v7693_v47 = vpop.eup %5198  ;;  %5224 = vpow2.f32 %v3904_v38  ;;  %v3893_v15 = vsub.f32 %v9251_v10, %v7665_v36  ;;  %v3632_v2 = vmax.f32 %v3624_v3, %v9263_v21  ;;  %v3758_v29 = vmul.f32 1.442695, %v3749_v12  ;;  %v9266_v10 = vld [vmem:[#allocation183_spill] sm:$0xff] }
 0x8dd   : > { %v7698_v58 = vpop.eup %5200  ;;  %5226 = vpow2.f32 %v3952_v9  ;;  %v3941_v54 = vsub.f32 %v9253_v17, %v7665_v36  ;;  %v3634_v5 = vmax.f32 %v3626_v44, %v9264_v28  ;;  %v3806_v45 = vmul.f32 1.442695, %v3797_v14  ;;  %v9267_v17 = vld [vmem:[#allocation184_spill] sm:$0xff] }
 0x8de   : > { %v7703_v56 = vpop.eup %5202  ;;  %5228 = vpow2.f32 %v4000_v4  ;;  %v3989_v22 = vsub.f32 %v7657_v1, %v7665_v36  ;;  %v3633_v55 = vmax.f32 %v3625_v57, %v9266_v10  ;;  %v3854_v3 = vmul.f32 1.442695, %v3845_v7  ;;  %v9269_v36 = vld [vmem:[#allocation210_spill] sm:$0xff]  ;;  %v9271_v4 = vld [vmem:[#allocation211_spill] sm:$0xff]  ;;  %v7730_v7 = vpop.f32.mrf.mxu1 }
 0x8df   : > { %v7708_v62 = vpop.eup %5204  ;;  %5230 = vpow2.f32 %v3662_v20  ;;  %v3655_v0 = vsub.f32 %v9231_v32, %v7691_v39  ;;  %v3635_v38 = vmax.f32 %v3627_v23, %v9267_v17  ;;  %v3902_v44 = vmul.f32 1.442695, %v3893_v15 }
 0x8e0   : > { %9265 = vst [vmem:[#allocation58_spill] sm:$0xff] %v7708_v62  ;;  %v7713_v49 = vpop.eup %5206  ;;  %5232 = vpow2.f32 %v3710_v50  ;;  %v3703_v16 = vsub.f32 %v9230_v48, %v7691_v39  ;;  %v3640_v9 = vmax.f32 %v3632_v2, %v9269_v36  ;;  %v3950_v12 = vmul.f32 1.442695, %v3941_v54  ;;  %v7758_v52 = vpop.f32.mrf.mxu1 }
 0x8e1   : > { %v7720_v1 = vpop.eup %5208  ;;  %5234 = vpow2.f32 %v3758_v29  ;;  %v3751_v32 = vsub.f32 %v9242_v51, %v7691_v39  ;;  %v3642_v14 = vmax.f32 %v3634_v5, %v9271_v4  ;;  %v3998_v20 = vmul.f32 1.442695, %v3989_v22  ;;  %v9274_v29 = vld [vmem:[#allocation212_spill] sm:$0xff] }
 0x8e2   : > { %9268 = vst [vmem:[#allocation30_spill] sm:$0xff] %v7720_v1  ;;  %v7725_v57 = vpop.eup %5210  ;;  %5236 = vpow2.f32 %v3806_v45  ;;  %v3799_v48 = vsub.f32 %v9249_v27, %v7691_v39  ;;  %v3666_v50 = vmul.f32 1.442695, %v3655_v0  ;;  %v3847_v15 = vsub.f32 %v9256_v34, %v7691_v39  ;;  %v7744_v45 = vpop.f32.mrf.mxu0 }
 0x8e3   : > { %9270 = vst [vmem:[#allocation111_spill] sm:$0xff] %v7725_v57  ;;  %v7732_v23 = vpop.eup %5212  ;;  %5238 = vpow2.f32 %v3854_v3  ;;  %v7737_v51 = vmax.f32 %v3640_v9, %v7718_v8  ;;  %v3641_v54 = vmax.f32 %v3633_v55, %v9274_v29  ;;  %v3714_v5 = vmul.f32 1.442695, %v3703_v16  ;;  %v9277_v55 = vld [vmem:[#allocation213_spill] sm:$0xff] }
 0x8e4   : > { %9272 = vst [vmem:[#allocation86_spill] sm:$0xff] %v7732_v23  ;;  %v7739_v2 = vpop.eup %5214  ;;  %5240 = vpow2.f32 %v3902_v44  ;;  %v3895_v27 = vsub.f32 %v9258_v31, %v7691_v39  ;;  %v3762_v3 = vmul.f32 1.442695, %v3751_v32  ;;  %v3943_v34 = vsub.f32 %v9260_v30, %v7691_v39 }
 0x8e5   : > { %9273 = vst [vmem:[#allocation141_spill] sm:$0xff] %v7739_v2  ;;  %v7746_v22 = vpop.eup %5216  ;;  %5242 = vpow2.f32 %v3950_v12  ;;  %v7751_v0 = vmax.f32 %v3642_v14, %v7730_v7  ;;  %v3643_v44 = vmax.f32 %v3635_v38, %v9277_v55  ;;  %v3810_v16 = vmul.f32 1.442695, %v3799_v48 }
 0x8e6   : > { %9275 = vst [vmem:[#allocation115_spill] sm:$0xff] %v7746_v22  ;;  %v7753_v9 = vpop.eup %5218  ;;  %5244 = vpow2.f32 %v3998_v20  ;;  %v3991_v31 = vsub.f32 %v7680_v61, %v7691_v39  ;;  %v3858_v12 = vmul.f32 1.442695, %v3847_v15  ;;  %v3656_v30 = vsub.f32 %v9233_v43, %v7737_v51 }
 0x8e7   : > { %9276 = vst [vmem:[#allocation172_spill] sm:$0xff] %v7753_v9  ;;  %v7760_v23 = vpop.eup %5220  ;;  %5246 = vpow2.f32 %v3666_v50  ;;  %v7765_v32 = vmax.f32 %v3641_v54, %v7744_v45  ;;  %v3906_v38 = vmul.f32 1.442695, %v3895_v27  ;;  %v3704_v20 = vsub.f32 %v9232_v25, %v7737_v51 }
 0x8e8   : > { %9278 = vst [vmem:[#allocation145_spill] sm:$0xff] %v7760_v23  ;;  %v7767_v14 = vpop.eup %5222  ;;  %5248 = vpow2.f32 %v3714_v5  ;;  %v3954_v39 = vmul.f32 1.442695, %v3943_v34  ;;  %v3658_v48 = vsub.f32 %v9235_v35, %v7751_v0  ;;  %v7776_v50 = vmax.f32 %v3643_v44, %v7758_v52 }
 0x8e9   : > { %9279 = vst [vmem:[#allocation201_spill] sm:$0xff] %v7767_v14  ;;  %v7771_v61 = vpop.eup %5224  ;;  %5250 = vpow2.f32 %v3762_v3  ;;  %v4002_v15 = vmul.f32 1.442695, %v3991_v31  ;;  %v3706_v54 = vsub.f32 %v9234_v11, %v7751_v0  ;;  %v3668_v25 = vmul.f32 1.442695, %v3656_v30 }
 0x8ea   : > { %9280 = vst [vmem:[#allocation176_spill] sm:$0xff] %v7771_v61  ;;  %v7778_v43 = vpop.eup %5226  ;;  %5252 = vpow2.f32 %v3810_v16  ;;  %v3657_v27 = vsub.f32 %v9237_v60, %v7765_v32  ;;  %v3716_v35 = vmul.f32 1.442695, %v3704_v20  ;;  %v3705_v34 = vsub.f32 %v9236_v46, %v7765_v32 }
 0x8eb   : > { %9281 = vst [vmem:[#allocation205_spill] sm:$0xff] %v7778_v43  ;;  %v7782_v5 = vpop.eup %5228  ;;  %5254 = vpow2.f32 %v3858_v12  ;;  %v3672_v16 = vmul.f32 1.442695, %v3658_v48  ;;  %v3659_v11 = vsub.f32 %v9241_v59, %v7776_v50  ;;  %v3720_v12 = vmul.f32 1.442695, %v3706_v54 }
 0x8ec   : > { %9282 = vst [vmem:[#allocation56_spill] sm:$0xff] %v7782_v5  ;;  %v7786_v3 = vpop.eup %5230  ;;  %5256 = vpow2.f32 %v3906_v38  ;;  %v3707_v60 = vsub.f32 %v9240_v24, %v7776_v50  ;;  %v3752_v46 = vsub.f32 %v9243_v63, %v7737_v51  ;;  %v3670_v38 = vmul.f32 1.442695, %v3657_v27 }
 0x8ed   : > { %v7790_v44 = vpop.eup %5232  ;;  %5258 = vpow2.f32 %v3954_v39  ;;  %v3754_v59 = vsub.f32 %v9245_v40, %v7751_v0  ;;  %v3718_v39 = vmul.f32 1.442695, %v3705_v34  ;;  %v3674_v24 = vmul.f32 1.442695, %v3659_v11 }
 0x8ee   : > { %v7794_v31 = vpop.eup %5234  ;;  %5260 = vpow2.f32 %v4002_v15  ;;  %v3800_v15 = vsub.f32 %v9250_v13, %v7737_v51  ;;  %v3802_v63 = vsub.f32 %v9252_v19, %v7751_v0  ;;  %v3753_v40 = vsub.f32 %v9246_v26, %v7765_v32 }
 0x8ef   : > { %v7798_v30 = vpop.eup %5236  ;;  %5262 = vpow2.f32 %v3668_v25  ;;  %v3722_v25 = vmul.f32 1.442695, %v3707_v60  ;;  %v3768_v5 = vmul.f32 1.442695, %v3754_v59  ;;  %v3755_v13 = vsub.f32 %v9247_v6, %v7776_v50 }
 0x8f0   : > { %v7802_v20 = vpop.eup %5238  ;;  %5264 = vpow2.f32 %v3716_v35  ;;  %v3764_v35 = vmul.f32 1.442695, %v3752_v46  ;;  %v3812_v11 = vmul.f32 1.442695, %v3800_v15  ;;  %v3848_v19 = vsub.f32 %v9257_v37, %v7737_v51 }
 0x8f1   : > { %v7806_v48 = vpop.eup %5240  ;;  %5266 = vpow2.f32 %v3672_v16  ;;  %v3816_v60 = vmul.f32 1.442695, %v3802_v63  ;;  %v3850_v26 = vsub.f32 %v9259_v33, %v7751_v0  ;;  %v3896_v6 = vsub.f32 %v9263_v21, %v7737_v51 }
 0x8f2   : > { %v7810_v54 = vpop.eup %5242  ;;  %5268 = vpow2.f32 %v3720_v12  ;;  %v3801_v59 = vsub.f32 %v9254_v53, %v7765_v32  ;;  %v3724_v37 = vadd.f32 %v7698_v58, %v7693_v47  ;;  %v3770_v15 = vmul.f32 1.442695, %v3755_v13 }
 0x8f3   : > { %v7814_v27 = vpop.eup %5244  ;;  %5270 = vpow2.f32 %v3670_v38  ;;  %v3766_v38 = vmul.f32 1.442695, %v3753_v40  ;;  %v3803_v33 = vsub.f32 %v9255_v18, %v7776_v50  ;;  %v3860_v63 = vmul.f32 1.442695, %v3848_v19 }
 0x8f4   : > { %v7818_v34 = vpop.eup %5246  ;;  %5272 = vpow2.f32 %v3718_v39  ;;  %v3944_v21 = vsub.f32 %v9269_v36, %v7737_v51  ;;  %v3992_v53 = vsub.f32 %v7718_v8, %v7737_v51  ;;  %v3908_v18 = vmul.f32 1.442695, %v3896_v6 }
 0x8f5   : > { %v7822_v16 = vpop.eup %5248  ;;  %5274 = vpow2.f32 %v3674_v24  ;;  %v3814_v13 = vmul.f32 1.442695, %v3801_v59  ;;  %v3772_v36 = vadd.f32 %v7703_v56, %v3724_v37  ;;  %v3818_v8 = vmul.f32 1.442695, %v3803_v33 }
 0x8f6   : > { %v7826_v12 = vpop.eup %5250  ;;  %5276 = vpow2.f32 %v3722_v25  ;;  %v3851_v51 = vsub.f32 %v9262_v42, %v7776_v50  ;;  %v4004_v6 = vmul.f32 1.442695, %v3992_v53  ;;  %v3946_v37 = vsub.f32 %v9271_v4, %v7751_v0 }
 0x8f7   : > { %v7830_v46 = vpop.eup %5252  ;;  %5278 = vpow2.f32 %v3764_v35  ;;  %v3864_v35 = vmul.f32 1.442695, %v3850_v26  ;;  %v3956_v26 = vmul.f32 1.442695, %v3944_v21  ;;  %v3994_v42 = vsub.f32 %v7730_v7, %v7751_v0 }
 0x8f8   : > { %v7836_v39 = vpop.eup %5254  ;;  %5280 = vpow2.f32 %v3768_v5  ;;  %v3898_v5 = vsub.f32 %v9264_v28, %v7751_v0  ;;  %v3726_v28 = vadd.f32 %v7746_v22, %v7739_v2  ;;  %v3727_v53 = vadd.f32 %v7822_v16, %v7818_v34 }
 0x8f9   : > { %v7842_v24 = vpop.eup %5256  ;;  %5282 = vpow2.f32 %v3812_v11  ;;  %v3849_v11 = vsub.f32 %v9261_v41, %v7765_v32  ;;  %v3725_v41 = vadd.f32 %v7790_v44, %v7786_v3  ;;  %v3899_v4 = vsub.f32 %v9267_v17, %v7776_v50 }
 0x8fa   : > { %v7848_v25 = vpop.eup %5258  ;;  %5284 = vpow2.f32 %v3816_v60  ;;  %v3912_v59 = vmul.f32 1.442695, %v3898_v5  ;;  %v3820_v22 = vadd.f32 %v7708_v62, %v3772_v36  ;;  %v3774_v7 = vadd.f32 %v7753_v9, %v3726_v28 }
 0x8fb   : > { %v7852_v40 = vpop.eup %5260  ;;  %5286 = vpow2.f32 %v3766_v38  ;;  %v3862_v33 = vmul.f32 1.442695, %v3849_v11  ;;  %v3945_v28 = vsub.f32 %v9274_v29, %v7765_v32  ;;  %v3914_v62 = vmul.f32 1.442695, %v3899_v4 }
 0x8fc   : > { %v7856_v19 = vpop.eup %5262  ;;  %5288 = vpow2.f32 %v3770_v15 }
 0x8fd   : > { %v7861_v60 = vpop.eup %5264  ;;  %5290 = vpow2.f32 %v3860_v63  ;;  %v3897_v63 = vsub.f32 %v9266_v10, %v7765_v32  ;;  %v3958_v4 = vmul.f32 1.442695, %v3945_v28 }
 0x8fe   : > { %v7865_v38 = vpop.eup %5266  ;;  %5292 = vpow2.f32 %v3864_v35  ;;  %v3866_v35 = vmul.f32 1.442695, %v3851_v51  ;;  %v3728_v0 = vadd.f32 %v7861_v60, %v7856_v19  ;;  %v4008_v51 = vmul.f32 1.442695, %v3994_v42 }
 0x8ff   : > { %v7871_v15 = vpop.eup %5268  ;;  %5294 = vpow2.f32 %v3814_v13  ;;  %v3773_v13 = vadd.f32 %v7794_v31, %v3725_v41  ;;  %v3910_v36 = vmul.f32 1.442695, %v3897_v63  ;;  %v3947_v41 = vsub.f32 %v9277_v55, %v7776_v50 }
 0x900   : > { %v7877_v21 = vpop.eup %5270  ;;  %5296 = vpow2.f32 %v3818_v8  ;;  %v3730_v11 = vadd.f32 %v7871_v15, %v7865_v38  ;;  %v3960_v8 = vmul.f32 1.442695, %v3946_v37 }
 0x901   : > { %v7883_v5 = vpop.eup %5272  ;;  %5298 = vpow2.f32 %v3908_v18  ;;  %v3775_v18 = vadd.f32 %v7826_v12, %v3727_v53 }
 0x902   : > { %v7889_v10 = vpop.eup %5274  ;;  %5300 = vpow2.f32 %v3912_v59  ;;  %v3822_v59 = vadd.f32 %v7760_v23, %v3774_v7  ;;  %v3729_v42 = vadd.f32 %v7883_v5, %v7877_v21 }
 0x903   : > { %v7894_v17 = vpop.eup %5276  ;;  %5302 = vpow2.f32 %v3862_v33  ;;  %v3821_v33 = vadd.f32 %v7798_v30, %v3773_v13  ;;  %v3962_v13 = vmul.f32 1.442695, %v3947_v41 }
 0x904   : > { %v7898_v9 = vpop.eup %5278  ;;  %5304 = vpow2.f32 %v3866_v35  ;;  %v3731_v55 = vadd.f32 %v7894_v17, %v7889_v10  ;;  %v3868_v35 = vadd.f32 %v7713_v49, %v3820_v22  ;;  %v3870_v23 = vadd.f32 %v7767_v14, %v3822_v59 }
 0x905   : > { %v7903_v2 = vpop.eup %5280  ;;  %v3776_v37 = vadd.f32 %v7898_v9, %v3728_v0  ;;  %5306 = vpow2.f32 %v3956_v26  ;;  %v3993_v26 = vsub.f32 %v7744_v45, %v7765_v32  ;;  %v3823_v0 = vadd.f32 %v7830_v46, %v3775_v18 }
 0x906   : > { %v7909_v29 = vpop.eup %5282  ;;  %v3778_v63 = vadd.f32 %v7903_v2, %v3730_v11  ;;  %5308 = vpow2.f32 %v3960_v8  ;;  %v3995_v11 = vsub.f32 %v7758_v52, %v7776_v50  ;;  %v3869_v45 = vadd.f32 %v7802_v20, %v3821_v33 }
 0x907   : > { %v7915_v53 = vpop.eup %5284  ;;  %5310 = vpow2.f32 %v3910_v36  ;;  %v3824_v22 = vadd.f32 %v7909_v29, %v3776_v37  ;;  %v4006_v52 = vmul.f32 1.442695, %v3993_v26  ;;  %v3916_v41 = vadd.f32 %v7720_v1, %v3868_v35 }
 0x908   : > { %9283 = vst [vmem:[#allocation28_spill] sm:$0xff] %v7915_v53  ;;  %v7920_v7 = vpop.eup %5286  ;;  %5312 = vpow2.f32 %v3914_v62  ;;  %v3826_v32 = vadd.f32 %v7915_v53, %v3778_v63  ;;  %v4010_v59 = vmul.f32 1.442695, %v3995_v11  ;;  %v3918_v63 = vadd.f32 %v7771_v61, %v3870_v23 }
 0x909   : > { %v7925_v8 = vpop.eup %5288  ;;  %5314 = vpow2.f32 %v4004_v6  ;;  %v3777_v36 = vadd.f32 %v7920_v7, %v3729_v42  ;;  %v3871_v6 = vadd.f32 %v7836_v39, %v3823_v0 }
 0x90a   : > { %v7930_v28 = vpop.eup %5290  ;;  %5316 = vpow2.f32 %v4008_v51  ;;  %v3779_v62 = vadd.f32 %v7925_v8, %v3731_v55  ;;  %v3917_v55 = vadd.f32 %v7806_v48, %v3869_v45 }
 0x90b   : > { %v7935_v18 = vpop.eup %5292  ;;  %5318 = vpow2.f32 %v3958_v4  ;;  %v3872_v42 = vadd.f32 %v7930_v28, %v3824_v22  ;;  %v3919_v11 = vadd.f32 %v7842_v24, %v3871_v6  ;;  %v9289_v6 = vld [vmem:[#allocation13_spill] sm:$0xff] }
 0x90c   : > { %9284 = vst [vmem:[#allocation84_spill] sm:$0xff] %v7935_v18  ;;  %v7937_v50 = vpop.eup %5294  ;;  %5320 = vpow2.f32 %v3962_v13  ;;  %v3874_v4 = vadd.f32 %v7935_v18, %v3826_v32  ;;  %v3964_v13 = vadd.f32 %v7725_v57, %v3916_v41  ;;  %v3966_v32 = vadd.f32 %v7778_v43, %v3918_v63  ;;  %v9291_v57 = vld [vmem:[#allocation23_spill] sm:$0xff]  ;;  %v9293_v18 = vld [vmem:[#allocation41_spill] sm:$0xff] }
 0x90d   : > { %v7941_v37 = vpop.eup %5296  ;;  %v3825_v51 = vadd.f32 %v7937_v50, %v3777_v36  ;;  %5322 = vpow2.f32 %v4006_v52  ;;  %v9294_v1 = vmax.f32 %v9293_v18, 0.0  ;;  %v9295_v43 = vld [vmem:[#allocation51_spill] sm:$0xff] }
 0x90e   : > { %v7945_v33 = vpop.eup %5298  ;;  %v3827_v35 = vadd.f32 %v7941_v37, %v3779_v62  ;;  %5324 = vpow2.f32 %v4010_v59  ;;  %v3965_v62 = vadd.f32 %v7810_v54, %v3917_v55  ;;  %v9290_v59 = vmax.f32 %v9289_v6, 0.0 }
 0x90f   : > { %9285 = vst [vmem:[#allocation57_spill] sm:$0xff] %v7945_v33  ;;  %v7951_v26 = vpop.eup %5300  ;;  %v3920_v23 = vadd.f32 %v7945_v33, %v3872_v42  ;;  %v9292_v42 = vmax.f32 %v9291_v57, 0.0  ;;  %v3733_v63 = vmul.f32 %v7790_v44, %v9294_v1  ;;  %v9296_v55 = vmax.f32 %v9295_v43, 0.0 }
 0x910   : > { %9286 = vst [vmem:[#allocation29_spill] sm:$0xff] %v7951_v26  ;;  %v7953_v0 = vpop.eup %5302  ;;  %v3922_v52 = vadd.f32 %v7951_v26, %v3874_v4  ;;  %v3685_v14 = vmul.f32 %v7786_v3, %v9290_v59  ;;  %v3967_v33 = vadd.f32 %v7848_v25, %v3919_v11 }
 0x911   : > { %v7957_v22 = vpop.eup %5304  ;;  %v3873_v36 = vadd.f32 %v7953_v0, %v3825_v51  ;;  %v3689_v51 = vmul.f32 %v7877_v21, %v9292_v42  ;;  %v3737_v4 = vmul.f32 %v7883_v5, %v9296_v55  ;;  %v9298_v21 = vld [vmem:[#allocation56_spill] sm:$0xff]  ;;  %v4013_v5 = vadd.f32 %v7814_v27, %v3965_v62 }
 0x912   : > { %v7961_v45 = vpop.eup %5306  ;;  %v3875_v61 = vadd.f32 %v7957_v22, %v3827_v35  ;;  %v9297_v35 = vld [vmem:[#allocation86_spill] sm:$0xff]  ;;  %v4014_v18 = vadd.f32 %v9298_v21, %v3966_v32  ;;  %v4015_v55 = vadd.f32 %v7852_v40, %v3967_v33  ;;  %v9299_v32 = vld [vmem:[#allocation69_spill] sm:$0xff] }
 0x913   : > { %9287 = vst [vmem:[#allocation112_spill] sm:$0xff] %v7961_v45  ;;  %v7967_v41 = vpop.eup %5308  ;;  %v4012_v53 = vadd.f32 %v9297_v35, %v3964_v13  ;;  %v3968_v3 = vadd.f32 %v7961_v45, %v3920_v23  ;;  %v3741_v13 = vadd.f32 %v3733_v63, %v3685_v14  ;;  %v3745_v42 = vadd.f32 %v3737_v4, %v3689_v51 }
 0x914   : > { %9288 = vst [vmem:[#allocation85_spill] sm:$0xff] %v7967_v41  ;;  %v5311_v26 = vpop.eup %5310  ;;  %v3970_v1 = vadd.f32 %v7967_v41, %v3922_v52  ;;  %v9300_v21 = vmax.f32 %v9299_v32, 0.0 }
 0x915   : > { %v7983_v6 = vpop.eup %5312  ;;  %v3921_v57 = vadd.f32 %v5311_v26, %v3873_v36  ;;  %5326 = vrcp.f32 %v4012_v53 }
 0x916   : > { %v7986_v59 = vpop.eup %5314  ;;  %v3923_v43 = vadd.f32 %v7983_v6, %v3875_v61  ;;  %v3781_v52 = vmul.f32 %v7794_v31, %v9300_v21  ;;  %v9301_v61 = vld [vmem:[#allocation79_spill] sm:$0xff]  ;;  %5328 = vrcp.f32 %v4014_v18 }
 0x917   : > { %v7991_v44 = vpop.eup %5316  ;;  %v4016_v36 = vadd.f32 %v7986_v59, %v3968_v3  ;;  %v9302_v41 = vmax.f32 %v9301_v61, 0.0  ;;  %5330 = vrcp.f32 %v4013_v5  ;;  %v9303_v3 = vld [vmem:[#allocation97_spill] sm:$0xff]  ;;  %v9305_v21 = vld [vmem:[#allocation107_spill] sm:$0xff] }
 0x918   : > { %v5319_v11 = vpop.eup %5318  ;;  %v4018_v14 = vadd.f32 %v7991_v44, %v3970_v1  ;;  %v3789_v33 = vadd.f32 %v3781_v52, %v3741_v13  ;;  %5332 = vrcp.f32 %v4015_v55  ;;  %v9304_v31 = vmax.f32 %v9303_v3, 0.0  ;;  %v9313_v52 = vld [vmem:[#allocation42_spill] sm:$0xff] }
 0x919   : > { %v7995_v23 = vpop.eup %5320  ;;  %v3969_v35 = vadd.f32 %v5319_v11, %v3921_v57  ;;  %v3785_v45 = vmul.f32 %v7920_v7, %v9302_v41  ;;  %5334 = vrcp.f32 %v4016_v36  ;;  %v9306_v7 = vmax.f32 %v9305_v21, 0.0  ;;  %v9311_v36 = vld [vmem:[#allocation14_spill] sm:$0xff] }
 0x91a   : > { %v3971_v53 = vadd.f32 %v7995_v23, %v3923_v43  ;;  %v5323_v51 = vpop.eup %5322  ;;  %v3829_v57 = vmul.f32 %v7798_v30, %v9304_v31  ;;  %5336 = vrcp.f32 %v4018_v14  ;;  %v9312_v32 = vmax.f32 %v9311_v36, 0.0  ;;  %v9315_v14 = vld [vmem:[#allocation19_spill] sm:$0xff] }
 0x91b   : > { %v3793_v62 = vadd.f32 %v3785_v45, %v3745_v42  ;;  %v8006_v63 = vpop.eup %5324  ;;  %v4017_v4 = vadd.f32 %v5323_v51, %v3969_v35  ;;  %v3833_v41 = vmul.f32 %v7937_v50, %v9306_v7  ;;  %v9307_v45 = vld [vmem:[#allocation15_spill] sm:$0xff]  ;;  %v9314_v61 = vmax.f32 %v9313_v52, 0.0 }
 0x91c   : > { %v4019_v18 = vadd.f32 %v8006_v63, %v3971_v53  ;;  %v3837_v1 = vadd.f32 %v3829_v57, %v3789_v33  ;;  %v9308_v5 = vmax.f32 %v9307_v45, 0.0  ;;  %v9309_v42 = vld [vmem:[#allocation43_spill] sm:$0xff]  ;;  %v3687_v30 = vmul.f32 %v7818_v34, %v9312_v32  ;;  %v9321_v34 = vld [vmem:[#allocation126_spill] sm:$0xff]  ;;  %v9323_v45 = vld [vmem:[#allocation156_spill] sm:$0xff] }
 0x91d   : > { %v3841_v43 = vadd.f32 %v3833_v41, %v3793_v62  ;;  %v9310_v55 = vmax.f32 %v9309_v42, 0.0  ;;  %v3735_v50 = vmul.f32 %v7822_v16, %v9314_v61  ;;  %v9316_v53 = vmax.f32 %v9315_v14, 0.0  ;;  %v9317_v62 = vld [vmem:[#allocation47_spill] sm:$0xff]  ;;  %v9325_v42 = vld [vmem:[#allocation24_spill] sm:$0xff] }
 0x91e   : > { %v3688_v13 = vmul.f32 %v7856_v19, %v9308_v5  ;;  %v9318_v3 = vmax.f32 %v9317_v62, 0.0  ;;  %5338 = vrcp.f32 %v4017_v4  ;;  %v9322_v7 = vmax.f32 %v9321_v34, 0.0  ;;  %v9327_v32 = vld [vmem:[#allocation52_spill] sm:$0xff] }
 0x91f   : > { %v3736_v35 = vmul.f32 %v7861_v60, %v9310_v55  ;;  %v3684_v33 = vmul.f32 %v7693_v47, %v9316_v53  ;;  %v9319_v60 = vld [vmem:[#allocation136_spill] sm:$0xff]  ;;  %5340 = vrcp.f32 %v4019_v18  ;;  %v9324_v5 = vmax.f32 %v9323_v45, 0.0  ;;  %v9343_v45 = vld [vmem:[#allocation75_spill] sm:$0xff] }
 0x920   : > { %v3732_v19 = vmul.f32 %v7698_v58, %v9318_v3  ;;  %v9320_v57 = vmax.f32 %v9319_v60, 0.0  ;;  %v3877_v16 = vmul.f32 %v7802_v20, %v9322_v7  ;;  %v9326_v55 = vmax.f32 %v9325_v42, 0.0  ;;  %v9341_v7 = vld [vmem:[#allocation70_spill] sm:$0xff] }
 0x921   : > { %v3925_v47 = vmul.f32 %v7806_v48, %v9324_v5  ;;  %v3744_v4 = vadd.f32 %v3736_v35, %v3688_v13  ;;  %v9328_v52 = vmax.f32 %v9327_v32, 0.0  ;;  %v3743_v18 = vadd.f32 %v3735_v50, %v3687_v30  ;;  %v9331_v48 = vld [vmem:[#allocation187_spill] sm:$0xff]  ;;  %v9337_v30 = vld [vmem:[#allocation216_spill] sm:$0xff] }
 0x922   : > { %v3881_v21 = vmul.f32 %v7953_v0, %v9320_v57  ;;  %v3691_v58 = vmul.f32 %v7889_v10, %v9326_v55  ;;  %v3885_v36 = vadd.f32 %v3877_v16, %v3837_v1  ;;  %v3740_v61 = vadd.f32 %v3732_v19, %v3684_v33  ;;  %v8050_v14 = vpop.eup %5326  ;;  %v9333_v10 = vld [vmem:[#allocation197_spill] sm:$0xff]  ;;  %v9335_v35 = vld [vmem:[#allocation71_spill] sm:$0xff]  ;;  %v9339_v19 = vld [vmem:[#allocation226_spill] sm:$0xff] }
 0x923   : > { %v3739_v0 = vmul.f32 %v7894_v17, %v9328_v52  ;;  %v9332_v3 = vmax.f32 %v9331_v48, 0.0  ;;  %v9334_v13 = vmax.f32 %v9333_v10, 0.0  ;;  %v9336_v57 = vmax.f32 %v9335_v35, 0.0 }
 0x924   : > { %v3889_v41 = vadd.f32 %v3881_v21, %v3841_v43  ;;  %v9329_v43 = vld [vmem:[#allocation166_spill] sm:$0xff]  ;;  %v9338_v50 = vmax.f32 %v9337_v30, 0.0  ;;  %v9340_v21 = vmax.f32 %v9339_v19, 0.0  ;;  %v3933_v48 = vadd.f32 %v3925_v47, %v3885_v36  ;;  %v9353_v30 = vld [vmem:[#allocation20_spill] sm:$0xff] }
 0x925   : > { %v9330_v53 = vmax.f32 %v9329_v43, 0.0  ;;  %v3973_v60 = vmul.f32 %v7810_v54, %v9332_v3  ;;  %v3977_v1 = vmul.f32 %v5319_v11, %v9334_v13  ;;  %v3784_v17 = vmul.f32 %v7898_v9, %v9336_v57  ;;  %v8075_v11 = vpop.eup %5328  ;;  %v9345_v9 = vld [vmem:[#allocation16_spill] sm:$0xff]  ;;  %v9351_v57 = vld [vmem:[#allocation99_spill] sm:$0xff]  ;;  %v9359_v19 = vld [vmem:[#allocation98_spill] sm:$0xff] }
 0x926   : > { %v4021_v33 = vmul.f32 %v7814_v27, %v9338_v50  ;;  %v4025_v34 = vmul.f32 %v5323_v51, %v9340_v21  ;;  %v9344_v54 = vmax.f32 %v9343_v45, 0.0  ;;  %v9346_v32 = vmax.f32 %v9345_v9, 0.0  ;;  %v9347_v27 = vld [vmem:[#allocation44_spill] sm:$0xff]  ;;  %v9355_v50 = vld [vmem:[#allocation141_spill] sm:$0xff]  ;;  %v9363_v45 = vld [vmem:[#allocation127_spill] sm:$0xff] }
 0x927   : > { %v3929_v62 = vmul.f32 %v5311_v26, %v9330_v53  ;;  %v9342_v26 = vmax.f32 %v9341_v7, 0.0  ;;  %v3792_v55 = vadd.f32 %v3784_v17, %v3744_v4  ;;  %v9348_v43 = vmax.f32 %v9347_v27, 0.0  ;;  %v5331_v53 = vpop.eup %5330 }
 0x928   : > { %v3780_v5 = vmul.f32 %v7703_v56, %v9344_v54  ;;  %v3690_v52 = vmul.f32 %v7865_v38, %v9346_v32  ;;  %v3747_v3 = vadd.f32 %v3739_v0, %v3691_v58  ;;  %v8083_v13 = vpop.eup %5332  ;;  %v9352_v38 = vmax.f32 %v9351_v57, 0.0  ;;  %v9356_v58 = vld [vmem:[#allocation48_spill] sm:$0xff]  ;;  %v9358_v0 = vld [vmem:[#allocation115_spill] sm:$0xff]  ;;  %v9367_v32 = vld [vmem:[#allocation58_spill] sm:$0xff] }
 0x929   : > { %v3783_v16 = vmul.f32 %v7826_v12, %v9342_v26  ;;  %v3937_v42 = vadd.f32 %v3929_v62, %v3889_v41  ;;  %v3738_v51 = vmul.f32 %v7871_v15, %v9348_v43  ;;  %v9349_v41 = vld [vmem:[#allocation80_spill] sm:$0xff]  ;;  %v9354_v15 = vmax.f32 %v9353_v30, 0.0 }
 0x92a   : > { %v3788_v10 = vadd.f32 %v3780_v5, %v3740_v61  ;;  %v9350_v4 = vmax.f32 %v9349_v41, 0.0  ;;  %v3832_v17 = vmul.f32 %v7909_v29, %v9352_v38  ;;  %v9357_v36 = vmax.f32 %v9356_v58, 0.0  ;;  %v8099_v61 = vpop.eup %5334  ;;  %v9361_v26 = vld [vmem:[#allocation108_spill] sm:$0xff]  ;;  %v9365_v5 = vld [vmem:[#allocation103_spill] sm:$0xff] }
 0x92b   : > { %v3791_v12 = vadd.f32 %v3783_v16, %v3743_v18  ;;  %v3686_v47 = vmul.f32 %v9355_v50, %v9354_v15  ;;  %v9360_v21 = vmax.f32 %v9359_v19, 0.0  ;;  %v9364_v29 = vmax.f32 %v9363_v45, 0.0  ;;  %v8113_v43 = vpop.eup %5336  ;;  %v9374_v45 = vld [vmem:[#allocation72_spill] sm:$0xff] }
 0x92c   : > { %v3787_v62 = vmul.f32 %v7925_v8, %v9350_v4  ;;  %v3734_v18 = vmul.f32 %v9358_v0, %v9357_v36  ;;  %v9362_v8 = vmax.f32 %v9361_v26, 0.0  ;;  %v9366_v9 = vmax.f32 %v9365_v5, 0.0  ;;  %v9368_v4 = vld [vmem:[#allocation137_spill] sm:$0xff]  ;;  %v9372_v26 = vld [vmem:[#allocation128_spill] sm:$0xff] }
 0x92d   : > { %v3831_v7 = vmul.f32 %v7830_v46, %v9360_v21  ;;  %v3879_v54 = vmul.f32 %v7836_v39, %v9364_v29  ;;  %v3985_v41 = vadd.f32 %v3977_v1, %v3937_v42  ;;  %v9369_v57 = vmax.f32 %v9368_v4, 0.0  ;;  %v9370_v0 = vld [vmem:[#allocation157_spill] sm:$0xff] }
 0x92e   : > { %v3835_v16 = vmul.f32 %v7941_v37, %v9362_v8  ;;  %v3828_v27 = vmul.f32 %v9367_v32, %v9366_v9  ;;  %v3840_v46 = vadd.f32 %v3832_v17, %v3792_v55  ;;  %v3746_v30 = vadd.f32 %v3738_v51, %v3690_v52  ;;  %v9376_v52 = vld [vmem:[#allocation167_spill] sm:$0xff]  ;;  %v9386_v32 = vld [vmem:[#allocation172_spill] sm:$0xff] }
 0x92f   : > { %v3883_v38 = vmul.f32 %v7957_v22, %v9369_v57  ;;  %v3981_v15 = vadd.f32 %v3973_v60, %v3933_v48  ;;  %v3795_v50 = vadd.f32 %v3787_v62, %v3747_v3  ;;  %v3839_v37 = vadd.f32 %v3831_v7, %v3791_v12  ;;  %v5339_v60 = vpop.eup %5338  ;;  %v9378_v3 = vld [vmem:[#allocation188_spill] sm:$0xff] }
 0x930   : > { %v3836_v58 = vadd.f32 %v3828_v27, %v3788_v10  ;;  %v9371_v19 = vmax.f32 %v9370_v0, 0.0  ;;  %v9373_v8 = vmax.f32 %v9372_v26, 0.0  ;;  %v3742_v42 = vadd.f32 %v3734_v18, %v3686_v47 }
 0x931   : > { %v9375_v22 = vmax.f32 %v9374_v45, 0.0  ;;  %v9377_v51 = vmax.f32 %v9376_v52, 0.0  ;;  %v9379_v12 = vmax.f32 %v9378_v3, 0.0  ;;  %v4033_v29 = vadd.f32 %v4025_v34, %v3985_v41  ;;  %v9387_v45 = vld [vmem:[#allocation158_spill] sm:$0xff]  ;;  %v9390_v34 = vld [vmem:[#allocation100_spill] sm:$0xff] }
 0x932   : > { %v3927_v21 = vmul.f32 %v7842_v24, %v9371_v19  ;;  %v3880_v1 = vmul.f32 %v7930_v28, %v9373_v8  ;;  %v9380_v24 = vld [vmem:[#allocation198_spill] sm:$0xff]  ;;  %v9382_v28 = vld [vmem:[#allocation132_spill] sm:$0xff]  ;;  %v4029_v4 = vadd.f32 %v4021_v33, %v3981_v15  ;;  %v3843_v57 = vadd.f32 %v3835_v16, %v3795_v50  ;;  %v9393_v33 = vld [vmem:[#allocation227_spill] sm:$0xff] }
 0x933   : > { %v3786_v55 = vmul.f32 %v7903_v2, %v9375_v22  ;;  %v3931_v48 = vmul.f32 %v7983_v6, %v9377_v51  ;;  %v8135_v10 = vmul.f32 %v7848_v25, %v9379_v12  ;;  %v9381_v62 = vmax.f32 %v9380_v24, 0.0  ;;  %v8145_v2 = vpop.eup %5340  ;;  %v9384_v6 = vld [vmem:[#allocation76_spill] sm:$0xff]  ;;  %v9389_v22 = vld [vmem:[#allocation57_spill] sm:$0xff]  ;;  %v9395_v15 = vld [vmem:[#allocation162_spill] sm:$0xff] }
 0x934   : > { %v9383_v47 = vmax.f32 %v9382_v28, 0.0  ;;  %v3888_v5 = vadd.f32 %v3880_v1, %v3840_v46  ;;  %v9385_v9 = vmax.f32 %v9384_v6, 0.0  ;;  %v3887_v0 = vadd.f32 %v3879_v54, %v3839_v37  ;;  %v9392_v46 = vld [vmem:[#allocation28_spill] sm:$0xff]  ;;  %v9397_v37 = vld [vmem:[#allocation30_spill] sm:$0xff] }
 0x935   : > { %v8033_v31 = vpop.f32.mrf.mxu0  ;;  %v8085_v56 = vpop.f32.mrf.mxu1  ;;  %v8140_v17 = vmul.f32 %v7995_v23, %v9381_v62  ;;  %v3794_v25 = vadd.f32 %v3786_v55, %v3746_v30  ;;  %v8150_v8 = vmul.f32 %v5339_v60, %v4033_v29  ;;  %v9391_v41 = vmax.f32 %v9390_v34, 0.0  ;;  %v9398_v12 = vld [vmem:[#allocation104_spill] sm:$0xff]  ;;  %v9400_v62 = vld [vmem:[#allocation145_spill] sm:$0xff] }
 0x936   : > { %v3876_v18 = vmul.f32 %v7713_v49, %v9383_v47  ;;  %v3782_v27 = vmul.f32 %v9386_v32, %v9385_v9  ;;  %v9388_v49 = vmax.f32 %v9387_v45, 0.0  ;;  %v8159_v30 = vmul.f32 %v5331_v53, %v4029_v4  ;;  %v3438_v53 = vpop.permute.xlu0 %3437  ;;  %v3443_v47 = vpop.permute.xlu1 %3442  ;;  %v9401_v4 = vld [vmem:[#allocation189_spill] sm:$0xff] }
 0x937   : > { %v8052_v20 = vpop.f32.mrf.mxu0  ;;  %v8118_v36 = vpop.f32.mrf.mxu1  ;;  %v3834_v1 = vmul.f32 %v9392_v46, %v9391_v41  ;;  %v9394_v16 = vmax.f32 %v9393_v33, 0.0  ;;  %v9396_v50 = vmax.f32 %v9395_v15, 0.0  ;;  %v9399_v24 = vmax.f32 %v9398_v12, 0.0  ;;  %v9404_v45 = vld [vmem:[#allocation129_spill] sm:$0xff] }
 0x938   : > { %v3884_v19 = vadd.f32 %v3876_v18, %v3836_v58  ;;  %v3928_v52 = vmul.f32 %v9389_v22, %v9388_v49  ;;  %v3790_v51 = vadd.f32 %v3782_v27, %v3742_v42  ;;  %v3891_v29 = vadd.f32 %v3883_v38, %v3843_v57  ;;  %v9406_v22 = vld [vmem:[#allocation84_spill] sm:$0xff]  ;;  %v9407_v38 = vld [vmem:[#allocation193_spill] sm:$0xff]  ;;  %v9409_v57 = vld [vmem:[#allocation111_spill] sm:$0xff] }
 0x939   : > { %v2831_v35 = vpop.f32.mrf.mxu0  ;;  %v2874_v23 = vpop.f32.mrf.mxu1  ;;  %v8164_v54 = vmul.f32 %v8006_v63, %v9394_v16  ;;  %v3924_v58 = vmul.f32 %v9397_v37, %v9396_v50  ;;  %v3830_v28 = vmul.f32 %v9400_v62, %v9399_v24  ;;  %v3935_v6 = vadd.f32 %v3927_v21, %v3887_v0  ;;  %v9413_v37 = vld [vmem:[#allocation222_spill] sm:$0xff] }
 0x93a   : > { %v3936_v60 = vadd.f32 %v3928_v52, %v3888_v5  ;;  %v4053_v27 = vpack.c.bf16 %v8150_v8, %v8159_v30  ;;  %v9405_v49 = vmax.f32 %v9404_v45, 0.0  ;;  %v9408_v21 = vmax.f32 %v9407_v38, 0.0  ;;  %v9410_v8 = vld [vmem:[#allocation133_spill] sm:$0xff]  ;;  %v9416_v24 = vld [vmem:[#allocation218_spill] sm:$0xff] }
 0x93b   : > { %v2833_v39 = vpop.f32.mrf.mxu0  ;;  %v3932_v63 = vadd.f32 %v3924_v58, %v3884_v19  ;;  %v2876_v9 = vpop.f32.mrf.mxu1  ;;  %v9412_v30 = vld [vmem:[#allocation201_spill] sm:$0xff]  ;;  %v3939_v15 = vadd.f32 %v3931_v48, %v3891_v29  ;;  %v9414_v58 = vmax.f32 %v9413_v37, 0.0  ;;  %v9417_v62 = vmax.f32 %v9416_v24, 0.0  ;;  %v9421_v29 = vld [vmem:[#allocation163_spill] sm:$0xff] }
 0x93c   : > { %v3972_v0 = vmul.f32 %v9409_v57, %v9408_v21 }
 0x93e   : > { %v3980_v50 = vadd.f32 %v3972_v0, %v3932_v63  ;;  %v9422_v63 = vmax.f32 %v9421_v29, 0.0  ;;  %v9424_v0 = vld [vmem:[#allocation190_spill] sm:$0xff] }
 0x980   : > { %v3383_v7 = vpop.f32.mrf.mxu0 }
 0x981   : > { %v3384_v55 = vadd.f32 %v3383_v7, %v8033_v31  ;;  %v9402_v31 = vmax.f32 %v9401_v4, 0.0  ;;  %v9403_v7 = vld [vmem:[#allocation112_spill] sm:$0xff] }
 0x982   : > { %v3385_v26 = vpop.f32.mrf.mxu0 }
 0x983   : > { %v3386_v3 = vadd.f32 %v3385_v26, %v8052_v20  ;;  %v3842_v20 = vadd.f32 %v3834_v1, %v3794_v25  ;;  %v3976_v5 = vmul.f32 %v9403_v7, %v9402_v31  ;;  %v3838_v26 = vadd.f32 %v3830_v28, %v3790_v51  ;;  %v9423_v7 = vld [vmem:[#allocation176_spill] sm:$0xff] }
 0x984   : > { %v3387_v42 = vpop.f32.mrf.mxu0  ;;  %v3882_v25 = vmul.f32 %v9406_v22, %v9405_v49  ;;  %v3445_v19 = vadd.f32 %v3438_v53, %v3384_v55  ;;  %v9411_v1 = vmax.f32 %v9410_v8, 0.0  ;;  %v4024_v55 = vmul.f32 %v7986_v59, %v9417_v62 }
 0x985   : > { %v3388_v18 = vadd.f32 %v3387_v42, %v2831_v35  ;;  %v3446_v52 = vadd.f32 %v3438_v53, %v3386_v3  ;;  %v3984_v46 = vadd.f32 %v3976_v5, %v3936_v60  ;;  %v9415_v3 = vld [vmem:[#allocation86_spill] sm:$0xff]  ;;  %v9418_v60 = vld [vmem:[#allocation159_spill] sm:$0xff]  ;;  %v3926_v5 = vmul.f32 %v9423_v7, %v9422_v63 }
 0x986   : > { %v3389_v32 = vpop.f32.mrf.mxu0  ;;  %v3878_v33 = vmul.f32 %v9412_v30, %v9411_v1  ;;  %v3890_v16 = vadd.f32 %v3882_v25, %v3842_v20  ;;  %v4020_v42 = vmul.f32 %v9415_v3, %v9414_v58  ;;  %v3453_v45 = vmax.f32 %v3445_v19, 0.0  ;;  %v9426_v1 = vld [vmem:[#allocation85_spill] sm:$0xff]  ;;  %v5047_v63 = vld [vmem:[%s8411_s6 + $0x18] sm:$0xff]  }
 0x987   : > { %v3449_v34 = vadd.f32 %v3443_v47, %v3388_v18  ;;  %v3390_v35 = vadd.f32 %v3389_v32, %v2833_v39  ;;  %v9419_v18 = vmax.f32 %v9418_v60, 0.0  ;;  %v9420_v32 = vld [vmem:[#allocation29_spill] sm:$0xff]  ;;  %v3454_v31 = vmax.f32 %v3446_v52, 0.0  ;;  %v9436_v60 = vld [vmem:[#allocation56_spill] sm:$0xff] }
 0x988   : > { %v3886_v28 = vadd.f32 %v3878_v33, %v3838_v26  ;;  %v4032_v25 = vadd.f32 %v4024_v55, %v3984_v46  ;;  %v4028_v38 = vadd.f32 %v4020_v42, %v3980_v50  ;;  %v9425_v8 = vmax.f32 %v9424_v0, 0.0  ;;  %v9430_v58 = vld [vmem:[#allocation217_spill] sm:$0xff] }
 0x989   : > { %v3426_v41 = vpop.f32.mrf.mxu1  ;;  %v3450_v51 = vadd.f32 %v3443_v47, %v3390_v35  ;;  %v3457_v12 = vmax.f32 %v3449_v34, 0.0  ;;  %v3930_v4 = vmul.f32 %v9420_v32, %v9419_v18  ;;  %v3987_v35 = vadd.f32 %v8140_v17, %v3939_v15  ;;  %v5046_v17 = vld [vmem:[%s8411_s6 + $0x10] sm:$0xff]  }
 0x98a   : > { %v3427_v49 = vadd.f32 %v3426_v41, %v8085_v56  ;;  %v3934_v57 = vadd.f32 %v3926_v5, %v3886_v28  ;;  %v3978_v30 = vmul.f32 %v9426_v1, %v9425_v8  ;;  %v3983_v41 = vadd.f32 %v8135_v10, %v3935_v6 }
 0x98b   : > { %v3428_v39 = vpop.f32.mrf.mxu1  ;;  %v3458_v48 = vmax.f32 %v3450_v51, 0.0  ;;  %v3938_v34 = vadd.f32 %v3930_v4, %v3890_v16  ;;  %v3461_v21 = vpack.c.bf16 %v3457_v12, %v3453_v45  ;;  %v4044_v46 = vmul.f32 %v8050_v14, %v4028_v38  ;;  %v9429_v51 = vld [vmem:[#allocation205_spill] sm:$0xff]  ;;  %v5049_v45 = vld [vmem:[%s8411_s6 + $0x8] sm:$0xff]  }
 0x98c   : > { %v3429_v20 = vadd.f32 %v3428_v39, %v8118_v36  ;;  %v4048_v36 = vmul.f32 %v8099_v61, %v4032_v25  ;;  %v9427_v61 = vld [vmem:[#allocation194_spill] sm:$0xff]  ;;  %v4035_v10 = vadd.f32 %v8164_v54, %v3987_v35  ;;  %v9437_v32 = vmov 0  }
 0x98d   : > { %v3430_v22 = vpop.f32.mrf.mxu1  ;;  %v3462_v26 = vpack.c.bf16 %v3458_v48, %v3454_v31  ;;  %v9428_v16 = vmax.f32 %v9427_v61, 0.0  ;;  %v3986_v50 = vadd.f32 %v3978_v30, %v3938_v34  ;;  %v4195_v61 = vpop.permute.xlu0 %4194 }
 0x98e   : > { %v3431_v59 = vadd.f32 %v3430_v22, %v2874_v23  ;;  %v3448_v19 = vadd.f32 %v3438_v53, %v3429_v20  ;;  %v3447_v23 = vadd.f32 %v3438_v53, %v3427_v49  ;;  %v4052_v42 = vpack.c.bf16 %v4048_v36, %v4044_v46  ;;  %v9432_v53 = vld [vmem:[#allocation219_spill] sm:$0xff]  ;;  %v9441_v49 = vld [vmem:[#allocation10_spill] sm:$0xff] }
 0x98f   : > { %v3432_v52 = vpop.f32.mrf.mxu1  ;;  %3504 = vmatprep.subr.bf16.mxu0 %v3462_v26  ;;  %v3974_v15 = vmul.f32 %v9429_v51, %v9428_v16  ;;  %v9433_v12 = vmax.f32 %v9432_v53, 0.0  ;;  %v4051_v28 = vmul.f32 %v8145_v2, %v4035_v10  ;;  %v4200_v16 = vpop.permute.xlu1 %4199 }
 0x990   : > { %v3451_v33 = vadd.f32 %v3443_v47, %v3431_v59  ;;  %v3433_v56 = vadd.f32 %v3432_v52, %v2876_v9  ;;  %3505 = vmatpush1.bf16.msra.mxu0 %v3461_v21  ;;  %v9431_v9 = vmax.f32 %v9430_v58, 0.0  ;;  %v3456_v24 = vmax.f32 %v3448_v19, 0.0 }
 0x991   : > { %4090 = vmatprep.subr.bf16.mxu0 %v4053_v27  ;;  %v3982_v39 = vadd.f32 %v3974_v15, %v3934_v57  ;;  %v4026_v14 = vmul.f32 %v7991_v44, %v9433_v12  ;;  %v9434_v27 = vld [vmem:[#allocation223_spill] sm:$0xff] }
 0x992   : > { %v3452_v37 = vadd.f32 %v3443_v47, %v3433_v56  ;;  %v4023_v3 = vmul.f32 %v7852_v40, %v9431_v9  ;;  %v3459_v6 = vmax.f32 %v3451_v33, 0.0  ;;  %v3455_v47 = vmax.f32 %v3447_v23, 0.0  ;;  %v9438_v44 = vld [vmem:[#allocation7_spill] sm:$0xff] }
 0x993   : > { %4895 = vmatmul.mubr.msk.bf16.vlgmr.msra.gmra.mxu0 %vm2789_vm13, %v5046_v17  ;;  %v9435_v40 = vmax.f32 %v9434_v27, 0.0  ;;  %v4034_v18 = vadd.f32 %v4026_v14, %v3986_v50  ;;  %v4190_v12 = vpop.permute.xlu1 %4189 }
 0x994   : > { %v3460_v62 = vmax.f32 %v3452_v37, 0.0  ;;  %v4031_v55 = vadd.f32 %v4023_v3, %v3983_v41  ;;  %4091 = vmatpush1.bf16.msra.mxu0 %v4052_v42  ;;  %3532 = vmatprep.mubr.bf16.mxu0 %v9437_v32  ;;  %v3463_v20 = vpack.c.bf16 %v3459_v6, %v3455_v47 }
 0x995   : > { %v4022_v54 = vmul.f32 %v9436_v60, %v9435_v40  ;;  %4909 = vmatprep.subr.msk.bf16.mxu0 %vm434_vm0, %v9438_v44  ;;  %v4050_v2 = vmul.f32 %v8113_v43, %v4034_v18  ;;  %v5048_v43 = vld [vmem:[%s8411_s6] sm:$0xff]  }
 0x996   : > { %v3464_v4 = vpack.c.bf16 %v3460_v62, %v3456_v24  ;;  %v4047_v31 = vmul.f32 %v8083_v13, %v4031_v55  ;;  %v9439_v13 = vld [vmem:[#allocation8_spill] sm:$0xff]  ;;  %v4185_v62 = vpop.permute.xlu0 %4184 }
 0x997   : > { %v4030_v48 = vadd.f32 %v4022_v54, %v3982_v39 }
 0x998   : > { %3557 = vmatprep.subr.bf16.mxu1 %v3464_v4  ;;  %v4055_v29 = vpack.c.bf16 %v4051_v28, %v4047_v31 }
 0x999   : > { %3558 = vmatpush1.bf16.msra.mxu1 %v3463_v20  ;;  %v4046_v7 = vmul.f32 %v8075_v11, %v4030_v48  ;;  %v9440_v11 = vld [vmem:[#allocation9_spill] sm:$0xff] }
 0x99a   : > { %4143 = vmatprep.subr.bf16.mxu1 %v4055_v29 }
 0x99b   : > { %v4054_v5 = vpack.c.bf16 %v4050_v2, %v4046_v7  ;;  %4896 = vmatmul.mubr.msk.bf16.gmra.mxu0 %vm2789_vm13, %v5047_v63 }
 0x99c   : > { %4897 = vmatmul.mubr.msk.bf16.vlgmr.msra.gmra.mxu1 %vm2789_vm13, %v5046_v17  ;;  %4108 = vmatprep.mubr.bf16.mxu0 %v9437_v32 }
 0x99d   : > { %4144 = vmatpush1.bf16.msra.mxu1 %v4054_v5  ;;  %3585 = vmatprep.mubr.bf16.mxu1 %v9437_v32 }
 0x99e   : > { %4914 = vmatprep.subr.msk.bf16.mxu1 %vm434_vm0, %v9439_v13 }
 0x9a3   : > { %4901 = vmatmul.mubr.msk.bf16.vlgmr.msra.gmra.mxu0 %vm2789_vm13, %v5048_v43 }
 0x9a4   : > { %4898 = vmatmul.mubr.msk.bf16.gmra.mxu1 %vm2789_vm13, %v5047_v63  ;;  %4118 = vmatprep.mubr.bf16.mxu0 %v9437_v32 }
 0x9a5   : > { %4161 = vmatprep.mubr.bf16.mxu1 %v9437_v32  ;;  %4342 = vmatpush1.bf16.msra.mxu0 %v9440_v11 }
 0x9ab   : > { %4902 = vmatmul.mubr.msk.bf16.gmra.mxu0 %vm2789_vm13, %v5049_v45 }
 0x9ac   : > { %4903 = vmatmul.mubr.msk.bf16.vlgmr.msra.gmra.mxu1 %vm2789_vm13, %v5048_v43  ;;  %4363 = vmatprep.mubr.bf16.mxu0 %v9437_v32 }
 0x9ad   : > { %4171 = vmatprep.mubr.bf16.mxu1 %v9437_v32  ;;  %4415 = vmatpush1.bf16.msra.mxu1 %v9441_v49 }
 0x9b4   : > { %4904 = vmatmul.mubr.msk.bf16.gmra.mxu1 %vm2789_vm13, %v5049_v45 }
 0x9b5   : > { %4436 = vmatprep.mubr.bf16.mxu1 %v9437_v32 }
 0xa53   : > { %v3524_v22 = vpop.f32.mrf.mxu0 }
 0xa55   : > { %v3526_v25 = vpop.f32.mrf.mxu0 }
 0xa57   : > { %v3528_v34 = vpop.f32.mrf.mxu0 }
 0xa59   : > { %v3530_v59 = vpop.f32.mrf.mxu0 }
 0xa5b   : > { %v3534_v35 = vpop.f32.mrf.mxu0 }
 0xa5c   : > { %v8259_v26 = vpop.f32.mrf.mxu1 }
 0xa5d   : > { %v3536_v21 = vpop.f32.mrf.mxu0 }
 0xa5e   : > { %v3579_v38 = vpop.f32.mrf.mxu1 }
 0xa5f   : > { %v3538_v36 = vpop.f32.mrf.mxu0 }
 0xa60   : > { %v3581_v52 = vpop.f32.mrf.mxu1 }
 0xa61   : > { %v3540_v0 = vpop.f32.mrf.mxu0 }
 0xa62   : > { %v3583_v57 = vpop.f32.mrf.mxu1 }
 0xa63   : > { %v4110_v1 = vpop.f32.mrf.mxu0 }
 0xa64   : > { %v3587_v8 = vpop.f32.mrf.mxu1  ;;  %v4111_v14 = vadd.f32 %v4110_v1, %v3524_v22 }
 0xa65   : > { %v4112_v19 = vpop.f32.mrf.mxu0 }
 0xa66   : > { %v3589_v30 = vpop.f32.mrf.mxu1  ;;  %v4113_v3 = vadd.f32 %v4112_v19, %v3526_v25  ;;  %v4202_v44 = vadd.f32 %v4185_v62, %v4111_v14 }
 0xa67   : > { %v4114_v56 = vpop.f32.mrf.mxu0 }
 0xa68   : > { %v3591_v33 = vpop.f32.mrf.mxu1  ;;  %v4115_v42 = vadd.f32 %v4114_v56, %v3528_v34  ;;  %v4203_v40 = vadd.f32 %v4185_v62, %v4113_v3  ;;  %v5051_v3 = vld [vmem:[%s8412_s7 + $0x8] sm:$0xff]  }
 0xa69   : > { %v4116_v17 = vpop.f32.mrf.mxu0 }
 0xa6a   : > { %v3593_v41 = vpop.f32.mrf.mxu1  ;;  %v4117_v37 = vadd.f32 %v4116_v17, %v3530_v59  ;;  %v4206_v54 = vadd.f32 %v4190_v12, %v4115_v42  ;;  %v4219_v13 = vmax.f32 %v4203_v40, 0.0  ;;  %v4261_v42 = vpop.permute.xlu0 %4260 }
 0xa6b   : > { %v4120_v46 = vpop.f32.mrf.mxu0 }
 0xa6c   : > { %v4163_v23 = vpop.f32.mrf.mxu1  ;;  %v4121_v10 = vadd.f32 %v4120_v46, %v3534_v35  ;;  %v4207_v55 = vadd.f32 %v4190_v12, %v4117_v37  ;;  %v4222_v49 = vmax.f32 %v4206_v54, 0.0 }
 0xa6d   : > { %v4122_v15 = vpop.f32.mrf.mxu0 }
 0xa6e   : > { %v4165_v51 = vpop.f32.mrf.mxu1  ;;  %v4123_v58 = vadd.f32 %v4122_v15, %v3536_v21  ;;  %v4210_v60 = vadd.f32 %v4195_v61, %v4121_v10  ;;  %v4223_v2 = vmax.f32 %v4207_v55, 0.0  ;;  %v5052_v10 = vld [vmem:[%s8412_s7 + $0x10] sm:$0xff]  }
 0xa6f   : > { %v4124_v9 = vpop.f32.mrf.mxu0  ;;  %v4166_v43 = vadd.f32 %v4165_v51, %v3579_v38 }
 0xa70   : > { %v4167_v50 = vpop.f32.mrf.mxu1  ;;  %v4125_v6 = vadd.f32 %v4124_v9, %v3538_v36  ;;  %v4211_v47 = vadd.f32 %v4195_v61, %v4123_v58  ;;  %v4226_v11 = vmax.f32 %v4210_v60, 0.0 }
 0xa71   : > { %v4126_v53 = vpop.f32.mrf.mxu0  ;;  %v4168_v22 = vadd.f32 %v4167_v50, %v3581_v52  ;;  %v4205_v19 = vadd.f32 %v4185_v62, %v4166_v43 }
 0xa72   : > { %v4169_v39 = vpop.f32.mrf.mxu1  ;;  %v4214_v24 = vadd.f32 %v4200_v16, %v4125_v6  ;;  %v4127_v27 = vadd.f32 %v4126_v53, %v3540_v0  ;;  %v4227_v63 = vmax.f32 %v4211_v47, 0.0  ;;  %v4164_v0 = vadd.f32 %v4163_v23, %v8259_v26  ;;  %v5050_v26 = vld [vmem:[%s8412_s7] sm:$0xff]   ;;  %v5053_v6 = vld [vmem:[%s8412_s7 + $0x18] sm:$0xff]  }
 0xa73   : > { %v4170_v18 = vadd.f32 %v4169_v39, %v3583_v57  ;;  %v4208_v38 = vadd.f32 %v4190_v12, %v4168_v22 }
 0xa74   : > { %v4173_v28 = vpop.f32.mrf.mxu1  ;;  %v4215_v31 = vadd.f32 %v4200_v16, %v4127_v27  ;;  %v4230_v48 = vmax.f32 %v4214_v24, 0.0  ;;  %v4204_v15 = vadd.f32 %v4185_v62, %v4164_v0  ;;  %v4266_v62 = vpop.permute.xlu1 %4265 }
 0xa75   : > { %v4174_v29 = vadd.f32 %v4173_v28, %v3587_v8  ;;  %v4209_v25 = vadd.f32 %v4190_v12, %v4170_v18  ;;  %v4235_v8 = vpack.c.bf16 %v4223_v2, %v4219_v13 }
 0xa76   : > { %v4175_v4 = vpop.f32.mrf.mxu1  ;;  %v4231_v5 = vmax.f32 %v4215_v31, 0.0  ;;  %v4238_v21 = vpack.c.bf16 %v4230_v48, %v4226_v11  ;;  %v4220_v58 = vmax.f32 %v4204_v15, 0.0 }
 0xa77   : > { %v4176_v20 = vadd.f32 %v4175_v4, %v3589_v30  ;;  %v4212_v1 = vadd.f32 %v4195_v61, %v4174_v29  ;;  %v4218_v30 = vmax.f32 %v4202_v44, 0.0  ;;  %v4225_v17 = vmax.f32 %v4209_v25, 0.0  ;;  %v4271_v4 = vpop.permute.xlu0 %4270 }
 0xa78   : > { %v4177_v7 = vpop.f32.mrf.mxu1  ;;  %v4239_v59 = vpack.c.bf16 %v4231_v5, %v4227_v63 }
 0xa79   : > { %v4178_v45 = vadd.f32 %v4177_v7, %v3591_v33  ;;  %v4213_v35 = vadd.f32 %v4195_v61, %v4176_v20  ;;  %v4234_v52 = vpack.c.bf16 %v4222_v49, %v4218_v30  ;;  %v4228_v50 = vmax.f32 %v4212_v1, 0.0  ;;  %v8296_v49 = vpop.permute.xlu1 %4275 }
 0xa7a   : > { %v4179_v34 = vpop.f32.mrf.mxu1  ;;  %4343 = vmatprep.subr.bf16.mxu0 %v4239_v59  ;;  %v4224_v61 = vmax.f32 %v4208_v38, 0.0 }
 0xa7b   : > { %v4216_v36 = vadd.f32 %v4200_v16, %v4178_v45  ;;  %v4180_v57 = vadd.f32 %v4179_v34, %v3593_v41  ;;  %4344 = vmatpush1.bf16.msra.mxu0 %v4238_v21  ;;  %v4229_v46 = vmax.f32 %v4213_v35, 0.0  ;;  %v4221_v41 = vmax.f32 %v4205_v19, 0.0 }
 0xa7c   : > { %4345 = vmatprep.subr.bf16.mxu0 %v4235_v8  ;;  %v4236_v9 = vpack.c.bf16 %v4224_v61, %v4220_v58 }
 0xa7d   : > { %v4217_v56 = vadd.f32 %v4200_v16, %v4180_v57  ;;  %v4232_v33 = vmax.f32 %v4216_v36, 0.0  ;;  %v4237_v37 = vpack.c.bf16 %v4225_v17, %v4221_v41 }
 0xa7f   : > { %v4233_v51 = vmax.f32 %v4217_v56, 0.0  ;;  %4346 = vmatpush1.bf16.msra.mxu0 %v4234_v52  ;;  %v4240_v16 = vpack.c.bf16 %v4232_v33, %v4228_v50  ;;  %v8304_v52 = vpop.permute.xlu0 %4280 }
 0xa81   : > { %v4241_v23 = vpack.c.bf16 %v4233_v51, %v4229_v46 }
 0xa82   : > { %4910 = vmatmul.mubr.msk.bf16.vlgmr.msra.gmra.mxu0 %vm4318_vm14, %v5050_v26 }
 0xa83   : > { %4416 = vmatprep.subr.bf16.mxu1 %v4241_v23  ;;  %4373 = vmatprep.mubr.bf16.mxu0 %v9437_v32 }
 0xa84   : > { %4417 = vmatpush1.bf16.msra.mxu1 %v4240_v16 }
 0xa85   : > { %4418 = vmatprep.subr.bf16.mxu1 %v4237_v37 }
 0xa88   : > { %4419 = vmatpush1.bf16.msra.mxu1 %v4236_v9 }
 0xa8a   : > { %4911 = vmatmul.mubr.msk.bf16.gmra.mxu0 %vm4318_vm14, %v5051_v3 }
 0xa8b   : > { %4915 = vmatmul.mubr.msk.bf16.vlgmr.msra.gmra.mxu1 %vm4318_vm14, %v5050_v26  ;;  %4383 = vmatprep.mubr.bf16.mxu0 %v9437_v32 }
 0xa8c   : > { %4446 = vmatprep.mubr.bf16.mxu1 %v9437_v32 }
 0xa92   : > { %4912 = vmatmul.mubr.msk.bf16.gmra.mxu0 %vm4318_vm14, %v5052_v10 }
 0xa93   : > { %4916 = vmatmul.mubr.msk.bf16.gmra.mxu1 %vm4318_vm14, %v5051_v3  ;;  %4393 = vmatprep.mubr.bf16.mxu0 %v9437_v32 }
 0xa94   : > { %4456 = vmatprep.mubr.bf16.mxu1 %v9437_v32 }
 0xa9a   : > { %4913 = vmatmul.mubr.msk.bf16.gmra.mxu0 %vm4318_vm14, %v5053_v6 }
 0xa9b   : > { %4917 = vmatmul.mubr.msk.bf16.gmra.mxu1 %vm4318_vm14, %v5052_v10 }
 0xa9c   : > { %4466 = vmatprep.mubr.bf16.mxu1 %v9437_v32 }
 0xaa3   : > { %4918 = vmatmul.mubr.msk.bf16.gmra.mxu1 %vm4318_vm14, %v5053_v6 }
 0xb42   : > { %v4365_v39 = vpop.f32.mrf.mxu0 }
 0xb43   : > { %v4366_v53 = vadd.f32 %v4365_v39, %v4261_v42 }
 0xb44   : > { %v4367_v12 = vpop.f32.mrf.mxu0 }
 0xb45   : > { %vm4477_vm15 = vcmp.ge.f32.partialorder %v4366_v53, 0.0  ;;  %v4509_v14 = vmul.f32 0.01, %v4366_v53  ;;  %v4368_v24 = vadd.f32 %v4367_v12, %v4261_v42 }
 0xb46   : > { %v4369_v55 = vpop.f32.mrf.mxu0 }
 0xb47   : > { %v4541_v28 = vsel %vm4477_vm15, %v4366_v53, %v4509_v14  ;;  %vm4478_vm0 = vcmp.ge.f32.partialorder %v4368_v24, 0.0  ;;  %v4510_v47 = vmul.f32 0.01, %v4368_v24  ;;  %v4370_v32 = vadd.f32 %v4369_v55, %v4266_v62 }
 0xb48   : > { %4573 = vst [vmem:[%s8291_s17] sm:$0xff] %v4541_v28  ;;  %v4371_v27 = vpop.f32.mrf.mxu0 }
 0xb49   : > { %v4542_v60 = vsel %vm4478_vm0, %v4368_v24, %v4510_v47  ;;  %vm4481_vm1 = vcmp.ge.f32.partialorder %v4370_v32, 0.0  ;;  %v4513_v54 = vmul.f32 0.01, %v4370_v32  ;;  %v4372_v18 = vadd.f32 %v4371_v27, %v4266_v62 }
 0xb4a   : > { %4574 = vst [vmem:[%s8291_s17 + $0x8] sm:$0xff] %v4542_v60  ;;  %v4375_v44 = vpop.f32.mrf.mxu0 }
 0xb4b   : > { %v4438_v40 = vpop.f32.mrf.mxu1  ;;  %v4545_v48 = vsel %vm4481_vm1, %v4370_v32, %v4513_v54  ;;  %vm4482_vm2 = vcmp.ge.f32.partialorder %v4372_v18, 0.0  ;;  %v4514_v2 = vmul.f32 0.01, %v4372_v18  ;;  %v4376_v29 = vadd.f32 %v4375_v44, %v4271_v4 }
 0xb4c   : > { %v4439_v31 = vadd.f32 %v4438_v40, %v4261_v42  ;;  %4577 = vst [vmem:[%s8291_s17 + $0x20] sm:$0xff] %v4545_v48  ;;  %v4377_v5 = vpop.f32.mrf.mxu0 }
 0xb4d   : > { %v4440_v20 = vpop.f32.mrf.mxu1  ;;  %v4546_v43 = vsel %vm4482_vm2, %v4372_v18, %v4514_v2  ;;  %vm4485_vm4 = vcmp.ge.f32.partialorder %v4376_v29, 0.0  ;;  %v4517_v11 = vmul.f32 0.01, %v4376_v29  ;;  %v4378_v45 = vadd.f32 %v4377_v5, %v4271_v4 }
 0xb4e   : > { %vm4479_vm3 = vcmp.ge.f32.partialorder %v4439_v31, 0.0  ;;  %v4511_v63 = vmul.f32 0.01, %v4439_v31  ;;  %v4441_v7 = vadd.f32 %v4440_v20, %v4261_v42  ;;  %4578 = vst [vmem:[%s8291_s17 + $0x28] sm:$0xff] %v4546_v43  ;;  %v4379_v59 = vpop.f32.mrf.mxu0  ;;  %v8312_v42 = vpop.permute.xlu1 %4285 }
 0xb4f   : > { %v4442_v13 = vpop.f32.mrf.mxu1  ;;  %v4549_v21 = vsel %vm4485_vm4, %v4376_v29, %v4517_v11  ;;  %vm4486_vm6 = vcmp.ge.f32.partialorder %v4378_v45, 0.0  ;;  %v4518_v36 = vmul.f32 0.01, %v4378_v45  ;;  %v4380_v57 = vadd.f32 %v4379_v59, %v8296_v49 }
 0xb50   : > { %v4543_v22 = vsel %vm4479_vm3, %v4439_v31, %v4511_v63  ;;  %vm4480_vm5 = vcmp.ge.f32.partialorder %v4441_v7, 0.0  ;;  %v4512_v25 = vmul.f32 0.01, %v4441_v7  ;;  %v4443_v34 = vadd.f32 %v4442_v13, %v4266_v62  ;;  %4581 = vst [vmem:[%s8291_s17 + $0x40] sm:$0xff] %v4549_v21  ;;  %v4381_v30 = vpop.f32.mrf.mxu0  ;;  %v8322_v31 = vpop.permute.xlu0 %4290 }
 0xb51   : > { %4575 = vst [vmem:[%s8291_s17 + $0x10] sm:$0xff] %v4543_v22  ;;  %v4444_v35 = vpop.f32.mrf.mxu1  ;;  %v4550_v56 = vsel %vm4486_vm6, %v4378_v45, %v4518_v36  ;;  %vm4489_vm8 = vcmp.ge.f32.partialorder %v4380_v57, 0.0  ;;  %v4521_v38 = vmul.f32 0.01, %v4380_v57  ;;  %v4382_v33 = vadd.f32 %v4381_v30, %v8296_v49 }
 0xb52   : > { %v4544_v0 = vsel %vm4480_vm5, %v4441_v7, %v4512_v25  ;;  %vm4483_vm7 = vcmp.ge.f32.partialorder %v4443_v34, 0.0  ;;  %v4515_v1 = vmul.f32 0.01, %v4443_v34  ;;  %v4445_v8 = vadd.f32 %v4444_v35, %v4266_v62  ;;  %4582 = vst [vmem:[%s8291_s17 + $0x48] sm:$0xff] %v4550_v56  ;;  %v4385_v15 = vpop.f32.mrf.mxu0  ;;  %v4296_v59 = vpop.permute.xlu1 %4295 }
 0xb53   : > { %4576 = vst [vmem:[%s8291_s17 + $0x18] sm:$0xff] %v4544_v0  ;;  %v4448_v19 = vpop.f32.mrf.mxu1  ;;  %v4553_v26 = vsel %vm4489_vm8, %v4380_v57, %v4521_v38  ;;  %vm4490_vm10 = vcmp.ge.f32.partialorder %v4382_v33, 0.0  ;;  %v4522_v41 = vmul.f32 0.01, %v4382_v33  ;;  %v4386_v23 = vadd.f32 %v4385_v15, %v8304_v52 }
 0xb54   : > { %v4547_v17 = vsel %vm4483_vm7, %v4443_v34, %v4515_v1  ;;  %vm4484_vm9 = vcmp.ge.f32.partialorder %v4445_v8, 0.0  ;;  %v4516_v46 = vmul.f32 0.01, %v4445_v8  ;;  %v4449_v51 = vadd.f32 %v4448_v19, %v4271_v4  ;;  %4585 = vst [vmem:[%s8291_s17 + $0x60] sm:$0xff] %v4553_v26  ;;  %v4387_v58 = vpop.f32.mrf.mxu0 }
 0xb55   : > { %4579 = vst [vmem:[%s8291_s17 + $0x30] sm:$0xff] %v4547_v17  ;;  %v4450_v50 = vpop.f32.mrf.mxu1  ;;  %v4554_v3 = vsel %vm4490_vm10, %v4382_v33, %v4522_v41  ;;  %vm4493_vm12 = vcmp.ge.f32.partialorder %v4386_v23, 0.0  ;;  %v4525_v10 = vmul.f32 0.01, %v4386_v23  ;;  %v4388_v6 = vadd.f32 %v4387_v58, %v8304_v52 }
 0xb56   : > { %v4548_v61 = vsel %vm4484_vm9, %v4445_v8, %v4516_v46  ;;  %vm4487_vm11 = vcmp.ge.f32.partialorder %v4449_v51, 0.0  ;;  %v4519_v16 = vmul.f32 0.01, %v4449_v51  ;;  %v4451_v37 = vadd.f32 %v4450_v50, %v4271_v4  ;;  %4586 = vst [vmem:[%s8291_s17 + $0x68] sm:$0xff] %v4554_v3  ;;  %v4389_v14 = vpop.f32.mrf.mxu0 }
 0xb57   : > { %4580 = vst [vmem:[%s8291_s17 + $0x38] sm:$0xff] %v4548_v61  ;;  %v4452_v9 = vpop.f32.mrf.mxu1  ;;  %v4557_v62 = vsel %vm4493_vm12, %v4386_v23, %v4525_v10  ;;  %vm4494_vm14 = vcmp.ge.f32.partialorder %v4388_v6, 0.0  ;;  %v4526_v55 = vmul.f32 0.01, %v4388_v6  ;;  %v4390_v28 = vadd.f32 %v4389_v14, %v8312_v42 }
 0xb58   : > { %v4551_v39 = vsel %vm4487_vm11, %v4449_v51, %v4519_v16  ;;  %vm4488_vm13 = vcmp.ge.f32.partialorder %v4451_v37, 0.0  ;;  %v4520_v53 = vmul.f32 0.01, %v4451_v37  ;;  %v4453_v12 = vadd.f32 %v4452_v9, %v8296_v49  ;;  %4589 = vst [vmem:[%s8291_s17 + $0x80] sm:$0xff] %v4557_v62  ;;  %v4391_v40 = vpop.f32.mrf.mxu0 }
 0xb59   : > { %4583 = vst [vmem:[%s8291_s17 + $0x50] sm:$0xff] %v4551_v39  ;;  %v4454_v24 = vpop.f32.mrf.mxu1  ;;  %v4558_v54 = vsel %vm4494_vm14, %v4388_v6, %v4526_v55  ;;  %vm4497_vm0 = vcmp.ge.f32.partialorder %v4390_v28, 0.0  ;;  %v4529_v18 = vmul.f32 0.01, %v4390_v28  ;;  %v4392_v4 = vadd.f32 %v4391_v40, %v8312_v42 }
 0xb5a   : > { %v4552_v47 = vsel %vm4488_vm13, %v4451_v37, %v4520_v53  ;;  %vm4491_vm15 = vcmp.ge.f32.partialorder %v4453_v12, 0.0  ;;  %v4523_v32 = vmul.f32 0.01, %v4453_v12  ;;  %v4455_v27 = vadd.f32 %v4454_v24, %v8296_v49  ;;  %4590 = vst [vmem:[%s8291_s17 + $0x88] sm:$0xff] %v4558_v54  ;;  %v4395_v2 = vpop.f32.mrf.mxu0 }
 0xb5b   : > { %4584 = vst [vmem:[%s8291_s17 + $0x58] sm:$0xff] %v4552_v47  ;;  %v4458_v60 = vpop.f32.mrf.mxu1  ;;  %v4561_v63 = vsel %vm4497_vm0, %v4390_v28, %v4529_v18  ;;  %vm4498_vm2 = vcmp.ge.f32.partialorder %v4392_v4, 0.0  ;;  %v4530_v7 = vmul.f32 0.01, %v4392_v4  ;;  %v4396_v5 = vadd.f32 %v4395_v2, %v8322_v31 }
 0xb5c   : > { %v4555_v44 = vsel %vm4491_vm15, %v4453_v12, %v4523_v32  ;;  %vm4492_vm1 = vcmp.ge.f32.partialorder %v4455_v27, 0.0  ;;  %v4524_v20 = vmul.f32 0.01, %v4455_v27  ;;  %v4459_v48 = vadd.f32 %v4458_v60, %v8304_v52  ;;  %4593 = vst [vmem:[%s8291_s17 + $0xa0] sm:$0xff] %v4561_v63  ;;  %v4397_v45 = vpop.f32.mrf.mxu0 }
 0xb5d   : > { %4587 = vst [vmem:[%s8291_s17 + $0x70] sm:$0xff] %v4555_v44  ;;  %v4460_v29 = vpop.f32.mrf.mxu1  ;;  %v4562_v22 = vsel %vm4498_vm2, %v4392_v4, %v4530_v7  ;;  %vm4501_vm4 = vcmp.ge.f32.partialorder %v4396_v5, 0.0  ;;  %v4533_v25 = vmul.f32 0.01, %v4396_v5  ;;  %v4398_v34 = vadd.f32 %v4397_v45, %v8322_v31 }
 0xb5e   : > { %v4556_v13 = vsel %vm4492_vm1, %v4455_v27, %v4524_v20  ;;  %vm4495_vm3 = vcmp.ge.f32.partialorder %v4459_v48, 0.0  ;;  %v4527_v43 = vmul.f32 0.01, %v4459_v48  ;;  %v4461_v11 = vadd.f32 %v4460_v29, %v8304_v52  ;;  %4594 = vst [vmem:[%s8291_s17 + $0xa8] sm:$0xff] %v4562_v22  ;;  %v4399_v57 = vpop.f32.mrf.mxu0 }
 0xb5f   : > { %4588 = vst [vmem:[%s8291_s17 + $0x78] sm:$0xff] %v4556_v13  ;;  %v4462_v49 = vpop.f32.mrf.mxu1  ;;  %v4565_v1 = vsel %vm4501_vm4, %v4396_v5, %v4533_v25  ;;  %vm4502_vm6 = vcmp.ge.f32.partialorder %v4398_v34, 0.0  ;;  %v4534_v8 = vmul.f32 0.01, %v4398_v34  ;;  %v4400_v30 = vadd.f32 %v4399_v57, %v4296_v59 }
 0xb60   : > { %v4559_v35 = vsel %vm4495_vm3, %v4459_v48, %v4527_v43  ;;  %vm4496_vm5 = vcmp.ge.f32.partialorder %v4461_v11, 0.0  ;;  %v4528_v21 = vmul.f32 0.01, %v4461_v11  ;;  %v4463_v36 = vadd.f32 %v4462_v49, %v8312_v42  ;;  %4597 = vst [vmem:[%s8291_s17 + $0xc0] sm:$0xff] %v4565_v1  ;;  %v4401_v33 = vpop.f32.mrf.mxu0 }
 0xb61   : > { %4591 = vst [vmem:[%s8291_s17 + $0x90] sm:$0xff] %v4559_v35  ;;  %v4464_v0 = vpop.f32.mrf.mxu1  ;;  %v4566_v17 = vsel %vm4502_vm6, %v4398_v34, %v4534_v8  ;;  %vm4505_vm8 = vcmp.ge.f32.partialorder %v4400_v30, 0.0  ;;  %v4537_v46 = vmul.f32 0.01, %v4400_v30  ;;  %v4402_v51 = vadd.f32 %v4401_v33, %v4296_v59 }
 0xb62   : > { %v4560_v19 = vsel %vm4496_vm5, %v4461_v11, %v4528_v21  ;;  %vm4499_vm7 = vcmp.ge.f32.partialorder %v4463_v36, 0.0  ;;  %v4531_v56 = vmul.f32 0.01, %v4463_v36  ;;  %v4465_v38 = vadd.f32 %v4464_v0, %v8312_v42  ;;  %4598 = vst [vmem:[%s8291_s17 + $0xc8] sm:$0xff] %v4566_v17 }
 0xb63   : > { %4592 = vst [vmem:[%s8291_s17 + $0x98] sm:$0xff] %v4560_v19  ;;  %v4468_v52 = vpop.f32.mrf.mxu1  ;;  %v4569_v23 = vsel %vm4505_vm8, %v4400_v30, %v4537_v46  ;;  %vm4506_vm10 = vcmp.ge.f32.partialorder %v4402_v51, 0.0  ;;  %v4538_v61 = vmul.f32 0.01, %v4402_v51 }
 0xb64   : > { %v4563_v15 = vsel %vm4499_vm7, %v4463_v36, %v4531_v56  ;;  %vm4500_vm9 = vcmp.ge.f32.partialorder %v4465_v38, 0.0  ;;  %v4532_v50 = vmul.f32 0.01, %v4465_v38  ;;  %v4469_v26 = vadd.f32 %v4468_v52, %v8322_v31  ;;  %4601 = vst [vmem:[%s8291_s17 + $0xe0] sm:$0xff] %v4569_v23 }
 0xb65   : > { %4595 = vst [vmem:[%s8291_s17 + $0xb0] sm:$0xff] %v4563_v15  ;;  %v4470_v41 = vpop.f32.mrf.mxu1  ;;  %v4570_v3 = vsel %vm4506_vm10, %v4402_v51, %v4538_v61 }
 0xb66   : > { %v4564_v16 = vsel %vm4500_vm9, %v4465_v38, %v4532_v50  ;;  %vm4503_vm11 = vcmp.ge.f32.partialorder %v4469_v26, 0.0  ;;  %v4535_v37 = vmul.f32 0.01, %v4469_v26  ;;  %v4471_v58 = vadd.f32 %v4470_v41, %v8322_v31  ;;  %4602 = vst [vmem:[%s8291_s17 + $0xe8] sm:$0xff] %v4570_v3 }
 0xb67   : > { %4596 = vst [vmem:[%s8291_s17 + $0xb8] sm:$0xff] %v4564_v16  ;;  %v4472_v9 = vpop.f32.mrf.mxu1 }
 0xb68   : > { %v4567_v10 = vsel %vm4503_vm11, %v4469_v26, %v4535_v37  ;;  %vm4504_vm12 = vcmp.ge.f32.partialorder %v4471_v58, 0.0  ;;  %v4536_v6 = vmul.f32 0.01, %v4471_v58  ;;  %v4473_v42 = vadd.f32 %v4472_v9, %v4296_v59 }
 0xb69   : > { %4599 = vst [vmem:[%s8291_s17 + $0xd0] sm:$0xff] %v4567_v10  ;;  %v4474_v39 = vpop.f32.mrf.mxu1 }
 0xb6a   : > { %v4568_v53 = vsel %vm4504_vm12, %v4471_v58, %v4536_v6  ;;  %vm4507_vm13 = vcmp.ge.f32.partialorder %v4473_v42, 0.0  ;;  %v4539_v12 = vmul.f32 0.01, %v4473_v42  ;;  %v4475_v14 = vadd.f32 %v4474_v39, %v4296_v59 }
 0xb6b   : > { %4600 = vst [vmem:[%s8291_s17 + $0xd8] sm:$0xff] %v4568_v53 }
 0xb6c   : > { %v4571_v24 = vsel %vm4507_vm13, %v4473_v42, %v4539_v12  ;;  %vm4508_vm14 = vcmp.ge.f32.partialorder %v4475_v14, 0.0  ;;  %v4540_v62 = vmul.f32 0.01, %v4475_v14 }
 0xb6d   : > { %4603 = vst [vmem:[%s8291_s17 + $0xf0] sm:$0xff] %v4571_v24 }
 0xb6e   : > { %v4572_v55 = vsel %vm4508_vm14, %v4475_v14, %v4540_v62 }
 0xb6f   : > { %4604 = vst [vmem:[%s8291_s17 + $0xf8] sm:$0xff] %v4572_v55 }
 0xb70   : > { %5359 = shalt.err (!%p5356_p5)
}
 0xb71   : > { %s5360_s20 = scalar_lea.hbm %s8352_s13, 4096  ;;  %s5364_s17 = scalar_lea.hbm %s8414_s9, 8192 }
 0xb72   : > { %p5361_p6 = scmp.ne.s32.totalorder %s8352_s13, %s5360_s20  ;;  %p5365_p10 = scmp.lt.s32.totalorder %s8352_s13, %s8414_s9 }
 0xb73   : > { %p5366_p11 = scmp.lt.s32.totalorder %s5364_s17, %s5360_s20 }
 0xb74   : > { %p5362_p7 = pnand %p5361_p6, %p5518_p4 }
 0xb75   : > { %p5367_p12 = por %p5366_p11, %p5365_p10 }
 0xb76   : > { %p5363_p9 = pneg %p5362_p7 }
 0xb78   : > { %p5368_p13 = pnand %p5367_p12, %p5363_p9 }
 0xb7a   : > { %5371 = shalt.err (!%p5368_p13)
}
 0xb7b   : > { %s5426_s18 = smov 512   ;;  %s5427_s28 = smov 32  }
 0xb7c   : > { %4927 = dma.vmem_to_hbm [thread:$0]  (%p5518_p4), %s8354_s26, 4096, %s8352_s13, %s8360_s12, %s5426_s18, %s5426_s18, %s5427_s28  }
 0xb7d PF: > { %p4933_p0 = scmp.ge.s32.totalorder %s5422_s14, 2  ;;  %s4636_s29 = sand.u32 1, %s5402_s30  }
 0xb7e   : > { %s4637_s15 = scalar_lea.sflag [#allocation3], %s4636_s29 }
 0xb7f   : > { %p4930_p1 = pnand %p4933_p0, %p5525_p8 }
 0xb81   : > { %p4931_p2 = pneg %p4930_p1 }
 0xb83   : > { %5397 = dma.done.wait (%p4931_p2), %s4637_s15, 4096  }
 0xb84   : > { %5399 = vsyncadd (%p4931_p2), %s4637_s15, 4294963200  ;;  %s22_s14 = sadd.s32 1, %s5422_s14   ;;  %s9442_s12 = sld [smem:[#allocation5_spill]] }
 0xb85   : > { %p19_p3 = scmp.ge.s32.totalorder %s22_s14, 4   ;;  %s9443_s13 = sld [smem:[#allocation6_spill]] }
 0xb86   : > { %s9444_s30 = smov %s5406_s10  ;;  %s9445_s10 = smov %s5410_s11 }
 0xb87   : > { %s9446_s11 = smov %s5531_s22  ;;  %21 = sbr.rel (!%p19_p3) target bundleno = 4 (0x4), region = 103 }
 0xb8c   :  { %4642 = vsyncpa [#allocation3], 1 }
 0xb8d   :  { %4644 = vsyncpa [#allocation3 + $0x1], 1 }

</bundles_post_ra>
